<compile_context>
chip_gen: v6e
topology: v6e:2x2x1
jax: 0.10.0
libtpu: 0.0.40
codegen_flags: <defaults>
</compile_context>

<pallas_src>
import functools

import jax
import jax.numpy as jnp
from jax.experimental import pallas as pl
from jax.experimental.pallas import tpu as pltpu

_VMEM_LIMIT = 32 * 1024 * 1024  # explicit; safe on v5e/v6e (128 MiB) and v7x (64 MiB)


# --------------------------------------------------------------------------- #
# Kernels
# --------------------------------------------------------------------------- #
def _im2col_dot(xp_ref, w_ref, *, H, W, K, Cin):
    """Same-padded KxK conv as a single MXU contraction.

    xp_ref: (1, H+K-1, W+K-1, Cin) zero-padded input block (one batch element).
    w_ref:  (K*K*Cin, Cout) flattened HWIO weights.
    Returns the conv output as (H*W, Cout) f32.
    """
    cols = []
    for kh in range(K):
        for kw in range(K):
            cols.append(xp_ref[0, kh:kh + H, kw:kw + W, :].reshape(H * W, Cin))
    patches = jnp.concatenate(cols, axis=-1)               # (H*W, K*K*Cin)
    return jnp.dot(patches, w_ref[...], preferred_element_type=jnp.float32)


def _conv_stats_kernel(xp_ref, w_ref, out_ref, sum_ref, sq_ref,
                       *, H, W, K, Cin, Cout, pool):
    """Conv (bias dropped: cancels through training-mode BN), optional 2x2
    max-pool, lane-dense flattened store, and per-batch BN partial sums."""
    conv = _im2col_dot(xp_ref, w_ref, H=H, W=W, K=K, Cin=Cin)   # (H*W, Cout)

    if pool:
        Hp, Wp = H // 2, W // 2
        c4 = conv.reshape(Hp, 2, Wp, 2, Cout)
        y3 = jnp.maximum(jnp.maximum(c4[:, 0, :, 0, :], c4[:, 0, :, 1, :]),
                         jnp.maximum(c4[:, 1, :, 0, :], c4[:, 1, :, 1, :]))
        yf = y3.reshape(Hp * Wp, Cout)
        out_ref[0] = y3.reshape(Hp, Wp * Cout)                  # lane-dense store
    else:
        yf = conv
        out_ref[0] = conv.reshape(H, W * Cout)                  # lane-dense store

    # Per-batch partial sums so the batch grid axis can stay "parallel".
    sum_ref[0] = yf.sum(axis=0, keepdims=True)
    sq_ref[0] = (yf * yf).sum(axis=0, keepdims=True)


def _conv_bias_kernel(xp_ref, w_ref, b_ref, out_ref, *, H, W, K, Cin, Cout):
    """Plain Conv2d('same') + bias (final layer; no BN so the bias is kept)."""
    conv = _im2col_dot(xp_ref, w_ref, H=H, W=W, K=K, Cin=Cin) + b_ref[...]
    out_ref[0] = conv.reshape(H, W * Cout)


def _bn_relu_kernel(x_ref, scale_ref, shift_ref, o_ref):
    """Fused affine-normalize + ReLU on the flattened (rows, W*C) layout."""
    o_ref[...] = jnp.maximum(x_ref[...] * scale_ref[...] + shift_ref[...], 0.0)


# --------------------------------------------------------------------------- #
# Layer wrappers (NHWC in / NHWC out; NCHW only at the network boundary)
# --------------------------------------------------------------------------- #
def _pad_same(x_nhwc, K):
    pad_lo = (K - 1) // 2
    pad_hi = (K - 1) - pad_lo
    return jnp.pad(x_nhwc, ((0, 0), (pad_lo, pad_hi), (pad_lo, pad_hi), (0, 0)))


def conv_bn_relu(x_nhwc, w_hwio, gamma, beta, *, pool=False, upsample=False, eps=1e-5):
    """Conv2d('same') [-> MaxPool2d(2)] -> BatchNorm2d -> ReLU [-> Upsample(x2)]."""
    N, H, W, Cin = x_nhwc.shape
    K = w_hwio.shape[0]
    Cout = w_hwio.shape[-1]
    if pool:
        assert H % 2 == 0 and W % 2 == 0, "MaxPool2d(2) assumes even spatial dims"
    Ho, Wo = (H // 2, W // 2) if pool else (H, W)

    xp = _pad_same(x_nhwc.astype(jnp.float32), K)
    Hpad, Wpad = H + K - 1, W + K - 1
    w2 = w_hwio.astype(jnp.float32).reshape(K * K * Cin, Cout)

    kernel = functools.partial(_conv_stats_kernel,
                               H=H, W=W, K=K, Cin=Cin, Cout=Cout, pool=pool)
    conv_flat, csum, csq = pl.pallas_call(
        kernel,
        out_shape=(jax.ShapeDtypeStruct((N, Ho, Wo * Cout), jnp.float32),
                   jax.ShapeDtypeStruct((N, 1, Cout), jnp.float32),
                   jax.ShapeDtypeStruct((N, 1, Cout), jnp.float32)),
        grid=(N,),
        in_specs=[pl.BlockSpec((1, Hpad, Wpad, Cin), lambda n: (n, 0, 0, 0)),
                  pl.BlockSpec((K * K * Cin, Cout), lambda n: (0, 0))],
        out_specs=(pl.BlockSpec((1, Ho, Wo * Cout), lambda n: (n, 0, 0)),
                   pl.BlockSpec((1, 1, Cout), lambda n: (n, 0, 0)),
                   pl.BlockSpec((1, 1, Cout), lambda n: (n, 0, 0))),
        compiler_params=pltpu.CompilerParams(
            dimension_semantics=("parallel",),     # per-batch partials -> megacore OK
            vmem_limit_bytes=_VMEM_LIMIT),
    )(xp, w2)

    # BatchNorm2d (training mode): per-channel mean / biased variance over (N,Ho,Wo).
    # For the upsample case the stats of the nearest-upsampled tensor equal the
    # stats of the pre-upsample tensor, so they are computed on the small one.
    cnt = jnp.float32(N * Ho * Wo)
    mean = csum.sum(axis=0) / cnt                               # (1, Cout)
    var = jnp.maximum(csq.sum(axis=0) / cnt - mean * mean, 0.0)  # clamp: cancellation
    invstd = jax.lax.rsqrt(var + eps)
    scale = gamma.reshape(1, Cout).astype(jnp.float32) * invstd
    shift = beta.reshape(1, Cout).astype(jnp.float32) - mean * scale
    scale_row = jnp.tile(scale, (1, Wo))           # matches the (.., Wo*Cout) layout
    shift_row = jnp.tile(shift, (1, Wo))

    # Fused BN + ReLU over the whole tensor as one flattened, lane-dense 2D block.
    R, L = N * Ho, Wo * Cout
    y2d = pl.pallas_call(
        _bn_relu_kernel,
        out_shape=jax.ShapeDtypeStruct((R, L), jnp.float32),
        grid=(1,),
        in_specs=[pl.BlockSpec((R, L), lambda i: (0, 0)),
                  pl.BlockSpec((1, L), lambda i: (0, 0)),
                  pl.BlockSpec((1, L), lambda i: (0, 0))],
        out_specs=pl.BlockSpec((R, L), lambda i: (0, 0)),
        compiler_params=pltpu.CompilerParams(
            dimension_semantics=("arbitrary",),
            vmem_limit_bytes=_VMEM_LIMIT),
    )(conv_flat.reshape(R, L), scale_row, shift_row)

    y = y2d.reshape(N, Ho, Wo, Cout)
    if upsample:
        # nn.Upsample(scale_factor=2) (nearest); BN+ReLU commute with replication.
        # TODO(synk): fuse the 2x replication into the BN+ReLU store.
        y = jnp.repeat(jnp.repeat(y, 2, axis=1), 2, axis=2)
    return y


def conv2d_same(x_nhwc, w_hwio, bias):
    """Final Conv2d(padding='same') with bias."""
    N, H, W, Cin = x_nhwc.shape
    K = w_hwio.shape[0]
    Cout = w_hwio.shape[-1]
    xp = _pad_same(x_nhwc.astype(jnp.float32), K)
    Hpad, Wpad = H + K - 1, W + K - 1
    w2 = w_hwio.astype(jnp.float32).reshape(K * K * Cin, Cout)
    b2 = bias.astype(jnp.float32).reshape(1, Cout)

    kernel = functools.partial(_conv_bias_kernel, H=H, W=W, K=K, Cin=Cin, Cout=Cout)
    y = pl.pallas_call(
        kernel,
        out_shape=jax.ShapeDtypeStruct((N, H, W * Cout), jnp.float32),
        grid=(N,),
        in_specs=[pl.BlockSpec((1, Hpad, Wpad, Cin), lambda n: (n, 0, 0, 0)),
                  pl.BlockSpec((K * K * Cin, Cout), lambda n: (0, 0)),
                  pl.BlockSpec((1, Cout), lambda n: (0, 0))],
        out_specs=pl.BlockSpec((1, H, W * Cout), lambda n: (n, 0, 0)),
        compiler_params=pltpu.CompilerParams(
            dimension_semantics=("parallel",),
            vmem_limit_bytes=_VMEM_LIMIT),
    )(xp, w2, b2)
    return y.reshape(N, H, W, Cout)


def custom_unet_forward(x_nchw, p, *, eps=1e-5):
    """CustomUNET.forward: (N, in_channels, H, W) -> (N, num_colors, H, W).

    Conv biases b1..b5 are intentionally unused: they cancel exactly through the
    training-mode BatchNorm that follows each of those convolutions."""
    x = jnp.transpose(x_nchw, (0, 2, 3, 1)).astype(jnp.float32)   # NCHW -> NHWC once
    first = conv_bn_relu(x, p["w1"], p["g1"], p["be1"], pool=True, eps=eps)
    second = conv_bn_relu(first, p["w2"], p["g2"], p["be2"], pool=True, eps=eps)
    third = conv_bn_relu(second, p["w3"], p["g3"], p["be3"], eps=eps)
    fourth = conv_bn_relu(jnp.concatenate([second, third], axis=-1),
                          p["w4"], p["g4"], p["be4"], upsample=True, eps=eps)
    fifth = conv_bn_relu(jnp.concatenate([first, fourth], axis=-1),
                         p["w5"], p["g5"], p["be5"], upsample=True, eps=eps)
    sixth = conv2d_same(jnp.concatenate([x, fifth], axis=-1), p["w6"], p["b6"])
    return jnp.transpose(sixth, (0, 3, 1, 2))                     # NHWC -> NCHW


# --------------------------------------------------------------------------- #
# Pure-JAX reference (matches the PyTorch module, training-mode BN)
# --------------------------------------------------------------------------- #
def _conv_same_nchw(x, w_hwio, b):
    K = w_hwio.shape[0]
    pad_lo = (K - 1) // 2
    pad_hi = (K - 1) - pad_lo
    w_oihw = jnp.transpose(w_hwio, (3, 2, 0, 1))
    y = jax.lax.conv_general_dilated(
        x, w_oihw, window_strides=(1, 1),
        padding=((pad_lo, pad_hi), (pad_lo, pad_hi)),
        dimension_numbers=("NCHW", "OIHW", "NCHW"))
    return y + b[None, :, None, None]


def _bn_relu_ref(x, gamma, beta, eps=1e-5):
    mean = x.mean(axis=(0, 2, 3), keepdims=True)
    var = ((x - mean) ** 2).mean(axis=(0, 2, 3), keepdims=True)
    y = ((x - mean) * jax.lax.rsqrt(var + eps)
         * gamma[None, :, None, None] + beta[None, :, None, None])
    return jnp.maximum(y, 0.0)


def unet_reference(x, p, eps=1e-5):
    def down(h, w, b, g, be):
        c = _conv_same_nchw(h, w, b)
        pooled = jax.lax.reduce_window(c, -jnp.inf, jax.lax.max,
                                       (1, 1, 2, 2), (1, 1, 2, 2), "VALID")
        return _bn_relu_ref(pooled, g, be, eps)

    def bottleneck(h, w, b, g, be):
        return _bn_relu_ref(_conv_same_nchw(h, w, b), g, be, eps)

    def up(h, w, b, g, be):
        c = _conv_same_nchw(h, w, b)
        u = jnp.repeat(jnp.repeat(c, 2, axis=2), 2, axis=3)
        return _bn_relu_ref(u, g, be, eps)

    first = down(x, p["w1"], p["b1"], p["g1"], p["be1"])
    second = down(first, p["w2"], p["b2"], p["g2"], p["be2"])
    third = bottleneck(second, p["w3"], p["b3"], p["g3"], p["be3"])
    fourth = up(jnp.concatenate([second, third], axis=1),
                p["w4"], p["b4"], p["g4"], p["be4"])
    fifth = up(jnp.concatenate([first, fourth], axis=1),
               p["w5"], p["b5"], p["g5"], p["be5"])
    return _conv_same_nchw(jnp.concatenate([x, fifth], axis=1), p["w6"], p["b6"])


# --------------------------------------------------------------------------- #
# Test
# --------------------------------------------------------------------------- #
def _init_params(key, K, in_channels, num_filters, num_colors):
    nf = num_filters
    specs = {
        "w1": (K, K, in_channels, nf), "b1": (nf,), "g1": (nf,), "be1": (nf,),
        "w2": (K, K, nf, 2 * nf), "b2": (2 * nf,), "g2": (2 * nf,), "be2": (2 * nf,),
        "w3": (K, K, 2 * nf, 2 * nf), "b3": (2 * nf,), "g3": (2 * nf,), "be3": (2 * nf,),
        "w4": (K, K, 4 * nf, nf), "b4": (nf,), "g4": (nf,), "be4": (nf,),
        "w5": (K, K, 2 * nf, num_colors), "b5": (num_colors,),
        "g5": (num_colors,), "be5": (num_colors,),
        "w6": (K, K, in_channels + num_colors, num_colors), "b6": (num_colors,),
    }
    params = {}
    for (name, shape), k in zip(specs.items(), jax.random.split(key, len(specs))):
        if name.startswith("w"):
            params[name] = jax.random.normal(k, shape, jnp.float32) * 0.2
        elif name.startswith("g"):
            params[name] = 1.0 + 0.1 * jax.random.normal(k, shape, jnp.float32)
        else:  # conv biases b* and BN betas be*
            params[name] = 0.1 * jax.random.normal(k, shape, jnp.float32)
    return params


if __name__ == "__main__":
    N, H, W = 2, 16, 16
    in_channels, num_filters, num_colors, K = 1, 4, 3, 3

    key = jax.random.PRNGKey(0)
    kx, kp = jax.random.split(key)
    x = jax.random.normal(kx, (N, in_channels, H, W), jnp.float32)
    params = _init_params(kp, K, in_channels, num_filters, num_colors)

    out = custom_unet_forward(x, params)
    out = jax.block_until_ready(out)
    assert out.shape == (N, num_colors, H, W), out.shape

    ref = unet_reference(x, params)
    err = float(jnp.max(jnp.abs(out - ref)))
    assert jnp.allclose(out, ref, atol=5e-3, rtol=5e-3), err

    print("KERNEL_OK")
</pallas_src>

<mosaic_0001>
module attributes {stable_mosaic.version = 11 : i64} {
  func.func @_conv_stats_kernel(%arg0: i32, %arg1: memref<1x18x18x1xf32, #tpu.memory_space<vmem>>, %arg2: memref<9x4xf32, #tpu.memory_space<vmem>>, %arg3: memref<1x8x32xf32, #tpu.memory_space<vmem>>, %arg4: memref<1x1x4xf32, #tpu.memory_space<vmem>>, %arg5: memref<1x1x4xf32, #tpu.memory_space<vmem>>) attributes {dimension_semantics = [#tpu.dimension_semantics<parallel>], iteration_bounds = array<i64: 2>, scalar_prefetch = 0 : i64, scratch_operands = 0 : i64, tpu.core_type = #tpu.core_type<tc>, window_params = [{transform_indices = @transform_0, window_bounds = array<i64: 1, 18, 18, 1>}, {pipeline_mode = #tpu.pipeline_mode<synchronous>, transform_indices = @transform_1, window_bounds = array<i64: 9, 4>}, {transform_indices = @transform_2, window_bounds = array<i64: 1, 8, 32>}, {transform_indices = @transform_3, window_bounds = array<i64: 1, 1, 4>}, {transform_indices = @transform_4, window_bounds = array<i64: 1, 1, 4>}]} {
    %c0 = arith.constant 0 : index
    %c0_0 = arith.constant 0 : index
    %c0_1 = arith.constant 0 : index
    %c0_2 = arith.constant 0 : index
    %0 = vector.load %arg1[%c0, %c0_0, %c0_1, %c0_2] : memref<1x18x18x1xf32, #tpu.memory_space<vmem>>, vector<1x16x16x1xf32>
    %1 = vector.shape_cast %0 : vector<1x16x16x1xf32> to vector<16x16x1xf32>
    %2 = vector.shape_cast %1 : vector<16x16x1xf32> to vector<256x1xf32>
    %c0_3 = arith.constant 0 : index
    %c0_4 = arith.constant 0 : index
    %c1 = arith.constant 1 : index
    %c0_5 = arith.constant 0 : index
    %3 = vector.load %arg1[%c0_3, %c0_4, %c1, %c0_5] : memref<1x18x18x1xf32, #tpu.memory_space<vmem>>, vector<1x16x16x1xf32>
    %4 = vector.shape_cast %3 : vector<1x16x16x1xf32> to vector<16x16x1xf32>
    %5 = vector.shape_cast %4 : vector<16x16x1xf32> to vector<256x1xf32>
    %c0_6 = arith.constant 0 : index
    %c0_7 = arith.constant 0 : index
    %c2 = arith.constant 2 : index
    %c0_8 = arith.constant 0 : index
    %6 = vector.load %arg1[%c0_6, %c0_7, %c2, %c0_8] : memref<1x18x18x1xf32, #tpu.memory_space<vmem>>, vector<1x16x16x1xf32>
    %7 = vector.shape_cast %6 : vector<1x16x16x1xf32> to vector<16x16x1xf32>
    %8 = vector.shape_cast %7 : vector<16x16x1xf32> to vector<256x1xf32>
    %c0_9 = arith.constant 0 : index
    %c1_10 = arith.constant 1 : index
    %c0_11 = arith.constant 0 : index
    %c0_12 = arith.constant 0 : index
    %9 = vector.load %arg1[%c0_9, %c1_10, %c0_11, %c0_12] : memref<1x18x18x1xf32, #tpu.memory_space<vmem>>, vector<1x16x16x1xf32>
    %10 = vector.shape_cast %9 : vector<1x16x16x1xf32> to vector<16x16x1xf32>
    %11 = vector.shape_cast %10 : vector<16x16x1xf32> to vector<256x1xf32>
    %c0_13 = arith.constant 0 : index
    %c1_14 = arith.constant 1 : index
    %c1_15 = arith.constant 1 : index
    %c0_16 = arith.constant 0 : index
    %12 = vector.load %arg1[%c0_13, %c1_14, %c1_15, %c0_16] : memref<1x18x18x1xf32, #tpu.memory_space<vmem>>, vector<1x16x16x1xf32>
    %13 = vector.shape_cast %12 : vector<1x16x16x1xf32> to vector<16x16x1xf32>
    %14 = vector.shape_cast %13 : vector<16x16x1xf32> to vector<256x1xf32>
    %c0_17 = arith.constant 0 : index
    %c1_18 = arith.constant 1 : index
    %c2_19 = arith.constant 2 : index
    %c0_20 = arith.constant 0 : index
    %15 = vector.load %arg1[%c0_17, %c1_18, %c2_19, %c0_20] : memref<1x18x18x1xf32, #tpu.memory_space<vmem>>, vector<1x16x16x1xf32>
    %16 = vector.shape_cast %15 : vector<1x16x16x1xf32> to vector<16x16x1xf32>
    %17 = vector.shape_cast %16 : vector<16x16x1xf32> to vector<256x1xf32>
    %c0_21 = arith.constant 0 : index
    %c2_22 = arith.constant 2 : index
    %c0_23 = arith.constant 0 : index
    %c0_24 = arith.constant 0 : index
    %18 = vector.load %arg1[%c0_21, %c2_22, %c0_23, %c0_24] : memref<1x18x18x1xf32, #tpu.memory_space<vmem>>, vector<1x16x16x1xf32>
    %19 = vector.shape_cast %18 : vector<1x16x16x1xf32> to vector<16x16x1xf32>
    %20 = vector.shape_cast %19 : vector<16x16x1xf32> to vector<256x1xf32>
    %c0_25 = arith.constant 0 : index
    %c2_26 = arith.constant 2 : index
    %c1_27 = arith.constant 1 : index
    %c0_28 = arith.constant 0 : index
    %21 = vector.load %arg1[%c0_25, %c2_26, %c1_27, %c0_28] : memref<1x18x18x1xf32, #tpu.memory_space<vmem>>, vector<1x16x16x1xf32>
    %22 = vector.shape_cast %21 : vector<1x16x16x1xf32> to vector<16x16x1xf32>
    %23 = vector.shape_cast %22 : vector<16x16x1xf32> to vector<256x1xf32>
    %c0_29 = arith.constant 0 : index
    %c2_30 = arith.constant 2 : index
    %c2_31 = arith.constant 2 : index
    %c0_32 = arith.constant 0 : index
    %24 = vector.load %arg1[%c0_29, %c2_30, %c2_31, %c0_32] : memref<1x18x18x1xf32, #tpu.memory_space<vmem>>, vector<1x16x16x1xf32>
    %25 = vector.shape_cast %24 : vector<1x16x16x1xf32> to vector<16x16x1xf32>
    %26 = vector.shape_cast %25 : vector<16x16x1xf32> to vector<256x1xf32>
    %27 = tpu.concatenate %2, %5, %8, %11, %14, %17, %20, %23, %26 in 1 : vector<256x1xf32>, vector<256x1xf32>, vector<256x1xf32>, vector<256x1xf32>, vector<256x1xf32>, vector<256x1xf32>, vector<256x1xf32>, vector<256x1xf32>, vector<256x1xf32> -> vector<256x9xf32>
    %c0_33 = arith.constant 0 : index
    %c0_34 = arith.constant 0 : index
    %28 = vector.load %arg2[%c0_33, %c0_34] : memref<9x4xf32, #tpu.memory_space<vmem>>, vector<9x4xf32>
    %cst = arith.constant dense<0.000000e+00> : vector<256x4xf32>
    %29 = tpu.matmul %27, %28, %cst {dimension_numbers = #tpu.dot_dimension_numbers<[1], [0], [0], [1], [0, 0, 1, 1], [], []>} : vector<256x9xf32>, vector<9x4xf32>, vector<256x4xf32> -> vector<256x4xf32>
    %30 = vector.shape_cast %29 : vector<256x4xf32> to vector<8x2x8x2x4xf32>
    %31 = vector.extract_strided_slice %30 {offsets = [0, 0, 0, 0, 0], sizes = [8, 1, 8, 1, 4], strides = [1, 1, 1, 1, 1]} : vector<8x2x8x2x4xf32> to vector<8x1x8x1x4xf32>
    %32 = vector.shape_cast %31 : vector<8x1x8x1x4xf32> to vector<8x8x4xf32>
    %33 = vector.extract_strided_slice %30 {offsets = [0, 0, 0, 1, 0], sizes = [8, 1, 8, 1, 4], strides = [1, 1, 1, 1, 1]} : vector<8x2x8x2x4xf32> to vector<8x1x8x1x4xf32>
    %34 = vector.shape_cast %33 : vector<8x1x8x1x4xf32> to vector<8x8x4xf32>
    %35 = arith.maximumf %32, %34 : vector<8x8x4xf32>
    %36 = vector.extract_strided_slice %30 {offsets = [0, 1, 0, 0, 0], sizes = [8, 1, 8, 1, 4], strides = [1, 1, 1, 1, 1]} : vector<8x2x8x2x4xf32> to vector<8x1x8x1x4xf32>
    %37 = vector.shape_cast %36 : vector<8x1x8x1x4xf32> to vector<8x8x4xf32>
    %38 = vector.extract_strided_slice %30 {offsets = [0, 1, 0, 1, 0], sizes = [8, 1, 8, 1, 4], strides = [1, 1, 1, 1, 1]} : vector<8x2x8x2x4xf32> to vector<8x1x8x1x4xf32>
    %39 = vector.shape_cast %38 : vector<8x1x8x1x4xf32> to vector<8x8x4xf32>
    %40 = arith.maximumf %37, %39 : vector<8x8x4xf32>
    %41 = arith.maximumf %35, %40 : vector<8x8x4xf32>
    %42 = vector.shape_cast %41 : vector<8x8x4xf32> to vector<64x4xf32>
    %43 = vector.shape_cast %41 : vector<8x8x4xf32> to vector<8x32xf32>
    %c0_35 = arith.constant 0 : index
    %c0_36 = arith.constant 0 : index
    %c0_37 = arith.constant 0 : index
    %44 = vector.load %arg3[%c0_35, %c0_36, %c0_37] : memref<1x8x32xf32, #tpu.memory_space<vmem>>, vector<1x8x32xf32>
    %45 = vector.shape_cast %44 : vector<1x8x32xf32> to vector<8x32xf32>
    %46 = vector.shape_cast %43 : vector<8x32xf32> to vector<1x8x32xf32>
    tpu.vector_store %arg3[%c0_35, %c0_36, %c0_37], %46 {strides = array<i32>} : memref<1x8x32xf32, #tpu.memory_space<vmem>>, vector<1x8x32xf32>,
    %cst_38 = arith.constant dense<0.000000e+00> : vector<4xf32>
    %47 = vector.multi_reduction <add>, %42, %cst_38 [0] : vector<64x4xf32> to vector<4xf32>
    %48 = vector.shape_cast %47 : vector<4xf32> to vector<1x4xf32>
    %c0_39 = arith.constant 0 : index
    %c0_40 = arith.constant 0 : index
    %c0_41 = arith.constant 0 : index
    %49 = vector.load %arg4[%c0_39, %c0_40, %c0_41] : memref<1x1x4xf32, #tpu.memory_space<vmem>>, vector<1x1x4xf32>
    %50 = vector.shape_cast %49 : vector<1x1x4xf32> to vector<1x4xf32>
    %51 = vector.shape_cast %48 : vector<1x4xf32> to vector<1x1x4xf32>
    tpu.vector_store %arg4[%c0_39, %c0_40, %c0_41], %51 {strides = array<i32>} : memref<1x1x4xf32, #tpu.memory_space<vmem>>, vector<1x1x4xf32>,
    %52 = arith.mulf %42, %42 : vector<64x4xf32>
    %cst_42 = arith.constant dense<0.000000e+00> : vector<4xf32>
    %53 = vector.multi_reduction <add>, %52, %cst_42 [0] : vector<64x4xf32> to vector<4xf32>
    %54 = vector.shape_cast %53 : vector<4xf32> to vector<1x4xf32>
    %c0_43 = arith.constant 0 : index
    %c0_44 = arith.constant 0 : index
    %c0_45 = arith.constant 0 : index
    %55 = vector.load %arg5[%c0_43, %c0_44, %c0_45] : memref<1x1x4xf32, #tpu.memory_space<vmem>>, vector<1x1x4xf32>
    %56 = vector.shape_cast %55 : vector<1x1x4xf32> to vector<1x4xf32>
    %57 = vector.shape_cast %54 : vector<1x4xf32> to vector<1x1x4xf32>
    tpu.vector_store %arg5[%c0_43, %c0_44, %c0_45], %57 {strides = array<i32>} : memref<1x1x4xf32, #tpu.memory_space<vmem>>, vector<1x1x4xf32>,
    return
  }
  func.func @transform_0(%arg0: i32) -> (i32, i32, i32, i32) {
    %c0_i32 = arith.constant 0 : i32
    %c0_i32_0 = arith.constant 0 : i32
    %c0_i32_1 = arith.constant 0 : i32
    %c0_i32_2 = arith.constant 0 : i32
    return %arg0, %c0_i32, %c0_i32_0, %c0_i32_1 : i32, i32, i32, i32
  }
  func.func @transform_1(%arg0: i32) -> (i32, i32) {
    %c0_i32 = arith.constant 0 : i32
    %c0_i32_0 = arith.constant 0 : i32
    %c0_i32_1 = arith.constant 0 : i32
    return %c0_i32, %c0_i32_0 : i32, i32
  }
  func.func @transform_2(%arg0: i32) -> (i32, i32, i32) {
    %c0_i32 = arith.constant 0 : i32
    %c0_i32_0 = arith.constant 0 : i32
    %c0_i32_1 = arith.constant 0 : i32
    return %arg0, %c0_i32, %c0_i32_0 : i32, i32, i32
  }
  func.func @transform_3(%arg0: i32) -> (i32, i32, i32) {
    %c0_i32 = arith.constant 0 : i32
    %c0_i32_0 = arith.constant 0 : i32
    %c0_i32_1 = arith.constant 0 : i32
    return %arg0, %c0_i32, %c0_i32_0 : i32, i32, i32
  }
  func.func @transform_4(%arg0: i32) -> (i32, i32, i32) {
    %c0_i32 = arith.constant 0 : i32
    %c0_i32_0 = arith.constant 0 : i32
    %c0_i32_1 = arith.constant 0 : i32
    return %arg0, %c0_i32, %c0_i32_0 : i32, i32, i32
  }
}

</mosaic_0001>

<bundles_post_ra>
// kernel: tpu_custom_call.1
= control target key start
LH: loop header
LB: loop body
LE: loop exit
PB: predicated region body
PF: predicated region fallthrough
CT: control target
= control target key end

     0   :  { %10 = vsyncpa [#allocation3], 0  ;;  %s8716_s0 = inlined_call_operand.vmem [shape: f32[2,18,18,1], index: 0, kind: input, shape index: {}]   ;;  %s8717_s1 = inlined_call_operand.vmem [shape: f32[9,4], index: 1, kind: input, shape index: {}]   ;;  %s8718_s2 = inlined_call_operand.hbm [shape: f32[2,8,32], index: 2, kind: output, shape index: {0}]   ;;  %s8719_s3 = inlined_call_operand.hbm [shape: f32[2,1,4], index: 3, kind: output, shape index: {1}]   ;;  %s8720_s4 = inlined_call_operand.hbm [shape: f32[2,1,4], index: 4, kind: output, shape index: {2}]  }
   0x1   :  { %12 = vsyncpa [#allocation3 + $0x1], 0 }
   0x2   :  { %13 = vsyncpa [#allocation5], 0 }
   0x3   :  { %15 = vsyncpa [#allocation5 + $0x1], 0  ;;  %s5735_s15 = smov 0   ;;  %s5737_s16 = smov 0  }
   0x4   :  { %s5739_s17 = smov 0   ;;  %s5741_s18 = smov 0  }
   0x5 LB: > { %s5756_s19 = sadd.s32 4294967295, %s5690_s18   ;;  %s5046_s20 = sadd.s32 4294967294, %s5690_s18   ;;  %s5690_s18 = sphi %s5741_s18, %s8900_s18   ;;  %s5686_s17 = sphi %s5739_s17, %s8899_s17   ;;  %s5682_s16 = sphi %s5737_s16, %s8898_s16   ;;  %s5678_s15 = sphi %s5735_s15, %s8897_s15  }
   0x6   : > { %s5760_s21 = sadd.s32 1, %s5690_s18   ;;  %s75_s22 = sadd.s32 1, %s5686_s17 }
   0x7   : > { %s72_s23 = ssub.s32 %s5690_s18, %s5760_s21  ;;  %p85_p0 = scmp.ne.s32.totalorder %s5686_s17, %s5682_s16 }
   0x8   : > { %p73_p1 = scmp.eq.s32.totalorder %s72_s23, 0  ;;  %p86_p2 = scmp.eq.s32.totalorder %s5756_s19, 1 }
   0x9   : > { %p91_p3 = scmp.ne.s32.totalorder %s5682_s16, %s5678_s15  ;;  %p92_p4 = scmp.eq.s32.totalorder %s5046_s20, 1 }
   0xa   : > { %s5773_s24 = scalar_select %p73_p1, %s5686_s17, %s75_s22  }
   0xb   : > { %p5775_p5 = por %p86_p2, %p85_p0  ;;  %p5779_p6 = por %p92_p4, %p91_p3 }
   0xc   : > { %p5049_p7 = scmp.ge.s32.totalorder %s5690_s18, 1  ;;  %p173_p8 = scmp.lt.s32.totalorder %s5690_s18, 3 }
   0xe   : > { %p174_p9 = pnand %p5049_p7, %p173_p8 }
  0x10   : > { %177 = sbr.rel (%p174_p9) target bundleno = 1038 (0x40e), region = 28 }
  0x15   : > { %p207_p10 = scmp.lt.s32.totalorder %s5756_s19, 1  ;;  %s5692_s6 = smov 1   ;;  %vm1526_vm0 = vcmask 7168   ;;  %vm1889_vm1 = vcmask 1040384   ;;  %vm1559_vm2 = vcmask 15360   ;;  %vm1592_vm3 = vcmask 23552  }
  0x16   : > { %s5693_s7 = smov 2   ;;  %s5694_s8 = smov 3   ;;  %vm1625_vm4 = vcmask 31744   ;;  %vm1658_vm5 = vcmask 39936   ;;  %vm1691_vm6 = vcmask 48128   ;;  %vm1724_vm7 = vcmask 56320  }
  0x17   : > { %s208_s27 = scalar_select %p207_p10, %s5756_s19, 1  ;;  %vm1757_vm8 = vcmask 64512   ;;  %vm1792_vm9 = vcmask 72704   ;;  %vm3468_vm10 = vcmask 1041409   ;;  %vm3462_vm11 = vcmask 1042434  }
  0x18   : > { %s5695_s9 = smov 4   ;;  %s5696_s10 = smov 5   ;;  %vm3470_vm12 = vcmask 1043459   ;;  %vm3463_vm13 = vcmask 1044484   ;;  %vm3472_vm14 = vcmask 1045509   ;;  %vm3465_vm15 = vcmask 1046534  }
  0x19   : > { %s5509_s28 = smul.u32 432, %s208_s27  ;;  %s5697_s11 = smov 6  }
  0x1a   : > { %s5698_s12 = smov 7   ;;  %s5699_s27 = smov 8  }
  0x1b   : > { %s5790_s5 = scalar_lea.vmem %s8716_s0, %s5509_s28  ;;  %s5702_s28 = smov 12  }
  0x1c   : > { %v5793_v0 = vld [vmem:[%s5790_s5 + $0x19] sm:$0xff]  ;;  %v244_v1 = vld [vmem:[%s5790_s5 + $0x1] sm:$0xff]  ;;  %v245_v3 = vld [vmem:[%s5790_s5 + $0x9] sm:$0xff]  ;;  %s5703_s29 = smov 16   ;;  %s5704_s30 = smov 20  }
  0x1d   : > { %538 = vrot.lane.b32.xlu1 %v5793_v0, %s5692_s6  ;;  %534 = vrot.lane.b32.xlu0 %v244_v1, %s5692_s6  ;;  %v5800_v2 = vld [vmem:[%s5790_s5 + $0x21] sm:$0xff]  ;;  %v5807_v4 = vld [vmem:[%s5790_s5 + $0x39] sm:$0xff] }
  0x1e   : > { %v5810_v5 = vld [vmem:[%s5790_s5 + $0x31] sm:$0xff]  ;;  %v5820_v7 = vld [vmem:[%s5790_s5 + $0x49] sm:$0xff]  ;;  %v5830_v9 = vld [vmem:[%s5790_s5 + $0x61] sm:$0xff] }
  0x1f   : > { %v5817_v6 = vld [vmem:[%s5790_s5 + $0x51] sm:$0xff]  ;;  %v5827_v8 = vld [vmem:[%s5790_s5 + $0x69] sm:$0xff]  ;;  %v255_v10 = vld [vmem:[%s5790_s5 + $0x81] sm:$0xff] }
  0x20   : > { %v254_v11 = vld [vmem:[%s5790_s5 + $0x79] sm:$0xff]  ;;  %v256_v13 = vld [vmem:[%s5790_s5 + $0x91] sm:$0xff]  ;;  %v258_v15 = vld [vmem:[%s5790_s5 + $0xa9] sm:$0xff] }
  0x21   : > { %540 = vrot.lane.b32.xlu1 %v5800_v2, %s5692_s6  ;;  %536 = vrot.lane.b32.xlu0 %v245_v3, %s5692_s6  ;;  %v257_v12 = vld [vmem:[%s5790_s5 + $0x99] sm:$0xff]  ;;  %v259_v14 = vld [vmem:[%s5790_s5 + $0xb1] sm:$0xff] }
  0x22   : > { %v261_v16 = vld [vmem:[%s5790_s5 + $0xc9] sm:$0xff]  ;;  %v260_v17 = vld [vmem:[%s5790_s5 + $0xc1] sm:$0xff]  ;;  %v5856_v19 = vld [vmem:[%s5790_s5 + $0xd9] sm:$0xff] }
  0x23   : > { %v5853_v18 = vld [vmem:[%s5790_s5 + $0xe1] sm:$0xff]  ;;  %v5863_v20 = vld [vmem:[%s5790_s5 + $0xf9] sm:$0xff]  ;;  %v5866_v21 = vld [vmem:[%s5790_s5 + $0xf1] sm:$0xff] }
  0x24   : > { %v5873_v22 = vld [vmem:[%s5790_s5 + $0x111] sm:$0xff]  ;;  %v5876_v23 = vld [vmem:[%s5790_s5 + $0x109] sm:$0xff]  ;;  %v5886_v25 = vld [vmem:[%s5790_s5 + $0x121] sm:$0xff] }
  0x25   : > { %544 = vrot.lane.b32.xlu1 %v5807_v4, %s5692_s6  ;;  %542 = vrot.lane.b32.xlu0 %v5810_v5, %s5692_s6  ;;  %v5883_v24 = vld [vmem:[%s5790_s5 + $0x129] sm:$0xff]  ;;  %v271_v26 = vld [vmem:[%s5790_s5 + $0x141] sm:$0xff] }
  0x26   : > { %v5894_v27 = vld [vmem:[%s5790_s5 + $0x139] sm:$0xff]  ;;  %v272_v29 = vld [vmem:[%s5790_s5 + $0x151] sm:$0xff]  ;;  %v274_v31 = vld [vmem:[%s5790_s5 + $0x169] sm:$0xff] }
  0x27   : > { %v273_v28 = vld [vmem:[%s5790_s5 + $0x159] sm:$0xff]  ;;  %v275_v30 = vld [vmem:[%s5790_s5 + $0x171] sm:$0xff]  ;;  %v276_v33 = vld [vmem:[%s5790_s5 + $0x2] sm:$0xff] }
  0x28   : > { %v277_v32 = vld [vmem:[%s5790_s5 + $0xa] sm:$0xff]  ;;  %v5912_v34 = vld [vmem:[%s5790_s5 + $0x22] sm:$0xff]  ;;  %v5915_v35 = vld [vmem:[%s5790_s5 + $0x1a] sm:$0xff] }
  0x29   : > { %548 = vrot.lane.b32.xlu1 %v5817_v6, %s5692_s6  ;;  %546 = vrot.lane.b32.xlu0 %v5820_v7, %s5692_s6  ;;  %v5922_v36 = vld [vmem:[%s5790_s5 + $0x3a] sm:$0xff]  ;;  %v5925_v37 = vld [vmem:[%s5790_s5 + $0x32] sm:$0xff] }
  0x2a   : > { %v5932_v38 = vld [vmem:[%s5790_s5 + $0x52] sm:$0xff]  ;;  %v5935_v39 = vld [vmem:[%s5790_s5 + $0x4a] sm:$0xff]  ;;  %v5945_v41 = vld [vmem:[%s5790_s5 + $0x62] sm:$0xff] }
  0x2b   : > { %v5942_v40 = vld [vmem:[%s5790_s5 + $0x6a] sm:$0xff]  ;;  %v287_v42 = vld [vmem:[%s5790_s5 + $0x82] sm:$0xff]  ;;  %v286_v43 = vld [vmem:[%s5790_s5 + $0x7a] sm:$0xff] }
  0x2c   : > { %v289_v44 = vld [vmem:[%s5790_s5 + $0x9a] sm:$0xff]  ;;  %v288_v45 = vld [vmem:[%s5790_s5 + $0x92] sm:$0xff]  ;;  %v290_v47 = vld [vmem:[%s5790_s5 + $0xaa] sm:$0xff] }
  0x2d   : > { %552 = vrot.lane.b32.xlu1 %v5827_v8, %s5692_s6  ;;  %550 = vrot.lane.b32.xlu0 %v5830_v9, %s5692_s6  ;;  %v291_v46 = vld [vmem:[%s5790_s5 + $0xb2] sm:$0xff]  ;;  %v293_v48 = vld [vmem:[%s5790_s5 + $0xca] sm:$0xff] }
  0x2e   : > { %v292_v49 = vld [vmem:[%s5790_s5 + $0xc2] sm:$0xff]  ;;  %v5971_v51 = vld [vmem:[%s5790_s5 + $0xda] sm:$0xff]  ;;  %v5981_v53 = vld [vmem:[%s5790_s5 + $0xf2] sm:$0xff] }
  0x2f   : > { %v5968_v50 = vld [vmem:[%s5790_s5 + $0xe2] sm:$0xff]  ;;  %v5978_v52 = vld [vmem:[%s5790_s5 + $0xfa] sm:$0xff]  ;;  %v5988_v54 = vld [vmem:[%s5790_s5 + $0x112] sm:$0xff] }
  0x30   : > { %v5991_v55 = vld [vmem:[%s5790_s5 + $0x10a] sm:$0xff]  ;;  %v6001_v57 = vld [vmem:[%s5790_s5 + $0x122] sm:$0xff]  ;;  %v6011_v59 = vld [vmem:[%s5790_s5 + $0x13a] sm:$0xff] }
  0x31   : > { %556 = vrot.lane.b32.xlu1 %v255_v10, %s5692_s6  ;;  %554 = vrot.lane.b32.xlu0 %v254_v11, %s5692_s6  ;;  %v5998_v56 = vld [vmem:[%s5790_s5 + $0x12a] sm:$0xff]  ;;  %v6008_v58 = vld [vmem:[%s5790_s5 + $0x142] sm:$0xff]  ;;  %8744 = vst [vmem:[#allocation10_spill] sm:$0xff] %v6011_v59 }
  0x32   : > { %8743 = vst [vmem:[#allocation9_spill] sm:$0xff] %v6008_v58  ;;  %v305_v62 = vld [vmem:[%s5790_s5 + $0x15a] sm:$0xff]  ;;  %v304_v63 = vld [vmem:[%s5790_s5 + $0x152] sm:$0xff] }
  0x33   : > { %v6030_v10 = vld [vmem:[%s5790_s5 + $0x38] sm:$0xff]  ;;  %v6033_v11 = vld [vmem:[%s5790_s5 + $0x30] sm:$0xff] }
  0x35   : > { %560 = vrot.lane.b32.xlu1 %v257_v12, %s5692_s6  ;;  %558 = vrot.lane.b32.xlu0 %v256_v13, %s5692_s6  ;;  %v307_v12 = vld [vmem:[%s5790_s5 + $0x172] sm:$0xff]  ;;  %v306_v13 = vld [vmem:[%s5790_s5 + $0x16a] sm:$0xff] }
  0x39   : > { %564 = vrot.lane.b32.xlu1 %v259_v14, %s5692_s6  ;;  %562 = vrot.lane.b32.xlu0 %v258_v15, %s5692_s6 }
  0x3d   : > { %568 = vrot.lane.b32.xlu1 %v261_v16, %s5692_s6  ;;  %566 = vrot.lane.b32.xlu0 %v260_v17, %s5692_s6 }
  0x41   : > { %572 = vrot.lane.b32.xlu1 %v5853_v18, %s5692_s6  ;;  %570 = vrot.lane.b32.xlu0 %v5856_v19, %s5692_s6 }
  0x45   : > { %576 = vrot.lane.b32.xlu1 %v5863_v20, %s5692_s6  ;;  %574 = vrot.lane.b32.xlu0 %v5866_v21, %s5692_s6 }
  0x49   : > { %580 = vrot.lane.b32.xlu1 %v5873_v22, %s5692_s6  ;;  %578 = vrot.lane.b32.xlu0 %v5876_v23, %s5692_s6 }
  0x4d   : > { %584 = vrot.lane.b32.xlu1 %v5883_v24, %s5692_s6  ;;  %582 = vrot.lane.b32.xlu0 %v5886_v25, %s5692_s6 }
  0x51   : > { %588 = vrot.lane.b32.xlu1 %v271_v26, %s5692_s6  ;;  %586 = vrot.lane.b32.xlu0 %v5894_v27, %s5692_s6 }
  0x55   : > { %592 = vrot.lane.b32.xlu1 %v273_v28, %s5692_s6  ;;  %590 = vrot.lane.b32.xlu0 %v272_v29, %s5692_s6  ;;  %v6052_v29 = vld [vmem:[%s5790_s5 + $0x18] sm:$0xff] }
  0x56   : > { %8747 = vst [vmem:[#allocation13_spill] sm:$0xff] %v6052_v29 }
  0x59   : > { %596 = vrot.lane.b32.xlu1 %v275_v30, %s5692_s6  ;;  %594 = vrot.lane.b32.xlu0 %v274_v31, %s5692_s6  ;;  %v6055_v30 = vld [vmem:[%s5790_s5 + $0x20] sm:$0xff]  ;;  %s5706_s6 = smov 28  }
  0x5a   : > { %8748 = vst [vmem:[#allocation14_spill] sm:$0xff] %v6055_v30 }
  0x5d   : > { %664 = vrot.lane.b32.xlu1 %v277_v32, %s5693_s7  ;;  %662 = vrot.lane.b32.xlu0 %v276_v33, %s5693_s7 }
  0x61   : > { %668 = vrot.lane.b32.xlu1 %v5912_v34, %s5693_s7  ;;  %666 = vrot.lane.b32.xlu0 %v5915_v35, %s5693_s7 }
  0x65   : > { %672 = vrot.lane.b32.xlu1 %v5922_v36, %s5693_s7  ;;  %670 = vrot.lane.b32.xlu0 %v5925_v37, %s5693_s7 }
  0x69   : > { %676 = vrot.lane.b32.xlu1 %v5932_v38, %s5693_s7  ;;  %674 = vrot.lane.b32.xlu0 %v5935_v39, %s5693_s7 }
  0x6d   : > { %680 = vrot.lane.b32.xlu1 %v5942_v40, %s5693_s7  ;;  %678 = vrot.lane.b32.xlu0 %v5945_v41, %s5693_s7 }
  0x71   : > { %684 = vrot.lane.b32.xlu1 %v287_v42, %s5693_s7  ;;  %682 = vrot.lane.b32.xlu0 %v286_v43, %s5693_s7  ;;  %v6074_v43 = vld [vmem:[%s5790_s5 + $0x50] sm:$0xff] }
  0x75   : > { %688 = vrot.lane.b32.xlu1 %v289_v44, %s5693_s7  ;;  %686 = vrot.lane.b32.xlu0 %v288_v45, %s5693_s7  ;;  %v6077_v44 = vld [vmem:[%s5790_s5 + $0x48] sm:$0xff] }
  0x79   : > { %692 = vrot.lane.b32.xlu1 %v291_v46, %s5693_s7  ;;  %690 = vrot.lane.b32.xlu0 %v290_v47, %s5693_s7  ;;  %v6088_v47 = vld [vmem:[%s5790_s5 + $0x68] sm:$0xff] }
  0x7d   : > { %696 = vrot.lane.b32.xlu1 %v293_v48, %s5693_s7  ;;  %694 = vrot.lane.b32.xlu0 %v292_v49, %s5693_s7  ;;  %v6091_v48 = vld [vmem:[%s5790_s5 + $0x60] sm:$0xff]  ;;  %v6098_v49 = vld [vmem:[%s5790_s5 + $0xd8] sm:$0xff] }
  0x7e   : > { %8749 = vst [vmem:[#allocation15_spill] sm:$0xff] %v6098_v49 }
  0x81   : > { %700 = vrot.lane.b32.xlu1 %v5968_v50, %s5693_s7  ;;  %698 = vrot.lane.b32.xlu0 %v5971_v51, %s5693_s7 }
  0x85   : > { %704 = vrot.lane.b32.xlu1 %v5978_v52, %s5693_s7  ;;  %702 = vrot.lane.b32.xlu0 %v5981_v53, %s5693_s7 }
  0x89   : > { %708 = vrot.lane.b32.xlu1 %v5988_v54, %s5693_s7  ;;  %706 = vrot.lane.b32.xlu0 %v5991_v55, %s5693_s7 }
  0x8d   : > { %712 = vrot.lane.b32.xlu1 %v5998_v56, %s5693_s7  ;;  %710 = vrot.lane.b32.xlu0 %v6001_v57, %s5693_s7 }
  0x8f   : > { %v6013_v60 = vpop.permute.xlu1 %538  ;;  %v6015_v61 = vpop.permute.xlu0 %534 }
  0x90   : > { %8745 = vst [vmem:[#allocation11_spill] sm:$0xff] %v6013_v60 }
  0x91   : > { %716 = vrot.lane.b32.xlu1 %v6008_v58, %s5693_s7  ;;  %714 = vrot.lane.b32.xlu0 %v6011_v59, %s5693_s7 }
  0x93   : > { %v6023_v1 = vpop.permute.xlu1 %540  ;;  %v6025_v3 = vpop.permute.xlu0 %536 }
  0x94   : > { %8746 = vst [vmem:[#allocation12_spill] sm:$0xff] %v6023_v1 }
  0x95   : > { %720 = vrot.lane.b32.xlu1 %v305_v62, %s5693_s7  ;;  %718 = vrot.lane.b32.xlu0 %v304_v63, %s5693_s7 }
  0x97   : > { %v545_v14 = vpop.permute.xlu1 %544  ;;  %v543_v15 = vpop.permute.xlu0 %542 }
  0x98   : > { %v6039_v16 = vsel %vm1526_vm0, %v6030_v10, %v545_v14  ;;  %v6043_v17 = vsel %vm1526_vm0, %v6033_v11, %v543_v15 }
  0x99   : > { %724 = vrot.lane.b32.xlu1 %v307_v12, %s5693_s7  ;;  %722 = vrot.lane.b32.xlu0 %v306_v13, %s5693_s7  ;;  %v6105_v12 = vld [vmem:[%s5790_s5 + $0x78] sm:$0xff]  ;;  %v6112_v13 = vld [vmem:[%s5790_s5 + $0xe0] sm:$0xff]  ;;  %s8603_s7 = sand.u32 1, %s5682_s16  }
  0x9a   : > { %8750 = vst [vmem:[#allocation16_spill] sm:$0xff] %v6112_v13  ;;  %s206_s22 = scalar_lea.vmem [#allocation6], %s8603_s7 }
  0x9b   : > { %v6047_v26 = vpop.permute.xlu1 %548  ;;  %v6049_v28 = vpop.permute.xlu0 %546  ;;  %s8620_s23 = sshll.u32 %s206_s22, 4  ;;  %s4935_s23 = int_to_ptr.vmem [resolvable:$true] %s8620_s23 }
  0x9d   : > { %792 = vrot.lane.b32.xlu1 %v6055_v30, %s5694_s8  ;;  %790 = vrot.lane.b32.xlu0 %v6052_v29, %s5694_s8  ;;  %v232_v29 = vld [vmem:[%s5790_s5 + $0xf0] sm:$0xff] }
  0x9f   : > { %v6061_v31 = vpop.permute.xlu1 %552  ;;  %v6063_v32 = vpop.permute.xlu0 %550 }
  0xa1   : > { %796 = vrot.lane.b32.xlu1 %v6030_v10, %s5694_s8  ;;  %794 = vrot.lane.b32.xlu0 %v6033_v11, %s5694_s8 }
  0xa3   : > { %v6069_v33 = vpop.permute.xlu1 %556  ;;  %v6071_v42 = vpop.permute.xlu0 %554 }
  0xa5   : > { %800 = vrot.lane.b32.xlu1 %v6074_v43, %s5694_s8  ;;  %798 = vrot.lane.b32.xlu0 %v6077_v44, %s5694_s8 }
  0xa7   : > { %v6083_v45 = vpop.permute.xlu1 %560  ;;  %v6085_v46 = vpop.permute.xlu0 %558 }
  0xa9   : > { %804 = vrot.lane.b32.xlu1 %v6088_v47, %s5694_s8  ;;  %802 = vrot.lane.b32.xlu0 %v6091_v48, %s5694_s8 }
  0xab   : > { %v6100_v62 = vpop.permute.xlu1 %564  ;;  %v6102_v63 = vpop.permute.xlu0 %562 }
  0xad   : > { %822 = vrot.lane.b32.xlu1 %v6098_v49, %s5694_s8  ;;  %806 = vrot.lane.b32.xlu0 %v6105_v12, %s5694_s8  ;;  %v233_v49 = vld [vmem:[%s5790_s5 + $0xf8] sm:$0xff] }
  0xaf   : > { %v6114_v14 = vpop.permute.xlu1 %568  ;;  %v6116_v15 = vpop.permute.xlu0 %566 }
  0xb0   : > { %8751 = vst [vmem:[#allocation17_spill] sm:$0xff] %v6114_v14  ;;  %v1791_v14 = vld [vmem:[%s8717_s1 + $0x8] sm:$0x1] }
  0xb1   : > { %918 = vrot.lane.b32.xlu1 %v5793_v0, %s5695_s9  ;;  %824 = vrot.lane.b32.xlu0 %v6112_v13, %s5694_s8 }
  0xb2   : > { %5453 = vmatprep.subr.msk.mxu0 %vm1889_vm1, %v1791_v14  ;;  %5505 = vmatprep.subr.msk.mxu1 %vm1889_vm1, %v1791_v14 }
  0xb3   : > { %v6122_v30 = vpop.permute.xlu1 %572  ;;  %v6124_v1 = vpop.permute.xlu0 %570  ;;  %5454 = vmatpush3.msk.msra.mxu0 %vm1889_vm1, %v1791_v14  ;;  %5507 = vmatpush3.msk.msra.mxu1 %vm1889_vm1, %v1791_v14  ;;  %vm4414_vm1 = vcmask 24576  }
  0xb4   : > { %8752 = vst [vmem:[#allocation18_spill] sm:$0xff] %v6122_v30  ;;  %8753 = vst [vmem:[#allocation19_spill] sm:$0xff] %v6124_v1 }
  0xb5   : > { %920 = vrot.lane.b32.xlu1 %v5800_v2, %s5695_s9  ;;  %950 = vrot.lane.b32.xlu0 %v5856_v19, %s5695_s9  ;;  %v6143_v2 = vld [vmem:[%s5790_s5 + $0x108] sm:$0xff] }
  0xb7   : > { %v577_v60 = vpop.permute.xlu1 %576  ;;  %v575_v58 = vpop.permute.xlu0 %574 }
  0xb8   : > { %v6133_v59 = vsel %vm1526_vm0, %v233_v49, %v577_v60  ;;  %v6136_v0 = vsel %vm1526_vm0, %v232_v29, %v575_v58 }
  0xb9   : > { %1046 = vrot.lane.b32.xlu1 %v5915_v35, %s5696_s10  ;;  %952 = vrot.lane.b32.xlu0 %v5853_v18, %s5695_s9 }
  0xbb   : > { %v6145_v19 = vpop.permute.xlu1 %580  ;;  %v579_v13 = vpop.permute.xlu0 %578 }
  0xbc   : > { %v6149_v30 = vsel %vm1526_vm0, %v6143_v2, %v579_v13 }
  0xbd   : > { %1048 = vrot.lane.b32.xlu1 %v5912_v34, %s5696_s10  ;;  %1078 = vrot.lane.b32.xlu0 %v5971_v51, %s5696_s10 }
  0xbf   : > { %v6155_v58 = vpop.permute.xlu1 %584  ;;  %v6157_v35 = vpop.permute.xlu0 %582 }
  0xc1   : > { %1174 = vrot.lane.b32.xlu1 %v6033_v11, %s5697_s11  ;;  %1080 = vrot.lane.b32.xlu0 %v5968_v50, %s5696_s10 }
  0xc3   : > { %v6163_v18 = vpop.permute.xlu1 %588  ;;  %v6165_v60 = vpop.permute.xlu0 %586 }
  0xc5   : > { %826 = vrot.lane.b32.xlu1 %v232_v29, %s5694_s8  ;;  %1206 = vrot.lane.b32.xlu0 %v232_v29, %s5697_s11 }
  0xc7   : > { %v6169_v34 = vpop.permute.xlu1 %592  ;;  %v6171_v51 = vpop.permute.xlu0 %590 }
  0xc9   : > { %1208 = vrot.lane.b32.xlu1 %v233_v49, %s5697_s11  ;;  %1176 = vrot.lane.b32.xlu0 %v6030_v10, %s5697_s11 }
  0xcb   : > { %v6176_v11 = vpop.permute.xlu1 %596  ;;  %v6178_v50 = vpop.permute.xlu0 %594 }
  0xcd   : > { %1334 = vrot.lane.b32.xlu1 %v5866_v21, %s5698_s12  ;;  %1302 = vrot.lane.b32.xlu0 %v5810_v5, %s5698_s12 }
  0xcf   : > { %v6184_v29 = vpop.permute.xlu1 %664  ;;  %v6186_v13 = vpop.permute.xlu0 %662 }
  0xd0   : > { %8754 = vst [vmem:[#allocation20_spill] sm:$0xff] %v6184_v29 }
  0xd1   : > { %922 = vrot.lane.b32.xlu1 %v5810_v5, %s5695_s9  ;;  %828 = vrot.lane.b32.xlu0 %v233_v49, %s5694_s8  ;;  %v1790_v5 = vld [vmem:[%s8717_s1] sm:$0xff] }
  0xd2   : > { %5455 = vmatprep.subr.mxu0 %v1790_v5  ;;  %5506 = vmatprep.subr.mxu1 %v1790_v5 }
  0xd3   : > { %v6191_v10 = vpop.permute.xlu1 %668  ;;  %v6193_v1 = vpop.permute.xlu0 %666  ;;  %5456 = vmatpush3.msra.mxu0 %v1790_v5  ;;  %5508 = vmatpush3.msra.mxu1 %v1790_v5 }
  0xd4   : > { %8755 = vst [vmem:[#allocation21_spill] sm:$0xff] %v6191_v10  ;;  %8756 = vst [vmem:[#allocation22_spill] sm:$0xff] %v6193_v1 }
  0xd5   : > { %1304 = vrot.lane.b32.xlu1 %v5807_v4, %s5698_s12  ;;  %954 = vrot.lane.b32.xlu0 %v5866_v21, %s5695_s9  ;;  %v1534_v21 = vsel %vm1526_vm0, %v6074_v43, %v6047_v26  ;;  %v1536_v26 = vsel %vm1526_vm0, %v6088_v47, %v6061_v31 }
  0xd7   : > { %v673_v49 = vpop.permute.xlu1 %672  ;;  %v671_v10 = vpop.permute.xlu0 %670 }
  0xd8   : > { %v6207_v1 = vsel %vm1559_vm2, %v6039_v16, %v673_v49  ;;  %v6211_v29 = vsel %vm1559_vm2, %v6043_v17, %v671_v10  ;;  %v1533_v16 = vsel %vm1526_vm0, %v6077_v44, %v6049_v28  ;;  %v1535_v28 = vsel %vm1526_vm0, %v6091_v48, %v6063_v32 }
  0xd9   : > { %1430 = vrot.lane.b32.xlu1 %v5925_v37, %s5699_s27  ;;  %1336 = vrot.lane.b32.xlu0 %v5863_v20, %s5698_s12  ;;  %v1537_v32 = vsel %vm1526_vm0, %v6105_v12, %v6071_v42 }
  0xdb   : > { %v677_v17 = vpop.permute.xlu1 %676  ;;  %v675_v14 = vpop.permute.xlu0 %674 }
  0xdc   : > { %v6224_v10 = vsel %vm1559_vm2, %v1534_v21, %v677_v17  ;;  %v6227_v49 = vsel %vm1559_vm2, %v1533_v16, %v675_v14  ;;  %v6240_v16 = vld [vmem:[%s5790_s5 + $0x80] sm:$0xff] }
  0xdd   : > { %924 = vrot.lane.b32.xlu1 %v5807_v4, %s5695_s9  ;;  %1462 = vrot.lane.b32.xlu0 %v5981_v53, %s5699_s27  ;;  %v1538_v31 = vsel %vm1526_vm0, %v6240_v16, %v6069_v33 }
  0xdf   : > { %v681_v5 = vpop.permute.xlu1 %680  ;;  %v679_v21 = vpop.permute.xlu0 %678 }
  0xe0   : > { %v6243_v17 = vsel %vm1559_vm2, %v1536_v26, %v681_v5  ;;  %v6246_v4 = vsel %vm1559_vm2, %v1535_v28, %v679_v21  ;;  %v6259_v28 = vld [vmem:[%s5790_s5 + $0x98] sm:$0xff]  ;;  %v6262_v5 = vld [vmem:[%s5790_s5 + $0x90] sm:$0xff] }
  0xe1   : > { %8757 = vst [vmem:[#allocation23_spill] sm:$0xff] %v6243_v17  ;;  %8758 = vst [vmem:[#allocation24_spill] sm:$0xff] %v6246_v4  ;;  %1050 = vrot.lane.b32.xlu1 %v5925_v37, %s5696_s10  ;;  %956 = vrot.lane.b32.xlu0 %v5863_v20, %s5695_s9  ;;  %v1540_v33 = vsel %vm1526_vm0, %v6259_v28, %v6083_v45  ;;  %v1539_v42 = vsel %vm1526_vm0, %v6262_v5, %v6085_v46  ;;  %v226_v17 = vld [vmem:[%s5790_s5 + $0xa8] sm:$0xff] }
  0xe2   : > { %v1541_v45 = vsel %vm1526_vm0, %v226_v17, %v6102_v63 }
  0xe3   : > { %v685_v14 = vpop.permute.xlu1 %684  ;;  %v683_v26 = vpop.permute.xlu0 %682 }
  0xe4   : > { %v6265_v37 = vsel %vm1559_vm2, %v1538_v31, %v685_v14  ;;  %v6268_v20 = vsel %vm1559_vm2, %v1537_v32, %v683_v26  ;;  %v227_v14 = vld [vmem:[%s5790_s5 + $0xb0] sm:$0xff] }
  0xe5   : > { %8759 = vst [vmem:[#allocation25_spill] sm:$0xff] %v6265_v37  ;;  %1432 = vrot.lane.b32.xlu1 %v5922_v36, %s5699_s27  ;;  %1082 = vrot.lane.b32.xlu0 %v5981_v53, %s5696_s10  ;;  %v1542_v53 = vsel %vm1526_vm0, %v227_v14, %v6100_v62 }
  0xe7   : > { %v689_v21 = vpop.permute.xlu1 %688  ;;  %v687_v31 = vpop.permute.xlu0 %686 }
  0xe8   : > { %v6283_v32 = vsel %vm1559_vm2, %v1540_v33, %v689_v21  ;;  %v6286_v26 = vsel %vm1559_vm2, %v1539_v42, %v687_v31 }
  0xe9   : > { %8760 = vst [vmem:[#allocation26_spill] sm:$0xff] %v6283_v32  ;;  %8761 = vst [vmem:[#allocation27_spill] sm:$0xff] %v6286_v26  ;;  %1052 = vrot.lane.b32.xlu1 %v5922_v36, %s5696_s10  ;;  %1464 = vrot.lane.b32.xlu0 %v5978_v52, %s5699_s27 }
  0xeb   : > { %v693_v46 = vpop.permute.xlu1 %692  ;;  %v691_v4 = vpop.permute.xlu0 %690 }
  0xec   : > { %v6297_v33 = vsel %vm1559_vm2, %v1542_v53, %v693_v46  ;;  %v6300_v42 = vsel %vm1559_vm2, %v1541_v45, %v691_v4  ;;  %v6337_v53 = vld [vmem:[%s5790_s5 + $0x128] sm:$0xff] }
  0xed   : > { %8762 = vst [vmem:[#allocation28_spill] sm:$0xff] %v6297_v33  ;;  %8763 = vst [vmem:[#allocation29_spill] sm:$0xff] %v6300_v42  ;;  %1178 = vrot.lane.b32.xlu1 %v6077_v44, %s5697_s11  ;;  %1084 = vrot.lane.b32.xlu0 %v5978_v52, %s5696_s10  ;;  %v235_v44 = vld [vmem:[%s5790_s5 + $0x110] sm:$0xff] }
  0xef   : > { %v6306_v36 = vpop.permute.xlu1 %696  ;;  %v6308_v62 = vpop.permute.xlu0 %694 }
  0xf1   : > { %830 = vrot.lane.b32.xlu1 %v6143_v2, %s5694_s8  ;;  %1210 = vrot.lane.b32.xlu0 %v6143_v2, %s5697_s11 }
  0xf3   : > { %v6314_v63 = vpop.permute.xlu1 %700  ;;  %v6316_v17 = vpop.permute.xlu0 %698 }
  0xf5   : > { %1212 = vrot.lane.b32.xlu1 %v235_v44, %s5697_s11  ;;  %1180 = vrot.lane.b32.xlu0 %v6074_v43, %s5697_s11  ;;  %v1550_v43 = vsel %vm1526_vm0, %v235_v44, %v6145_v19  ;;  %v1552_v19 = vsel %vm1526_vm0, %v6337_v53, %v6155_v58 }
  0xf7   : > { %v705_v52 = vpop.permute.xlu1 %704  ;;  %v703_v4 = vpop.permute.xlu0 %702 }
  0xf8   : > { %v6324_v21 = vsel %vm1559_vm2, %v6133_v59, %v705_v52  ;;  %v6328_v2 = vsel %vm1559_vm2, %v6136_v0, %v703_v4  ;;  %v236_v59 = vld [vmem:[%s5790_s5 + $0x120] sm:$0xff] }
  0xf9   : > { %1338 = vrot.lane.b32.xlu1 %v5876_v23, %s5698_s12  ;;  %1306 = vrot.lane.b32.xlu0 %v5820_v7, %s5698_s12  ;;  %v1551_v46 = vsel %vm1526_vm0, %v236_v59, %v6157_v35 }
  0xfb   : > { %v709_v31 = vpop.permute.xlu1 %708  ;;  %v707_v14 = vpop.permute.xlu0 %706 }
  0xfc   : > { %v6341_v45 = vsel %vm1559_vm2, %v1550_v43, %v709_v31  ;;  %v6345_v0 = vsel %vm1559_vm2, %v6149_v30, %v707_v14  ;;  %v6356_v43 = vld [vmem:[%s5790_s5 + $0x140] sm:$0xff]  ;;  %v6359_v30 = vld [vmem:[%s5790_s5 + $0x138] sm:$0xff] }
  0xfd   : > { %926 = vrot.lane.b32.xlu1 %v5820_v7, %s5695_s9  ;;  %832 = vrot.lane.b32.xlu0 %v235_v44, %s5694_s8  ;;  %v1554_v58 = vsel %vm1526_vm0, %v6356_v43, %v6163_v18  ;;  %v1553_v35 = vsel %vm1526_vm0, %v6359_v30, %v6165_v60 }
  0xff   : > { %v713_v52 = vpop.permute.xlu1 %712  ;;  %v711_v4 = vpop.permute.xlu0 %710 }
 0x100   : > { %v6362_v31 = vsel %vm1559_vm2, %v1552_v19, %v713_v52  ;;  %v6365_v7 = vsel %vm1559_vm2, %v1551_v46, %v711_v4  ;;  %v6378_v19 = vld [vmem:[%s5790_s5 + $0x158] sm:$0xff]  ;;  %v6381_v46 = vld [vmem:[%s5790_s5 + $0x150] sm:$0xff] }
 0x101   : > { %8764 = vst [vmem:[#allocation30_spill] sm:$0xff] %v6362_v31  ;;  %8765 = vst [vmem:[#allocation31_spill] sm:$0xff] %v6365_v7  ;;  %1308 = vrot.lane.b32.xlu1 %v5817_v6, %s5698_s12  ;;  %958 = vrot.lane.b32.xlu0 %v5876_v23, %s5695_s9  ;;  %v1556_v18 = vsel %vm1526_vm0, %v6378_v19, %v6169_v34  ;;  %v1555_v60 = vsel %vm1526_vm0, %v6381_v46, %v6171_v51 }
 0x103   : > { %v717_v44 = vpop.permute.xlu1 %716  ;;  %v715_v14 = vpop.permute.xlu0 %714 }
 0x104   : > { %v6384_v52 = vsel %vm1559_vm2, %v1554_v58, %v717_v44  ;;  %v6387_v23 = vsel %vm1559_vm2, %v1553_v35, %v715_v14  ;;  %v6400_v44 = vld [vmem:[%s5790_s5 + $0x170] sm:$0xff]  ;;  %v6403_v35 = vld [vmem:[%s5790_s5 + $0x168] sm:$0xff] }
 0x105   : > { %8766 = vst [vmem:[#allocation32_spill] sm:$0xff] %v6384_v52  ;;  %1434 = vrot.lane.b32.xlu1 %v5935_v39, %s5699_s27  ;;  %1340 = vrot.lane.b32.xlu0 %v5873_v22, %s5698_s12  ;;  %v1558_v34 = vsel %vm1526_vm0, %v6400_v44, %v6176_v11  ;;  %v1557_v51 = vsel %vm1526_vm0, %v6403_v35, %v6178_v50 }
 0x107   : > { %v721_v4 = vpop.permute.xlu1 %720  ;;  %v719_v58 = vpop.permute.xlu0 %718 }
 0x108   : > { %v6406_v14 = vsel %vm1559_vm2, %v1556_v18, %v721_v4  ;;  %v6409_v33 = vsel %vm1559_vm2, %v1555_v60, %v719_v58 }
 0x109   : > { %8767 = vst [vmem:[#allocation33_spill] sm:$0xff] %v6406_v14  ;;  %8768 = vst [vmem:[#allocation34_spill] sm:$0xff] %v6409_v33  ;;  %928 = vrot.lane.b32.xlu1 %v5817_v6, %s5695_s9  ;;  %1466 = vrot.lane.b32.xlu0 %v5991_v55, %s5699_s27 }
 0x10b   : > { %v725_v42 = vpop.permute.xlu1 %724  ;;  %v723_v18 = vpop.permute.xlu0 %722 }
 0x10c   : > { %v6422_v4 = vsel %vm1559_vm2, %v1558_v34, %v725_v42  ;;  %v6425_v60 = vsel %vm1559_vm2, %v1557_v51, %v723_v18 }
 0x10d   : > { %8769 = vst [vmem:[#allocation35_spill] sm:$0xff] %v6422_v4  ;;  %8770 = vst [vmem:[#allocation36_spill] sm:$0xff] %v6425_v60  ;;  %1054 = vrot.lane.b32.xlu1 %v5935_v39, %s5696_s10  ;;  %960 = vrot.lane.b32.xlu0 %v5873_v22, %s5695_s9 }
 0x10f   : > { %v6431_v6 = vpop.permute.xlu1 %792  ;;  %v6433_v11 = vpop.permute.xlu0 %790 }
 0x111   : > { %1436 = vrot.lane.b32.xlu1 %v5932_v38, %s5699_s27  ;;  %1086 = vrot.lane.b32.xlu0 %v5991_v55, %s5696_s10 }
 0x113   : > { %v6439_v50 = vpop.permute.xlu1 %796  ;;  %v6441_v42 = vpop.permute.xlu0 %794 }
 0x115   : > { %1056 = vrot.lane.b32.xlu1 %v5932_v38, %s5696_s10  ;;  %1468 = vrot.lane.b32.xlu0 %v5988_v54, %s5699_s27 }
 0x117   : > { %v6447_v22 = vpop.permute.xlu1 %800  ;;  %v6449_v39 = vpop.permute.xlu0 %798 }
 0x119   : > { %1182 = vrot.lane.b32.xlu1 %v6091_v48, %s5697_s11  ;;  %1088 = vrot.lane.b32.xlu0 %v5988_v54, %s5696_s10 }
 0x11b   : > { %v6455_v55 = vpop.permute.xlu1 %804  ;;  %v6457_v58 = vpop.permute.xlu0 %802 }
 0x11d   : > { %834 = vrot.lane.b32.xlu1 %v236_v59, %s5694_s8  ;;  %1214 = vrot.lane.b32.xlu0 %v236_v59, %s5697_s11 }
 0x11f   : > { %v823_v38 = vpop.permute.xlu1 %822  ;;  %v6461_v34 = vpop.permute.xlu0 %806 }
 0x120   : > { %8771 = vst [vmem:[#allocation37_spill] sm:$0xff] %v6461_v34 }
 0x121   : > { %1216 = vrot.lane.b32.xlu1 %v6337_v53, %s5697_s11  ;;  %1184 = vrot.lane.b32.xlu0 %v6088_v47, %s5697_s11 }
 0x123   : > { %v919_v48 = vpop.permute.xlu1 %918  ;;  %v6467_v51 = vpop.permute.xlu0 %824 }
 0x125   : > { %1342 = vrot.lane.b32.xlu1 %v5886_v25, %s5698_s12  ;;  %1310 = vrot.lane.b32.xlu0 %v5830_v9, %s5698_s12 }
 0x127   : > { %v6473_v54 = vpop.permute.xlu1 %920  ;;  %v951_v59 = vpop.permute.xlu0 %950 }
 0x129   : > { %930 = vrot.lane.b32.xlu1 %v5830_v9, %s5695_s9  ;;  %836 = vrot.lane.b32.xlu0 %v6337_v53, %s5694_s8 }
 0x12b   : > { %v1047_v18 = vpop.permute.xlu1 %1046  ;;  %v6479_v47 = vpop.permute.xlu0 %952 }
 0x12d   : > { %1312 = vrot.lane.b32.xlu1 %v5827_v8, %s5698_s12  ;;  %962 = vrot.lane.b32.xlu0 %v5886_v25, %s5695_s9 }
 0x12f   : > { %v6485_v4 = vpop.permute.xlu1 %1048  ;;  %v1079_v60 = vpop.permute.xlu0 %1078 }
 0x131   : > { %1438 = vrot.lane.b32.xlu1 %v5945_v41, %s5699_s27  ;;  %1344 = vrot.lane.b32.xlu0 %v5883_v24, %s5698_s12 }
 0x133   : > { %v1175_v9 = vpop.permute.xlu1 %1174  ;;  %v6491_v53 = vpop.permute.xlu0 %1080 }
 0x135   : > { %932 = vrot.lane.b32.xlu1 %v5827_v8, %s5695_s9  ;;  %1470 = vrot.lane.b32.xlu0 %v6001_v57, %s5699_s27 }
 0x137   : > { %v6497_v25 = vpop.permute.xlu1 %826  ;;  %v1207_v32 = vpop.permute.xlu0 %1206 }
 0x139   : > { %1058 = vrot.lane.b32.xlu1 %v5945_v41, %s5696_s10  ;;  %964 = vrot.lane.b32.xlu0 %v5883_v24, %s5695_s9  ;;  %v212_v24 = vld [vmem:[%s5790_s5] sm:$0xff] }
 0x13a   : > { %v1527_v7 = vsel %vm1526_vm0, %v212_v24, %v6015_v61 }
 0x13b   : > { %v6503_v14 = vpop.permute.xlu1 %1208  ;;  %v6505_v26 = vpop.permute.xlu0 %1176 }
 0x13d   : > { %1440 = vrot.lane.b32.xlu1 %v5942_v40, %s5699_s27  ;;  %1090 = vrot.lane.b32.xlu0 %v6001_v57, %s5696_s10  ;;  %v1560_v57 = vsel %vm1559_vm2, %v1527_v7, %v6186_v13 }
 0x13e   : > { %v1593_v34 = vsel %vm1592_vm3, %v1560_v57, %v6433_v11 }
 0x13f   : > { %v1335_v8 = vpop.permute.xlu1 %1334  ;;  %v1303_v33 = vpop.permute.xlu0 %1302  ;;  %v1626_v61 = vsel %vm1625_vm4, %v1593_v34, %v919_v48 }
 0x141   : > { %1060 = vrot.lane.b32.xlu1 %v5942_v40, %s5696_s10  ;;  %1472 = vrot.lane.b32.xlu0 %v5998_v56, %s5699_s27  ;;  %v228_v40 = vld [vmem:[%s5790_s5 + $0xc0] sm:$0xff] }
 0x143   : > { %v6516_v41 = vpop.permute.xlu1 %922  ;;  %v6518_v31 = vpop.permute.xlu0 %828 }
 0x145   : > { %1186 = vrot.lane.b32.xlu1 %v6105_v12, %s5697_s11  ;;  %1092 = vrot.lane.b32.xlu0 %v5998_v56, %s5696_s10  ;;  %v1543_v12 = vsel %vm1526_vm0, %v228_v40, %v6116_v15  ;;  %v1659_v56 = vsel %vm1658_vm5, %v1626_v61, %v1047_v18  ;;  %v8772_v61 = vld [vmem:[#allocation20_spill] sm:$0xff] }
 0x146   : > { %v1576_v13 = vsel %vm1559_vm2, %v1543_v12, %v6308_v62  ;;  %v1692_v7 = vsel %vm1691_vm6, %v1659_v56, %v1175_v9  ;;  %v213_v62 = vld [vmem:[%s5790_s5 + $0x8] sm:$0xff] }
 0x147   : > { %v1305_v37 = vpop.permute.xlu1 %1304  ;;  %v6531_v52 = vpop.permute.xlu0 %954  ;;  %v1609_v11 = vsel %vm1592_vm3, %v1576_v13, %v823_v38  ;;  %v1725_v15 = vsel %vm1724_vm7, %v1692_v7, %v1303_v33  ;;  %v5186_v33 = vld [vmem:[%s5790_s5 + $0x79] sm:$0xff] }
 0x148   : > { %v1642_v18 = vsel %vm1625_vm4, %v1609_v11, %v951_v59  ;;  %v8773_v7 = vld [vmem:[#allocation17_spill] sm:$0xff] }
 0x149   : > { %838 = vrot.lane.b32.xlu1 %v6359_v30, %s5694_s8  ;;  %1218 = vrot.lane.b32.xlu0 %v6359_v30, %s5697_s11  ;;  %v1675_v30 = vsel %vm1658_vm5, %v1642_v18, %v1079_v60  ;;  %v1528_v60 = vsel %vm1526_vm0, %v213_v62, %v6025_v3 }
 0x14a   : > { %v1708_v38 = vsel %vm1691_vm6, %v1675_v30, %v1207_v32  ;;  %v229_v32 = vld [vmem:[%s5790_s5 + $0xc8] sm:$0xff]  ;;  %v1561_v12 = vsel %vm1559_vm2, %v1528_v60, %v8772_v61 }
 0x14b   : > { %v1431_v34 = vpop.permute.xlu1 %1430  ;;  %v1337_v48 = vpop.permute.xlu0 %1336  ;;  %v1741_v9 = vsel %vm1724_vm7, %v1708_v38, %v1335_v8  ;;  %v1594_v8 = vsel %vm1592_vm3, %v1561_v12, %v6431_v6 }
 0x14c   : > { %v1758_v24 = vsel %vm1757_vm8, %v1725_v15, %v1431_v34  ;;  %v1627_v3 = vsel %vm1625_vm4, %v1594_v8, %v6473_v54  ;;  %v5108_v15 = vld [vmem:[%s5790_s5 + $0x139] sm:$0xff] }
 0x14d   : > { %1220 = vrot.lane.b32.xlu1 %v6356_v43, %s5697_s11  ;;  %1188 = vrot.lane.b32.xlu0 %v6240_v16, %s5697_s11  ;;  %v1660_v11 = vsel %vm1658_vm5, %v1627_v3, %v6485_v4  ;;  %v8775_v8 = vld [vmem:[#allocation9_spill] sm:$0xff] }
 0x14e   : > { %5457 = vmatprep.mubr.msk.f32.mxu0 %vm1792_vm9, %v1758_v24  ;;  %v1693_v54 = vsel %vm1691_vm6, %v1660_v11, %v6505_v26  ;;  %v8777_v11 = vld [vmem:[#allocation13_spill] sm:$0xff] }
 0x14f   : > { %v6558_v59 = vpop.permute.xlu1 %924  ;;  %v1463_v40 = vpop.permute.xlu0 %1462  ;;  %v1726_v4 = vsel %vm1724_vm7, %v1693_v54, %v1305_v37  ;;  %v5203_v37 = vld [vmem:[%s5790_s5 + $0x141] sm:$0xff] }
 0x150   : > { %v1774_v57 = vsel %vm1757_vm8, %v1741_v9, %v1463_v40  ;;  %v8774_v9 = vld [vmem:[#allocation10_spill] sm:$0xff] }
 0x151   : > { %1346 = vrot.lane.b32.xlu1 %v5894_v27, %s5698_s12  ;;  %1314 = vrot.lane.b32.xlu0 %v5186_v33, %s5698_s12  ;;  %v1544_v27 = vsel %vm1526_vm0, %v229_v32, %v8773_v7  ;;  %v5219_v32 = vld [vmem:[%s5790_s5 + $0x82] sm:$0xff] }
 0x152   : > { %5481 = vmatprep.mubr.msk.f32.mxu1 %vm1792_vm9, %v1774_v57  ;;  %v1577_v6 = vsel %vm1559_vm2, %v1544_v27, %v6306_v36  ;;  %v8776_v27 = vld [vmem:[#allocation11_spill] sm:$0xff]  ;;  %v8778_v54 = vld [vmem:[#allocation22_spill] sm:$0xff] }
 0x153   : > { %v1051_v56 = vpop.permute.xlu1 %1050  ;;  %v6572_v13 = vpop.permute.xlu0 %956  ;;  %v1610_v34 = vsel %vm1592_vm3, %v1577_v6, %v6467_v51  ;;  %v5187_v51 = vld [vmem:[%s5790_s5 + $0x81] sm:$0xff]  ;;  %v1529_v6 = vsel %vm1526_vm0, %v8777_v11, %v8776_v27 }
 0x155   : > { %840 = vrot.lane.b32.xlu1 %v6356_v43, %s5694_s8  ;;  %808 = vrot.lane.b32.xlu0 %v6240_v16, %s5694_s8  ;;  %v1643_v43 = vsel %vm1625_vm4, %v1610_v34, %v6479_v47 }
 0x156   : > { %v1676_v36 = vsel %vm1658_vm5, %v1643_v43, %v6491_v53  ;;  %v5218_v53 = vld [vmem:[%s5790_s5 + $0x7a] sm:$0xff] }
 0x157   : > { %v1433_v18 = vpop.permute.xlu1 %1432  ;;  %v1083_v24 = vpop.permute.xlu0 %1082  ;;  %v1709_v26 = vsel %vm1691_vm6, %v1676_v36, %v6503_v14  ;;  %v8780_v36 = vld [vmem:[#allocation15_spill] sm:$0xff] }
 0x158   : > { %v1759_v16 = vsel %vm1757_vm8, %v1726_v4, %v1433_v18  ;;  %v1742_v30 = vsel %vm1724_vm7, %v1709_v26, %v1337_v48 }
 0x159   : > { %966 = vrot.lane.b32.xlu1 %v5108_v15, %s5695_s9  ;;  %934 = vrot.lane.b32.xlu0 %v5186_v33, %s5695_s9  ;;  %v1562_v15 = vsel %vm1559_vm2, %v1529_v6, %v8778_v54 }
 0x15a   : > { %5458 = vmatmul.mubr.msk.f32.vlgmr.msra.gmra.mxu0 %vm1792_vm9, %v1759_v16  ;;  %v1595_v34 = vsel %vm1592_vm3, %v1562_v15, %v6441_v42  ;;  %v8779_v16 = vld [vmem:[#allocation19_spill] sm:$0xff]  ;;  %v8784_v15 = vld [vmem:[#allocation18_spill] sm:$0xff] }
 0x15b   : > { %v6605_v47 = vpop.permute.xlu1 %1052  ;;  %v1465_v62 = vpop.permute.xlu0 %1464  ;;  %v1628_v43 = vsel %vm1625_vm4, %v1595_v34, %v6516_v41  ;;  %v1545_v26 = vsel %vm1526_vm0, %v8780_v36, %v8779_v16  ;;  %v8785_v34 = vld [vmem:[#allocation16_spill] sm:$0xff] }
 0x15c   : > { %v1775_v38 = vsel %vm1757_vm8, %v1742_v30, %v1465_v62  ;;  %v1578_v42 = vsel %vm1559_vm2, %v1545_v26, %v6316_v17 }
 0x15d   : > { %1348 = vrot.lane.b32.xlu1 %v5203_v37, %s5698_s12  ;;  %1316 = vrot.lane.b32.xlu0 %v5187_v51, %s5698_s12  ;;  %v1611_v41 = vsel %vm1592_vm3, %v1578_v42, %v6497_v25 }
 0x15e   : > { %5482 = vmatmul.mubr.msk.f32.vlgmr.msra.gmra.mxu1 %vm1792_vm9, %v1775_v38 }
 0x15f   : > { %v1179_v14 = vpop.permute.xlu1 %1178  ;;  %v6612_v33 = vpop.permute.xlu0 %1084 }
 0x161   : > { %1474 = vrot.lane.b32.xlu1 %v8774_v9, %s5699_s27  ;;  %1442 = vrot.lane.b32.xlu0 %v5218_v53, %s5699_s27 }
 0x163   : > { %v6617_v48 = vpop.permute.xlu1 %830  ;;  %v1211_v40 = vpop.permute.xlu0 %1210 }
 0x165   : > { %968 = vrot.lane.b32.xlu1 %v5203_v37, %s5695_s9  ;;  %936 = vrot.lane.b32.xlu0 %v5187_v51, %s5695_s9  ;;  %v1661_v37 = vsel %vm1658_vm5, %v1628_v43, %v1051_v56  ;;  %v1644_v56 = vsel %vm1625_vm4, %v1611_v41, %v6531_v52  ;;  %v1546_v43 = vsel %vm1526_vm0, %v8785_v34, %v8784_v15 }
 0x166   : > { %v1694_v51 = vsel %vm1691_vm6, %v1661_v37, %v1179_v14  ;;  %v1613_v15 = vsel %vm1592_vm3, %v6328_v2, %v6617_v48 }
 0x167   : > { %v6621_v57 = vpop.permute.xlu1 %1212  ;;  %v1181_v60 = vpop.permute.xlu0 %1180 }
 0x169   : > { %1094 = vrot.lane.b32.xlu1 %v8774_v9, %s5696_s10  ;;  %1062 = vrot.lane.b32.xlu0 %v5218_v53, %s5696_s10  ;;  %v1677_v9 = vsel %vm1658_vm5, %v1644_v56, %v1083_v24 }
 0x16a   : > { %v1710_v17 = vsel %vm1691_vm6, %v1677_v9, %v1211_v40  ;;  %v5204_v40 = vld [vmem:[%s5790_s5 + $0x151] sm:$0xff] }
 0x16b   : > { %v1339_v61 = vpop.permute.xlu1 %1338  ;;  %v1307_v12 = vpop.permute.xlu0 %1306 }
 0x16c   : > { %v1727_v30 = vsel %vm1724_vm7, %v1694_v51, %v1307_v12  ;;  %v1743_v25 = vsel %vm1724_vm7, %v1710_v17, %v1339_v61  ;;  %v8781_v12 = vld [vmem:[#allocation12_spill] sm:$0xff] }
 0x16d   : > { %1476 = vrot.lane.b32.xlu1 %v8775_v8, %s5699_s27  ;;  %1444 = vrot.lane.b32.xlu0 %v5219_v32, %s5699_s27  ;;  %v5188_v61 = vld [vmem:[%s5790_s5 + $0x91] sm:$0xff] }
 0x16f   : > { %v6630_v3 = vpop.permute.xlu1 %926  ;;  %v6632_v7 = vpop.permute.xlu0 %832 }
 0x171   : > { %1096 = vrot.lane.b32.xlu1 %v8775_v8, %s5696_s10  ;;  %1064 = vrot.lane.b32.xlu0 %v5219_v32, %s5696_s10  ;;  %v8782_v8 = vld [vmem:[#allocation14_spill] sm:$0xff] }
 0x172   : > { %v1530_v24 = vsel %vm1526_vm0, %v8782_v8, %v8781_v12  ;;  %vm3474_vm0 = vcmask 1047559  }
 0x173   : > { %v1309_v4 = vpop.permute.xlu1 %1308  ;;  %v6644_v18 = vpop.permute.xlu0 %958 }
 0x175   : > { %1222 = vrot.lane.b32.xlu1 %v6381_v46, %s5697_s11  ;;  %1190 = vrot.lane.b32.xlu0 %v6262_v5, %s5697_s11 }
 0x177   : > { %v1435_v62 = vpop.permute.xlu1 %1434  ;;  %v1341_v38 = vpop.permute.xlu0 %1340 }
 0x178   : > { %v1760_v53 = vsel %vm1757_vm8, %v1727_v30, %v1435_v62  ;;  %v5236_v30 = vld [vmem:[%s5790_s5 + $0x152] sm:$0xff] }
 0x179   : > { %842 = vrot.lane.b32.xlu1 %v6381_v46, %s5694_s8  ;;  %810 = vrot.lane.b32.xlu0 %v6262_v5, %s5694_s8  ;;  %v8783_v5 = vld [vmem:[#allocation21_spill] sm:$0xff] }
 0x17a   : > { %5460 = vmatprep.mubr.msk.f32.mxu0 %vm1792_vm9, %v1760_v53  ;;  %v1563_v46 = vsel %vm1559_vm2, %v1530_v24, %v8783_v5  ;;  %v5220_v62 = vld [vmem:[%s5790_s5 + $0x92] sm:$0xff]  ;;  %v1597_v24 = vsel %vm1592_vm3, %v6211_v29, %v6449_v39 }
 0x17b   : > { %v6673_v14 = vpop.permute.xlu1 %928  ;;  %v1467_v52 = vpop.permute.xlu0 %1466  ;;  %v1596_v27 = vsel %vm1592_vm3, %v1563_v46, %v6439_v50  ;;  %v1579_v50 = vsel %vm1559_vm2, %v1546_v43, %v6314_v63 }
 0x17c   : > { %v1776_v32 = vsel %vm1757_vm8, %v1743_v25, %v1467_v52  ;;  %v1629_v54 = vsel %vm1625_vm4, %v1596_v27, %v6558_v59  ;;  %v1612_v26 = vsel %vm1592_vm3, %v1579_v50, %v6518_v31  ;;  %v5237_v52 = vld [vmem:[%s5790_s5 + $0x15a] sm:$0xff] }
 0x17d   : > { %1224 = vrot.lane.b32.xlu1 %v6378_v19, %s5697_s11  ;;  %1192 = vrot.lane.b32.xlu0 %v6259_v28, %s5697_s11  ;;  %v1662_v16 = vsel %vm1658_vm5, %v1629_v54, %v6605_v47  ;;  %v1645_v47 = vsel %vm1625_vm4, %v1612_v26, %v6572_v13  ;;  %v5158_v54 = vld [vmem:[%s5790_s5 + $0xa8] sm:$0xff]  ;;  %v1598_v26 = vsel %vm1592_vm3, %v6207_v1, %v6447_v22 }
 0x17e   : > { %5484 = vmatprep.mubr.msk.f32.mxu1 %vm1792_vm9, %v1776_v32  ;;  %v1695_v36 = vsel %vm1691_vm6, %v1662_v16, %v1181_v60  ;;  %v1678_v41 = vsel %vm1658_vm5, %v1645_v47, %v6612_v33  ;;  %v5221_v32 = vld [vmem:[%s5790_s5 + $0x9a] sm:$0xff]  ;;  %v1614_v1 = vsel %vm1592_vm3, %v6324_v21, %v6632_v7 }
 0x17f   : > { %v1055_v11 = vpop.permute.xlu1 %1054  ;;  %v6690_v6 = vpop.permute.xlu0 %960  ;;  %v1728_v59 = vsel %vm1724_vm7, %v1695_v36, %v1309_v4  ;;  %v1711_v63 = vsel %vm1691_vm6, %v1678_v41, %v6621_v57  ;;  %v5159_v36 = vld [vmem:[%s5790_s5 + $0xb0] sm:$0xff] }
 0x180   : > { %v1744_v31 = vsel %vm1724_vm7, %v1711_v63, %v1341_v38  ;;  %v5190_v41 = vld [vmem:[%s5790_s5 + $0xa9] sm:$0xff] }
 0x181   : > { %1350 = vrot.lane.b32.xlu1 %v5204_v40, %s5698_s12  ;;  %1318 = vrot.lane.b32.xlu0 %v5188_v61, %s5698_s12 }
 0x183   : > { %v1437_v37 = vpop.permute.xlu1 %1436  ;;  %v1087_v42 = vpop.permute.xlu0 %1086 }
 0x184   : > { %v1761_v51 = vsel %vm1757_vm8, %v1728_v59, %v1437_v37 }
 0x185   : > { %844 = vrot.lane.b32.xlu1 %v6378_v19, %s5694_s8  ;;  %812 = vrot.lane.b32.xlu0 %v6259_v28, %s5694_s8  ;;  %v5205_v28 = vld [vmem:[%s5790_s5 + $0x159] sm:$0xff] }
 0x186   : > { %5461 = vmatmul.mubr.msk.f32.gmra.mxu0 %vm1792_vm9, %v1761_v51  ;;  %v5189_v19 = vld [vmem:[%s5790_s5 + $0x99] sm:$0xff]  ;;  %v5206_v51 = vld [vmem:[%s5790_s5 + $0x169] sm:$0xff] }
 0x187   : > { %v6720_v13 = vpop.permute.xlu1 %1056  ;;  %v1469_v60 = vpop.permute.xlu0 %1468 }
 0x188   : > { %v1777_v33 = vsel %vm1757_vm8, %v1744_v31, %v1469_v60  ;;  %v1647_v31 = vsel %vm1625_vm4, %v1614_v1, %v6690_v6 }
 0x189   : > { %970 = vrot.lane.b32.xlu1 %v5204_v40, %s5695_s9  ;;  %938 = vrot.lane.b32.xlu0 %v5188_v61, %s5695_s9  ;;  %v1630_v40 = vsel %vm1625_vm4, %v1597_v24, %v6630_v3  ;;  %v1646_v3 = vsel %vm1625_vm4, %v1613_v15, %v6644_v18 }
 0x18a   : > { %5485 = vmatmul.mubr.msk.f32.gmra.mxu1 %vm1792_vm9, %v1777_v33  ;;  %v1663_v61 = vsel %vm1658_vm5, %v1630_v40, %v1055_v11  ;;  %v1679_v43 = vsel %vm1658_vm5, %v1646_v3, %v1087_v42  ;;  %v1631_v42 = vsel %vm1625_vm4, %v1598_v26, %v6673_v14  ;;  %v5223_v40 = vld [vmem:[%s5790_s5 + $0xb2] sm:$0xff] }
 0x18b   : > { %v1183_v4 = vpop.permute.xlu1 %1182  ;;  %v6728_v57 = vpop.permute.xlu0 %1088  ;;  %v1664_v47 = vsel %vm1658_vm5, %v1631_v42, %v6720_v13  ;;  %v5161_v42 = vld [vmem:[%s5790_s5 + $0xc8] sm:$0xff] }
 0x18c   : > { %v1696_v27 = vsel %vm1691_vm6, %v1663_v61, %v1183_v4  ;;  %v1680_v60 = vsel %vm1658_vm5, %v1647_v31, %v6728_v57  ;;  %v5207_v57 = vld [vmem:[%s5790_s5 + $0x171] sm:$0xff] }
 0x18d   : > { %1352 = vrot.lane.b32.xlu1 %v5205_v28, %s5698_s12  ;;  %1320 = vrot.lane.b32.xlu0 %v5189_v19, %s5698_s12 }
 0x18f   : > { %v6734_v38 = vpop.permute.xlu1 %834  ;;  %v1215_v56 = vpop.permute.xlu0 %1214 }
 0x190   : > { %v1712_v16 = vsel %vm1691_vm6, %v1679_v43, %v1215_v56  ;;  %v1615_v15 = vsel %vm1592_vm3, %v6345_v0, %v6734_v38  ;;  %v5160_v38 = vld [vmem:[%s5790_s5 + $0xc0] sm:$0xff] }
 0x191   : > { %1478 = vrot.lane.b32.xlu1 %v5236_v30, %s5699_s27  ;;  %1446 = vrot.lane.b32.xlu0 %v5220_v62, %s5699_s27 }
 0x193   : > { %v1217_v53 = vpop.permute.xlu1 %1216  ;;  %v1185_v9 = vpop.permute.xlu0 %1184 }
 0x194   : > { %v1713_v21 = vsel %vm1691_vm6, %v1680_v60, %v1217_v53  ;;  %v5222_v53 = vld [vmem:[%s5790_s5 + $0xaa] sm:$0xff] }
 0x195   : > { %972 = vrot.lane.b32.xlu1 %v5205_v28, %s5695_s9  ;;  %940 = vrot.lane.b32.xlu0 %v5189_v19, %s5695_s9 }
 0x197   : > { %v1343_v17 = vpop.permute.xlu1 %1342  ;;  %v1311_v25 = vpop.permute.xlu0 %1310 }
 0x198   : > { %v1729_v29 = vsel %vm1724_vm7, %v1696_v27, %v1311_v25  ;;  %v1745_v2 = vsel %vm1724_vm7, %v1712_v16, %v1343_v17 }
 0x199   : > { %1098 = vrot.lane.b32.xlu1 %v5236_v30, %s5696_s10  ;;  %1066 = vrot.lane.b32.xlu0 %v5220_v62, %s5696_s10  ;;  %v5191_v30 = vld [vmem:[%s5790_s5 + $0xb1] sm:$0xff] }
 0x19b   : > { %v6744_v12 = vpop.permute.xlu1 %930  ;;  %v6746_v8 = vpop.permute.xlu0 %836 }
 0x19d   : > { %1480 = vrot.lane.b32.xlu1 %v5237_v52, %s5699_s27  ;;  %1448 = vrot.lane.b32.xlu0 %v5221_v32, %s5699_s27 }
 0x19f   : > { %v1313_v5 = vpop.permute.xlu1 %1312  ;;  %v6753_v46 = vpop.permute.xlu0 %962 }
 0x1a0   : > { %v1648_v3 = vsel %vm1625_vm4, %v1615_v15, %v6753_v46  ;;  %v8787_v15 = vld [vmem:[#allocation25_spill] sm:$0xff] }
 0x1a1   : > { %1100 = vrot.lane.b32.xlu1 %v5237_v52, %s5696_s10  ;;  %1068 = vrot.lane.b32.xlu0 %v5221_v32, %s5696_s10 }
 0x1a3   : > { %v1439_v39 = vpop.permute.xlu1 %1438  ;;  %v1345_v34 = vpop.permute.xlu0 %1344 }
 0x1a4   : > { %v1762_v11 = vsel %vm1757_vm8, %v1729_v29, %v1439_v39  ;;  %v1746_v7 = vsel %vm1724_vm7, %v1713_v21, %v1345_v34 }
 0x1a5   : > { %1226 = vrot.lane.b32.xlu1 %v6403_v35, %s5697_s11  ;;  %1194 = vrot.lane.b32.xlu0 %v5158_v54, %s5697_s11 }
 0x1a6   : > { %5463 = vmatprep.mubr.msk.f32.mxu0 %vm1792_vm9, %v1762_v11 }
 0x1a7   : > { %v6776_v48 = vpop.permute.xlu1 %932  ;;  %v1471_v18 = vpop.permute.xlu0 %1470 }
 0x1a8   : > { %v1778_v50 = vsel %vm1757_vm8, %v1745_v2, %v1471_v18 }
 0x1a9   : > { %846 = vrot.lane.b32.xlu1 %v6403_v35, %s5694_s8  ;;  %814 = vrot.lane.b32.xlu0 %v5158_v54, %s5694_s8  ;;  %v1697_v35 = vsel %vm1691_vm6, %v1664_v47, %v1185_v9  ;;  %v1599_v54 = vsel %vm1592_vm3, %v6227_v49, %v6457_v58  ;;  %v5176_v58 = vld [vmem:[%s5790_s5 + $0x180] sm:$0xff]  ;;  %v1600_v47 = vsel %vm1592_vm3, %v6224_v10, %v6455_v55 }
 0x1aa   : > { %5487 = vmatprep.mubr.msk.f32.mxu1 %vm1792_vm9, %v1778_v50  ;;  %v1730_v22 = vsel %vm1724_vm7, %v1697_v35, %v1313_v5  ;;  %v5239_v5 = vld [vmem:[%s5790_s5 + $0x172] sm:$0xff]  ;;  %v1632_v34 = vsel %vm1625_vm4, %v1599_v54, %v6744_v12  ;;  %v1616_v35 = vsel %vm1592_vm3, %v6341_v45, %v6746_v8  ;;  %v1633_v1 = vsel %vm1625_vm4, %v1600_v47, %v6776_v48  ;;  %v5208_v8 = vld [vmem:[%s5790_s5 + $0x181] sm:$0xff] }
 0x1ab   : > { %v6787_v59 = vpop.permute.xlu1 %1058  ;;  %v6789_v37 = vpop.permute.xlu0 %964 }
 0x1ac   : > { %v1665_v11 = vsel %vm1658_vm5, %v1632_v34, %v6787_v59  ;;  %v5177_v59 = vld [vmem:[%s5790_s5 + $0x188] sm:$0xff] }
 0x1ad   : > { %1228 = vrot.lane.b32.xlu1 %v6400_v44, %s5697_s11  ;;  %1196 = vrot.lane.b32.xlu0 %v5159_v36, %s5697_s11  ;;  %v5225_v34 = vld [vmem:[%s5790_s5 + $0xca] sm:$0xff] }
 0x1af   : > { %v1441_v63 = vpop.permute.xlu1 %1440  ;;  %v1091_v14 = vpop.permute.xlu0 %1090 }
 0x1b0   : > { %v1763_v13 = vsel %vm1757_vm8, %v1730_v22, %v1441_v63  ;;  %v1681_v43 = vsel %vm1658_vm5, %v1648_v3, %v1091_v14  ;;  %v1649_v22 = vsel %vm1625_vm4, %v1616_v35, %v6789_v37  ;;  %v5192_v14 = vld [vmem:[%s5790_s5 + $0xc1] sm:$0xff] }
 0x1b1   : > { %1354 = vrot.lane.b32.xlu1 %v5206_v51, %s5698_s12  ;;  %1322 = vrot.lane.b32.xlu0 %v5190_v41, %s5698_s12 }
 0x1b2   : > { %5464 = vmatmul.mubr.msk.f32.gmra.mxu0 %vm1792_vm9, %v1763_v13 }
 0x1b3   : > { %v6815_v33 = vpop.permute.xlu1 %1060  ;;  %v1473_v6 = vpop.permute.xlu0 %1472 }
 0x1b4   : > { %v1779_v28 = vsel %vm1757_vm8, %v1746_v7, %v1473_v6  ;;  %v1666_v63 = vsel %vm1658_vm5, %v1633_v1, %v6815_v33 }
 0x1b5   : > { %848 = vrot.lane.b32.xlu1 %v6400_v44, %s5694_s8  ;;  %816 = vrot.lane.b32.xlu0 %v5159_v36, %s5694_s8  ;;  %v5238_v44 = vld [vmem:[%s5790_s5 + $0x16a] sm:$0xff] }
 0x1b6   : > { %5488 = vmatmul.mubr.msk.f32.gmra.mxu1 %vm1792_vm9, %v1779_v28 }
 0x1b7   : > { %v1187_v19 = vpop.permute.xlu1 %1186  ;;  %v6822_v4 = vpop.permute.xlu0 %1092 }
 0x1b8   : > { %v1698_v49 = vsel %vm1691_vm6, %v1665_v11, %v1187_v19  ;;  %v1682_v10 = vsel %vm1658_vm5, %v1649_v22, %v6822_v4  ;;  %v5209_v19 = vld [vmem:[%s5790_s5 + $0x189] sm:$0xff]  ;;  %v5179_v22 = vld [vmem:[%s5790_s5 + $0x1a0] sm:$0xff] }
 0x1b9   : > { %974 = vrot.lane.b32.xlu1 %v5206_v51, %s5695_s9  ;;  %942 = vrot.lane.b32.xlu0 %v5190_v41, %s5695_s9  ;;  %v5193_v4 = vld [vmem:[%s5790_s5 + $0xc9] sm:$0xff] }
 0x1bb   : > { %v6828_v62 = vpop.permute.xlu1 %838  ;;  %v1219_v56 = vpop.permute.xlu0 %1218 }
 0x1bc   : > { %v1714_v0 = vsel %vm1691_vm6, %v1681_v43, %v1219_v56  ;;  %v8788_v43 = vld [vmem:[#allocation37_spill] sm:$0xff] }
 0x1bd   : > { %1356 = vrot.lane.b32.xlu1 %v5207_v57, %s5698_s12  ;;  %1324 = vrot.lane.b32.xlu0 %v5191_v30, %s5698_s12 }
 0x1bf   : > { %v1221_v9 = vpop.permute.xlu1 %1220  ;;  %v1189_v17 = vpop.permute.xlu0 %1188 }
 0x1c0   : > { %v1715_v45 = vsel %vm1691_vm6, %v1682_v10, %v1221_v9  ;;  %v1699_v55 = vsel %vm1691_vm6, %v1666_v63, %v1189_v17  ;;  %v5224_v9 = vld [vmem:[%s5790_s5 + $0xc2] sm:$0xff] }
 0x1c1   : > { %1482 = vrot.lane.b32.xlu1 %v5238_v44, %s5699_s27  ;;  %1450 = vrot.lane.b32.xlu0 %v5222_v53, %s5699_s27  ;;  %v5163_v63 = vld [vmem:[%s5790_s5 + $0xe0] sm:$0xff] }
 0x1c3   : > { %v1347_v25 = vpop.permute.xlu1 %1346  ;;  %v1315_v52 = vpop.permute.xlu0 %1314 }
 0x1c4   : > { %v1747_v12 = vsel %vm1724_vm7, %v1714_v0, %v1347_v25  ;;  %v1731_v46 = vsel %vm1724_vm7, %v1698_v49, %v1315_v52  ;;  %v8789_v49 = vld [vmem:[#allocation24_spill] sm:$0xff] }
 0x1c5   : > { %976 = vrot.lane.b32.xlu1 %v5207_v57, %s5695_s9  ;;  %944 = vrot.lane.b32.xlu0 %v5191_v30, %s5695_s9  ;;  %v1601_v0 = vsel %vm1592_vm3, %v8789_v49, %v8788_v43  ;;  %v8794_v49 = vld [vmem:[#allocation27_spill] sm:$0xff] }
 0x1c7   : > { %v6838_v32 = vpop.permute.xlu1 %840  ;;  %v6840_v24 = vpop.permute.xlu0 %808 }
 0x1c9   : > { %1102 = vrot.lane.b32.xlu1 %v5238_v44, %s5696_s10  ;;  %1070 = vrot.lane.b32.xlu0 %v5222_v53, %s5696_s10  ;;  %v5240_v53 = vld [vmem:[%s5790_s5 + $0x182] sm:$0xff] }
 0x1cb   : > { %v6846_v61 = vpop.permute.xlu1 %966  ;;  %v6848_v27 = vpop.permute.xlu0 %934 }
 0x1cd   : > { %1484 = vrot.lane.b32.xlu1 %v5239_v5, %s5699_s27  ;;  %1452 = vrot.lane.b32.xlu0 %v5223_v40, %s5699_s27 }
 0x1cf   : > { %v1349_v29 = vpop.permute.xlu1 %1348  ;;  %v1317_v39 = vpop.permute.xlu0 %1316 }
 0x1d0   : > { %v1748_v48 = vsel %vm1724_vm7, %v1715_v45, %v1349_v29  ;;  %v1732_v37 = vsel %vm1724_vm7, %v1699_v55, %v1317_v39  ;;  %v5241_v39 = vld [vmem:[%s5790_s5 + $0x18a] sm:$0xff]  ;;  %v5210_v55 = vld [vmem:[%s5790_s5 + $0x199] sm:$0xff] }
 0x1d1   : > { %1104 = vrot.lane.b32.xlu1 %v5239_v5, %s5696_s10  ;;  %1072 = vrot.lane.b32.xlu0 %v5223_v40, %s5696_s10  ;;  %v8786_v40 = vld [vmem:[#allocation32_spill] sm:$0xff] }
 0x1d3   : > { %v1475_v16 = vpop.permute.xlu1 %1474  ;;  %v1443_v2 = vpop.permute.xlu0 %1442 }
 0x1d4   : > { %v1780_v18 = vsel %vm1757_vm8, %v1747_v12, %v1475_v16  ;;  %v1764_v50 = vsel %vm1757_vm8, %v1731_v46, %v1443_v2  ;;  %v1634_v2 = vsel %vm1625_vm4, %v1601_v0, %v6848_v27 }
 0x1d5   : > { %1230 = vrot.lane.b32.xlu1 %v5176_v58, %s5697_s11  ;;  %1198 = vrot.lane.b32.xlu0 %v5160_v38, %s5697_s11 }
 0x1d6   : > { %5466 = vmatprep.mubr.msk.f32.mxu0 %vm1792_vm9, %v1764_v50  ;;  %5490 = vmatprep.mubr.msk.f32.mxu1 %vm1792_vm9, %v1780_v18 }
 0x1d7   : > { %v6879_v36 = vpop.permute.xlu1 %968  ;;  %v6881_v26 = vpop.permute.xlu0 %936 }
 0x1d9   : > { %850 = vrot.lane.b32.xlu1 %v5176_v58, %s5694_s8  ;;  %818 = vrot.lane.b32.xlu0 %v5160_v38, %s5694_s8  ;;  %v8790_v58 = vld [vmem:[#allocation31_spill] sm:$0xff] }
 0x1da   : > { %v1617_v38 = vsel %vm1592_vm3, %v8790_v58, %v6828_v62 }
 0x1db   : > { %v6893_v51 = vpop.permute.xlu1 %1094  ;;  %v6895_v41 = vpop.permute.xlu0 %1062  ;;  %v1650_v16 = vsel %vm1625_vm4, %v1617_v38, %v6846_v61  ;;  %v5178_v61 = vld [vmem:[%s5790_s5 + $0x198] sm:$0xff] }
 0x1dc   : > { %v1683_v18 = vsel %vm1658_vm5, %v1650_v16, %v6893_v51  ;;  %v1667_v50 = vsel %vm1658_vm5, %v1634_v2, %v6895_v41 }
 0x1dd   : > { %1232 = vrot.lane.b32.xlu1 %v5177_v59, %s5697_s11  ;;  %1200 = vrot.lane.b32.xlu0 %v5161_v42, %s5697_s11 }
 0x1df   : > { %v1477_v31 = vpop.permute.xlu1 %1476  ;;  %v1445_v13 = vpop.permute.xlu0 %1444 }
 0x1e0   : > { %v1781_v60 = vsel %vm1757_vm8, %v1748_v48, %v1477_v31  ;;  %v1765_v21 = vsel %vm1757_vm8, %v1732_v37, %v1445_v13  ;;  %v8792_v37 = vld [vmem:[#allocation23_spill] sm:$0xff] }
 0x1e1   : > { %1358 = vrot.lane.b32.xlu1 %v5208_v8, %s5698_s12  ;;  %1326 = vrot.lane.b32.xlu0 %v5192_v14, %s5698_s12  ;;  %v1602_v31 = vsel %vm1592_vm3, %v8792_v37, %v6840_v24 }
 0x1e2   : > { %5467 = vmatmul.mubr.msk.f32.gmra.mxu0 %vm1792_vm9, %v1765_v21  ;;  %5491 = vmatmul.mubr.msk.f32.gmra.mxu1 %vm1792_vm9, %v1781_v60 }
 0x1e3   : > { %v6919_v7 = vpop.permute.xlu1 %1096  ;;  %v6921_v33 = vpop.permute.xlu0 %1064 }
 0x1e5   : > { %852 = vrot.lane.b32.xlu1 %v5177_v59, %s5694_s8  ;;  %820 = vrot.lane.b32.xlu0 %v5161_v42, %s5694_s8  ;;  %v5162_v42 = vld [vmem:[%s5790_s5 + $0xd8] sm:$0xff]  ;;  %s4891_s8 = sand.u32 1, %s5756_s19  }
 0x1e7   : > { %v1223_v6 = vpop.permute.xlu1 %1222  ;;  %v1191_v28 = vpop.permute.xlu0 %1190 }
 0x1e8   : > { %v1716_v62 = vsel %vm1691_vm6, %v1683_v18, %v1223_v6  ;;  %v1700_v59 = vsel %vm1691_vm6, %v1667_v50, %v1191_v28  ;;  %v1635_v6 = vsel %vm1625_vm4, %v1602_v31, %v6881_v26  ;;  %v5195_v26 = vld [vmem:[%s5790_s5 + $0xe1] sm:$0xff]  ;;  %v8795_v18 = vld [vmem:[#allocation33_spill] sm:$0xff] }
 0x1e9   : > { %978 = vrot.lane.b32.xlu1 %v5208_v8, %s5695_s9  ;;  %946 = vrot.lane.b32.xlu0 %v5192_v14, %s5695_s9  ;;  %v5194_v8 = vld [vmem:[%s5790_s5 + $0xd9] sm:$0xff] }
 0x1ea   : > { %v8791_v14 = vld [vmem:[#allocation30_spill] sm:$0xff] }
 0x1eb   : > { %v843_v57 = vpop.permute.xlu1 %842  ;;  %v811_v30 = vpop.permute.xlu0 %810  ;;  %v1618_v48 = vsel %vm1592_vm3, %v8791_v14, %v6838_v32 }
 0x1ec   : > { %v6931_v56 = vsel %vm1592_vm3, %v6387_v23, %v843_v57  ;;  %v6935_v44 = vsel %vm1592_vm3, %v6268_v20, %v811_v30  ;;  %v1651_v21 = vsel %vm1625_vm4, %v1618_v48, %v6879_v36  ;;  %v5211_v36 = vld [vmem:[%s5790_s5 + $0x1a1] sm:$0xff] }
 0x1ed   : > { %1360 = vrot.lane.b32.xlu1 %v5209_v19, %s5698_s12  ;;  %1328 = vrot.lane.b32.xlu0 %v5193_v4, %s5698_s12  ;;  %v1684_v28 = vsel %vm1658_vm5, %v1651_v21, %v6919_v7 }
 0x1ef   : > { %v6941_v17 = vpop.permute.xlu1 %1224  ;;  %v6943_v25 = vpop.permute.xlu0 %1192 }
 0x1f0   : > { %v1717_v32 = vsel %vm1691_vm6, %v1684_v28, %v6941_v17  ;;  %v5226_v17 = vld [vmem:[%s5790_s5 + $0xda] sm:$0xff] }
 0x1f1   : > { %1486 = vrot.lane.b32.xlu1 %v5240_v53, %s5699_s27  ;;  %1454 = vrot.lane.b32.xlu0 %v5224_v9, %s5699_s27 }
 0x1f3   : > { %v1351_v23 = vpop.permute.xlu1 %1350  ;;  %v1319_v52 = vpop.permute.xlu0 %1318 }
 0x1f4   : > { %v1749_v27 = vsel %vm1724_vm7, %v1716_v62, %v1351_v23  ;;  %v1733_v47 = vsel %vm1724_vm7, %v1700_v59, %v1319_v52  ;;  %v5243_v52 = vld [vmem:[%s5790_s5 + $0x1a2] sm:$0xff] }
 0x1f5   : > { %980 = vrot.lane.b32.xlu1 %v5209_v19, %s5695_s9  ;;  %948 = vrot.lane.b32.xlu0 %v5193_v4, %s5695_s9  ;;  %v1668_v19 = vsel %vm1658_vm5, %v1635_v6, %v6921_v33  ;;  %v8796_v62 = vld [vmem:[#allocation26_spill] sm:$0xff] }
 0x1f6   : > { %v1701_v24 = vsel %vm1691_vm6, %v1668_v19, %v6943_v25 }
 0x1f7   : > { %v845_v20 = vpop.permute.xlu1 %844  ;;  %v813_v5 = vpop.permute.xlu0 %812 }
 0x1f8   : > { %v6951_v54 = vsel %vm1592_vm3, %v8786_v40, %v845_v20  ;;  %v6955_v29 = vsel %vm1592_vm3, %v8787_v15, %v813_v5  ;;  %v5227_v20 = vld [vmem:[%s5790_s5 + $0xe2] sm:$0xff] }
 0x1f9   : > { %1106 = vrot.lane.b32.xlu1 %v5240_v53, %s5696_s10  ;;  %1074 = vrot.lane.b32.xlu0 %v5224_v9, %s5696_s10  ;;  %v5242_v9 = vld [vmem:[%s5790_s5 + $0x19a] sm:$0xff]  ;;  %s5705_s5 = smov 24  }
 0x1fb   : > { %v6961_v3 = vpop.permute.xlu1 %970  ;;  %v6963_v11 = vpop.permute.xlu0 %938 }
 0x1fd   : > { %1488 = vrot.lane.b32.xlu1 %v5241_v39, %s5699_s27  ;;  %1456 = vrot.lane.b32.xlu0 %v5225_v34, %s5699_s27 }
 0x1ff   : > { %v1353_v12 = vpop.permute.xlu1 %1352  ;;  %v1321_v46 = vpop.permute.xlu0 %1320 }
 0x200   : > { %v1750_v4 = vsel %vm1724_vm7, %v1717_v32, %v1353_v12  ;;  %v1734_v7 = vsel %vm1724_vm7, %v1701_v24, %v1321_v46 }
 0x201   : > { %1108 = vrot.lane.b32.xlu1 %v5241_v39, %s5696_s10  ;;  %1076 = vrot.lane.b32.xlu0 %v5225_v34, %s5696_s10  ;;  %v8793_v34 = vld [vmem:[#allocation34_spill] sm:$0xff]  ;;  %s200_s10 = scalar_lea.vmem [#allocation4], %s8603_s7 }
 0x203   : > { %v1479_v35 = vpop.permute.xlu1 %1478  ;;  %v1447_v51 = vpop.permute.xlu0 %1446 }
 0x204   : > { %v1782_v41 = vsel %vm1757_vm8, %v1749_v27, %v1479_v35  ;;  %v1766_v1 = vsel %vm1757_vm8, %v1733_v47, %v1447_v51 }
 0x205   : > { %1234 = vrot.lane.b32.xlu1 %v5178_v61, %s5697_s11  ;;  %1202 = vrot.lane.b32.xlu0 %v5162_v42, %s5697_s11 }
 0x206   : > { %5469 = vmatprep.mubr.msk.f32.mxu0 %vm1792_vm9, %v1766_v1  ;;  %5493 = vmatprep.mubr.msk.f32.mxu1 %vm1792_vm9, %v1782_v41  ;;  %v1652_v41 = vsel %vm1625_vm4, %v6931_v56, %v6961_v3  ;;  %v1636_v1 = vsel %vm1625_vm4, %v6935_v44, %v6963_v11 }
 0x207   : > { %v6997_v10 = vpop.permute.xlu1 %972  ;;  %v6999_v45 = vpop.permute.xlu0 %940 }
 0x208   : > { %v1653_v21 = vsel %vm1625_vm4, %v6951_v54, %v6997_v10  ;;  %v1637_v6 = vsel %vm1625_vm4, %v6955_v29, %v6999_v45 }
 0x209   : > { %1236 = vrot.lane.b32.xlu1 %v5179_v22, %s5697_s11  ;;  %1204 = vrot.lane.b32.xlu0 %v5163_v63, %s5697_s11  ;;  %s4921_s11 = sshll.u32 %s200_s10, 4  ;;  %s8615_s11 = int_to_ptr.vmem [resolvable:$true] %s4921_s11 }
 0x20b   : > { %v1099_v13 = vpop.permute.xlu1 %1098  ;;  %v1067_v60 = vpop.permute.xlu0 %1066 }
 0x20c   : > { %v1685_v22 = vsel %vm1658_vm5, %v1652_v41, %v1099_v13  ;;  %v1669_v63 = vsel %vm1658_vm5, %v1636_v1, %v1067_v60 }
 0x20d   : > { %1362 = vrot.lane.b32.xlu1 %v5210_v55, %s5698_s12  ;;  %1330 = vrot.lane.b32.xlu0 %v5194_v8, %s5698_s12 }
 0x20f   : > { %v1481_v33 = vpop.permute.xlu1 %1480  ;;  %v1449_v57 = vpop.permute.xlu0 %1448 }
 0x210   : > { %v1783_v30 = vsel %vm1757_vm8, %v1750_v4, %v1481_v33  ;;  %v1767_v53 = vsel %vm1757_vm8, %v1734_v7, %v1449_v57 }
 0x211   : > { %1364 = vrot.lane.b32.xlu1 %v5211_v36, %s5698_s12  ;;  %1332 = vrot.lane.b32.xlu0 %v5195_v26, %s5698_s12 }
 0x212   : > { %5470 = vmatmul.mubr.msk.f32.gmra.mxu0 %vm1792_vm9, %v1767_v53  ;;  %5494 = vmatmul.mubr.msk.f32.gmra.mxu1 %vm1792_vm9, %v1783_v30 }
 0x213   : > { %v1101_v25 = vpop.permute.xlu1 %1100  ;;  %v1069_v23 = vpop.permute.xlu0 %1068 }
 0x214   : > { %v1686_v28 = vsel %vm1658_vm5, %v1653_v21, %v1101_v25  ;;  %v1670_v19 = vsel %vm1658_vm5, %v1637_v6, %v1069_v23 }
 0x215   : > { %1490 = vrot.lane.b32.xlu1 %v5242_v9, %s5699_s27  ;;  %1458 = vrot.lane.b32.xlu0 %v5226_v17, %s5699_s27 }
 0x217   : > { %v1227_v5 = vpop.permute.xlu1 %1226  ;;  %v1195_v40 = vpop.permute.xlu0 %1194 }
 0x218   : > { %v1718_v55 = vsel %vm1691_vm6, %v1685_v22, %v1227_v5  ;;  %v1702_v8 = vsel %vm1691_vm6, %v1669_v63, %v1195_v40 }
 0x219   : > { %1492 = vrot.lane.b32.xlu1 %v5243_v52, %s5699_s27  ;;  %1460 = vrot.lane.b32.xlu0 %v5227_v20, %s5699_s27 }
 0x21b   : > { %v847_v15 = vpop.permute.xlu1 %846  ;;  %v815_v39 = vpop.permute.xlu0 %814 }
 0x21c   : > { %v1621_v43 = vsel %vm1592_vm3, %v8793_v34, %v847_v15  ;;  %v1605_v0 = vsel %vm1592_vm3, %v8794_v49, %v815_v39 }
 0x21f   : > { %v1229_v58 = vpop.permute.xlu1 %1228  ;;  %v1197_v38 = vpop.permute.xlu0 %1196 }
 0x220   : > { %v1719_v32 = vsel %vm1691_vm6, %v1686_v28, %v1229_v58  ;;  %v1703_v24 = vsel %vm1691_vm6, %v1670_v19, %v1197_v38  ;;  %v5459_v19 = vpop.f32.mrf.mxu0 }
 0x223   : > { %v1355_v12 = vpop.permute.xlu1 %1354  ;;  %v1323_v46 = vpop.permute.xlu0 %1322 }
 0x224   : > { %v1751_v14 = vsel %vm1724_vm7, %v1718_v55, %v1355_v12  ;;  %v1735_v48 = vsel %vm1724_vm7, %v1702_v8, %v1323_v46 }
 0x227   : > { %v849_v16 = vpop.permute.xlu1 %848  ;;  %v817_v2 = vpop.permute.xlu0 %816 }
 0x228   : > { %v7049_v50 = vsel %vm1592_vm3, %v8795_v18, %v849_v16  ;;  %v7053_v59 = vsel %vm1592_vm3, %v8796_v62, %v817_v2 }
 0x22b   : > { %v975_v61 = vpop.permute.xlu1 %974  ;;  %v943_v42 = vpop.permute.xlu0 %942 }
 0x22c   : > { %v1654_v27 = vsel %vm1625_vm4, %v1621_v43, %v975_v61  ;;  %v1638_v47 = vsel %vm1625_vm4, %v1605_v0, %v943_v42 }
 0x22f   : > { %v1357_v35 = vpop.permute.xlu1 %1356  ;;  %v1325_v51 = vpop.permute.xlu0 %1324 }
 0x230   : > { %v1752_v36 = vsel %vm1724_vm7, %v1719_v32, %v1357_v35  ;;  %v1736_v26 = vsel %vm1724_vm7, %v1703_v24, %v1325_v51  ;;  %v8797_v24 = vld [vmem:[#allocation36_spill] sm:$0xff] }
 0x233   : > { %v1483_v37 = vpop.permute.xlu1 %1482  ;;  %v1451_v31 = vpop.permute.xlu0 %1450 }
 0x234   : > { %v1784_v56 = vsel %vm1757_vm8, %v1751_v14, %v1483_v37  ;;  %v1768_v3 = vsel %vm1757_vm8, %v1735_v48, %v1451_v31 }
 0x235   : > { %5472 = vmatprep.mubr.msk.f32.mxu0 %vm1792_vm9, %v1768_v3  ;;  %5496 = vmatprep.mubr.msk.f32.mxu1 %vm1792_vm9, %v1784_v56  ;;  %v5700_v56 = vmov 1983009808  }
 0x236   : > { %v2152_v3 = vunpack.c.l.s4 %v5700_v56 }
 0x237   : > { %v977_v44 = vpop.permute.xlu1 %976  ;;  %v945_v11 = vpop.permute.xlu0 %944 }
 0x238   : > { %v1655_v18 = vsel %vm1625_vm4, %v7049_v50, %v977_v44  ;;  %v1639_v62 = vsel %vm1625_vm4, %v7053_v59, %v945_v11  ;;  %v2154_v44 = vlaneseq }
 0x23a   : > { %v7121_v21 = vshrl.u32 %v2154_v44, 7 }
 0x23b   : > { %v1103_v13 = vpop.permute.xlu1 %1102  ;;  %v1071_v60 = vpop.permute.xlu0 %1070 }
 0x23c   : > { %v1687_v16 = vsel %vm1658_vm5, %v1654_v27, %v1103_v13  ;;  %v1671_v2 = vsel %vm1658_vm5, %v1638_v47, %v1071_v60  ;;  %v2153_v60 = vunpack.c.0.s8 %v2152_v3 }
 0x23e   : > { %v7124_v32 = vsub.s32 %v2153_v60, %v7121_v21 }
 0x23f   : > { %v1485_v4 = vpop.permute.xlu1 %1484  ;;  %v1453_v7 = vpop.permute.xlu0 %1452 }
 0x240   : > { %v1785_v54 = vsel %vm1757_vm8, %v1752_v36, %v1485_v4  ;;  %v1769_v10 = vsel %vm1757_vm8, %v1736_v26, %v1453_v7  ;;  %v8798_v26 = vld [vmem:[#allocation29_spill] sm:$0xff] }
 0x241   : > { %5473 = vmatmul.mubr.msk.f32.gmra.mxu0 %vm1792_vm9, %v1769_v10  ;;  %5497 = vmatmul.mubr.msk.f32.gmra.mxu1 %vm1792_vm9, %v1785_v54  ;;  %v1959_v10 = vpop.f32.mrf.mxu0 }
 0x243   : > { %v1105_v29 = vpop.permute.xlu1 %1104  ;;  %v1073_v45 = vpop.permute.xlu0 %1072 }
 0x244   : > { %v1688_v41 = vsel %vm1658_vm5, %v1655_v18, %v1105_v29  ;;  %v1672_v1 = vsel %vm1658_vm5, %v1639_v62, %v1073_v45  ;;  %v2150_v62 = vcombine.high %v1959_v10, %v1959_v10 }
 0x247   : > { %v1231_v33 = vpop.permute.xlu1 %1230  ;;  %v1199_v57 = vpop.permute.xlu0 %1198 }
 0x248   : > { %v1720_v61 = vsel %vm1691_vm6, %v1687_v16, %v1231_v33  ;;  %v1704_v42 = vsel %vm1691_vm6, %v1671_v2, %v1199_v57  ;;  %v2167_v33 = vcombine.high %v5459_v19, %v5459_v19 }
 0x24a   : > { %v2181_v16 = vrot.slane %v2167_v33, %v7124_v32 }
 0x24b   : > { %v851_v30 = vpop.permute.xlu1 %850  ;;  %v819_v53 = vpop.permute.xlu0 %818 }
 0x24c   : > { %v1623_v36 = vsel %vm1592_vm3, %v8797_v24, %v851_v30  ;;  %v1607_v4 = vsel %vm1592_vm3, %v8798_v26, %v819_v53  ;;  %v8799_v53 = vld [vmem:[#allocation35_spill] sm:$0xff] }
 0x24f   : > { %v1233_v9 = vpop.permute.xlu1 %1232  ;;  %v1201_v17 = vpop.permute.xlu0 %1200 }
 0x250   : > { %v1721_v22 = vsel %vm1691_vm6, %v1688_v41, %v1233_v9  ;;  %v1705_v50 = vsel %vm1691_vm6, %v1672_v1, %v1201_v17  ;;  %v2174_v17 = vrot.slane %v5459_v19, %v7124_v32  ;;  %v2157_v41 = vrot.slane %v1959_v10, %v7124_v32 }
 0x252   : > { %v2182_v18 = vcombine.high %v2174_v17, %v2174_v17  ;;  %v5277_v44 = vrot.slane %v2157_v41, 9 }
 0x253   : > { %v1359_v25 = vpop.permute.xlu1 %1358  ;;  %v1327_v23 = vpop.permute.xlu0 %1326 }
 0x254   : > { %v1753_v27 = vsel %vm1724_vm7, %v1720_v61, %v1359_v25  ;;  %v1737_v47 = vsel %vm1724_vm7, %v1704_v42, %v1327_v23  ;;  %v5462_v25 = vpop.f32.mrf.mxu0  ;;  %v3014_v33 = vmax.f32 %v2157_v41, %v5277_v44 }
 0x255   : > { %v2201_v56 = vcombine.high %v5462_v25, %v5462_v25 }
 0x256   : > { %v1969_v61 = vpop.f32.mrf.mxu0 }
 0x257   : > { %v7089_v52 = vpop.permute.xlu1 %852  ;;  %v7091_v20 = vpop.permute.xlu0 %820  ;;  %v2184_v3 = vcombine.high %v1969_v61, %v1969_v61  ;;  %v2215_v10 = vrot.slane %v2201_v56, %v7124_v32 }
 0x25b   : > { %v979_v5 = vpop.permute.xlu1 %978  ;;  %v947_v40 = vpop.permute.xlu0 %946 }
 0x25c   : > { %v1656_v29 = vsel %vm1625_vm4, %v1623_v36, %v979_v5  ;;  %v1640_v45 = vsel %vm1625_vm4, %v1607_v4, %v947_v40  ;;  %v8800_v5 = vld [vmem:[#allocation28_spill] sm:$0xff] }
 0x25d   : > { %v1608_v40 = vsel %vm1592_vm3, %v8800_v5, %v7091_v20 }
 0x25f   : > { %v1361_v15 = vpop.permute.xlu1 %1360  ;;  %v1329_v39 = vpop.permute.xlu0 %1328 }
 0x260   : > { %v1754_v55 = vsel %vm1724_vm7, %v1721_v22, %v1361_v15  ;;  %v1738_v8 = vsel %vm1724_vm7, %v1705_v50, %v1329_v39  ;;  %v1624_v15 = vsel %vm1592_vm3, %v8799_v53, %v7089_v52  ;;  %v2183_v50 = vcombine.high %v2181_v16, %v2181_v16 }
 0x262   : > { %v5284_v60 = vrot.slane %v2183_v50, 9 }
 0x263   : > { %v1487_v34 = vpop.permute.xlu1 %1486  ;;  %v1455_v43 = vpop.permute.xlu0 %1454 }
 0x264   : > { %v1786_v59 = vsel %vm1757_vm8, %v1753_v27, %v1487_v34  ;;  %v1770_v63 = vsel %vm1757_vm8, %v1737_v47, %v1455_v43 }
 0x265   : > { %5475 = vmatprep.mubr.msk.f32.mxu0 %vm1792_vm9, %v1770_v63  ;;  %5499 = vmatprep.mubr.msk.f32.mxu1 %vm1792_vm9, %v1786_v59  ;;  %v5281_v59 = vrot.slane %v2174_v17, 9  ;;  %v2191_v63 = vrot.slane %v1969_v61, %v7124_v32 }
 0x267   : > { %v7093_v49 = vpop.permute.xlu1 %980  ;;  %v7095_v0 = vpop.permute.xlu0 %948  ;;  %v2199_v19 = vcombine.high %v2191_v63, %v2191_v63 }
 0x26b   : > { %v1107_v58 = vpop.permute.xlu1 %1106  ;;  %v1075_v38 = vpop.permute.xlu0 %1074 }
 0x26c   : > { %v1689_v57 = vsel %vm1658_vm5, %v1656_v29, %v1107_v58  ;;  %v1673_v9 = vsel %vm1658_vm5, %v1640_v45, %v1075_v38  ;;  %v1657_v38 = vsel %vm1625_vm4, %v1624_v15, %v7093_v49  ;;  %v5483_v49 = vpop.f32.mrf.mxu1  ;;  %v2198_v29 = vrot.slane %v2184_v3, %v7124_v32 }
 0x26f   : > { %v1489_v12 = vpop.permute.xlu1 %1488  ;;  %v1457_v46 = vpop.permute.xlu0 %1456 }
 0x270   : > { %v1787_v14 = vsel %vm1757_vm8, %v1754_v55, %v1489_v12  ;;  %v1771_v48 = vsel %vm1757_vm8, %v1738_v8, %v1457_v46  ;;  %v1641_v12 = vsel %vm1625_vm4, %v1608_v40, %v7095_v0  ;;  %v5282_v55 = vrot.slane %v2182_v18, 9 }
 0x271   : > { %5476 = vmatmul.mubr.msk.f32.gmra.mxu0 %vm1792_vm9, %v1771_v48  ;;  %5500 = vmatmul.mubr.msk.f32.gmra.mxu1 %vm1792_vm9, %v1787_v14  ;;  %v2164_v8 = vrot.slane %v2150_v62, %v7124_v32  ;;  %v2439_v14 = vcombine.high %v5483_v49, %v5483_v49  ;;  %v5283_v48 = vrot.slane %v2181_v16, 9 }
 0x272   : > { %v3019_v24 = vmax.f32 %v2182_v18, %v5282_v55  ;;  %v5347_v18 = vrot.slane %v2215_v10, 9 }
 0x273   : > { %v1109_v35 = vpop.permute.xlu1 %1108  ;;  %v1077_v51 = vpop.permute.xlu0 %1076  ;;  %v2166_v36 = vcombine.high %v2164_v8, %v2164_v8  ;;  %v2453_v26 = vrot.slane %v2439_v14, %v7124_v32  ;;  %v5279_v45 = vrot.slane %v2164_v8, 9 }
 0x274   : > { %v1690_v20 = vsel %vm1658_vm5, %v1657_v38, %v1109_v35  ;;  %v1674_v2 = vsel %vm1658_vm5, %v1641_v12, %v1077_v51  ;;  %v3276_v14 = vmax.f32 %v2215_v10, %v5347_v18 }
 0x275   : > { %v5280_v53 = vrot.slane %v2166_v36, 9  ;;  %v2455_v15 = vcombine.high %v2453_v26, %v2453_v26  ;;  %v3016_v38 = vmax.f32 %v2164_v8, %v5279_v45 }
 0x277   : > { %v1235_v37 = vpop.permute.xlu1 %1234  ;;  %v1203_v31 = vpop.permute.xlu0 %1202 }
 0x278   : > { %v1722_v30 = vsel %vm1691_vm6, %v1689_v57, %v1235_v37  ;;  %v1706_v23 = vsel %vm1691_vm6, %v1673_v9, %v1203_v31  ;;  %v2165_v37 = vcombine.high %v2157_v41, %v2157_v41  ;;  %v2039_v31 = vpop.f32.mrf.mxu1  ;;  %v3017_v41 = vmax.f32 %v2166_v36, %v5280_v53 }
 0x279   : > { %v2422_v4 = vcombine.high %v2039_v31, %v2039_v31  ;;  %v2429_v57 = vrot.slane %v2039_v31, %v7124_v32 }
 0x27b   : > { %v1237_v11 = vpop.permute.xlu1 %1236  ;;  %v1205_v13 = vpop.permute.xlu0 %1204  ;;  %v2436_v5 = vrot.slane %v2422_v4, %v7124_v32  ;;  %v2437_v12 = vcombine.high %v2429_v57, %v2429_v57 }
 0x27c   : > { %v1723_v0 = vsel %vm1691_vm6, %v1690_v20, %v1237_v11  ;;  %v1707_v42 = vsel %vm1691_vm6, %v1674_v2, %v1205_v13  ;;  %v2208_v11 = vrot.slane %v5462_v25, %v7124_v32  ;;  %v7169_v13 = vsub.s32 0, %v7121_v21 }
 0x27d   : > { %v5315_v2 = vrot.slane %v2453_v26, 9  ;;  %v5311_v8 = vrot.slane %v2436_v5, 9 }
 0x27e   : > { %v2216_v9 = vcombine.high %v2208_v11, %v2208_v11  ;;  %v5345_v40 = vrot.slane %v2208_v11, 9 }
 0x27f   : > { %v1363_v6 = vpop.permute.xlu1 %1362  ;;  %v1331_v28 = vpop.permute.xlu0 %1330  ;;  %v7202_v4 = vmax.f32 %v2436_v5, %v5311_v8 }
 0x280   : > { %v1755_v39 = vsel %vm1724_vm7, %v1722_v30, %v1363_v6  ;;  %v1739_v34 = vsel %vm1724_vm7, %v1706_v23, %v1331_v28  ;;  %v3018_v6 = vmax.f32 %v2174_v17, %v5281_v59  ;;  %v2446_v28 = vrot.slane %v5483_v49, %v7124_v32 }
 0x281   : > { %v3021_v17 = vmax.f32 %v2183_v50, %v5284_v60  ;;  %v5342_v23 = vrot.slane %v2199_v19, 9  ;;  %v5316_v49 = vrot.slane %v2455_v15, 9 }
 0x282   : > { %v2454_v25 = vcombine.high %v2446_v28, %v2446_v28  ;;  %v5313_v30 = vrot.slane %v2446_v28, 9 }
 0x283   : > { %v1365_v7 = vpop.permute.xlu1 %1364  ;;  %v1333_v54 = vpop.permute.xlu0 %1332  ;;  %v3271_v62 = vmax.f32 %v2199_v19, %v5342_v23  ;;  %v7187_v31 = vmax.f32 %v2455_v15, %v5316_v49 }
 0x284   : > { %v1756_v1 = vsel %vm1724_vm7, %v1723_v0, %v1365_v7  ;;  %v1740_v35 = vsel %vm1724_vm7, %v1707_v42, %v1333_v54  ;;  %v3020_v7 = vmax.f32 %v2181_v16, %v5283_v48  ;;  %v5278_v54 = vrot.slane %v2165_v37, 9  ;;  %v7177_v16 = vpop.f32.mrf.mxu1 }
 0x285   : > { %v5314_v20 = vrot.slane %v2454_v25, 9  ;;  %v7179_v61 = vmax.f32 %v2446_v28, %v5313_v30  ;;  %v2438_v0 = vcombine.high %v2436_v5, %v2436_v5  ;;  %v3274_v42 = vmax.f32 %v2208_v11, %v5345_v40 }
 0x286   : > { %v2049_v59 = vpop.f32.mrf.mxu1  ;;  %v2480_v15 = vrot.slane %v7177_v16, %v7124_v32 }
 0x287   : > { %v1491_v43 = vpop.permute.xlu1 %1490  ;;  %v1459_v58 = vpop.permute.xlu0 %1458  ;;  %v7181_v55 = vmax.f32 %v2454_v25, %v5314_v20  ;;  %v5312_v56 = vrot.slane %v2438_v0, 9  ;;  %v7189_v3 = vmax.f32 %v3018_v6, %v3274_v42  ;;  %v2463_v60 = vrot.slane %v2049_v59, %v7124_v32 }
 0x288   : > { %v1788_v46 = vsel %vm1757_vm8, %v1755_v39, %v1491_v43  ;;  %v1772_v52 = vsel %vm1757_vm8, %v1739_v34, %v1459_v58  ;;  %v3015_v39 = vmax.f32 %v2165_v37, %v5278_v54  ;;  %v2217_v34 = vcombine.high %v2215_v10, %v2215_v10 }
 0x289   : > { %5478 = vmatprep.mubr.msk.f32.mxu0 %vm1792_vm9, %v1772_v52  ;;  %5502 = vmatprep.mubr.msk.f32.mxu1 %vm1792_vm9, %v1788_v46  ;;  %v2200_v43 = vcombine.high %v2198_v29, %v2198_v29  ;;  %v5341_v58 = vrot.slane %v2191_v63, 9  ;;  %v5346_v46 = vrot.slane %v2216_v9, 9  ;;  %v5343_v52 = vrot.slane %v2198_v29, 9 }
 0x28a   : > { %v7183_v48 = vmax.f32 %v3015_v39, %v3271_v62  ;;  %v7185_v37 = vmax.f32 %v2453_v26, %v5315_v2  ;;  %v7204_v6 = vmax.f32 %v3020_v7, %v3276_v14  ;;  %v2456_v10 = vcombine.high %v2049_v59, %v2049_v59 }
 0x28b   : > { %v1493_v27 = vpop.permute.xlu1 %1492  ;;  %v1461_v51 = vpop.permute.xlu0 %1460  ;;  %v3272_v50 = vmax.f32 %v2198_v29, %v5343_v52  ;;  %v7208_v29 = vmax.f32 %v2438_v0, %v5312_v56  ;;  %v4092_v45 = vrot.slane %v7189_v3, %v7169_v13  ;;  %v2471_v25 = vcombine.high %v2463_v60, %v2463_v60 }
 0x28c   : > { %v1789_v47 = vsel %vm1757_vm8, %v1756_v1, %v1493_v27  ;;  %v1773_v22 = vsel %vm1757_vm8, %v1740_v35, %v1461_v51  ;;  %v5348_v1 = vrot.slane %v2217_v34, 9  ;;  %v5344_v35 = vrot.slane %v2200_v43, 9 }
 0x28d   : > { %5479 = vmatmul.mubr.msk.f32.gmra.mxu0 %vm1792_vm9, %v1773_v22  ;;  %5503 = vmatmul.mubr.msk.f32.gmra.mxu1 %vm1792_vm9, %v1789_v47  ;;  %v3270_v27 = vmax.f32 %v2191_v63, %v5341_v58  ;;  %v5309_v51 = vrot.slane %v2429_v57, 9  ;;  %v5310_v47 = vrot.slane %v2437_v12, 9  ;;  %v3275_v22 = vmax.f32 %v2216_v9, %v5346_v46 }
 0x28e   : > { %v3277_v63 = vmax.f32 %v2217_v34, %v5348_v1  ;;  %v3273_v44 = vmax.f32 %v2200_v43, %v5344_v35  ;;  %v7200_v26 = vmax.f32 %v3016_v38, %v3272_v50  ;;  %v4417_v54 = vmul.f32 %v7183_v48, %v7183_v48 }
 0x28f   : > { %v7191_v11 = vmax.f32 %v3014_v33, %v3270_v27  ;;  %v7194_v28 = vmax.f32 %v2429_v57, %v5309_v51  ;;  %v7196_v19 = vmax.f32 %v2437_v12, %v5310_v47  ;;  %v7198_v36 = vmax.f32 %v3019_v24, %v3275_v22 }
 0x290   : > { %v7214_v24 = vmul.f32 %v7189_v3, %v7189_v3  ;;  %v2473_v33 = vcombine.high %v7177_v16, %v7177_v16  ;;  %v7218_v57 = vmax.f32 %v3021_v17, %v3277_v63  ;;  %v3337_v7 = vmax.f32 %v3017_v41, %v3273_v44 }
 0x291   : > { %v4416_v9 = vmul.f32 %v7191_v11, %v7191_v11  ;;  %v7223_v30 = vrot.slane %v7198_v36, 7  ;;  %v4080_v23 = vrot.slane %v7183_v48, %v7169_v13  ;;  %v4418_v53 = vmul.f32 %v7200_v26, %v7200_v26 }
 0x292   : > { %v4096_v17 = vrot.slane %v7198_v36, %v7169_v13  ;;  %v4100_v5 = vrot.slane %v7204_v6, %v7169_v13  ;;  %v4551_v40 = vrot.slane %v4417_v54, %v7169_v13  ;;  %v2470_v39 = vrot.slane %v2456_v10, %v7124_v32 }
 0x293   : > { %v7239_v34 = vmul.f32 %v7198_v36, %v7198_v36  ;;  %v7243_v43 = vmul.f32 %v7204_v6, %v7204_v6  ;;  %v4076_v58 = vrot.slane %v7191_v11, %v7169_v13  ;;  %v4084_v38 = vrot.slane %v7200_v26, %v7169_v13 }
 0x294   : > { %v4419_v12 = vmul.f32 %v3337_v7, %v3337_v7  ;;  %v4547_v46 = vrot.slane %v4416_v9, %v7169_v13  ;;  %v2487_v52 = vrot.slane %v2473_v33, %v7124_v32  ;;  %v5374_v16 = vrot.slane %v2471_v25, 9 }
 0x295   : > { %v4563_v20 = vrot.slane %v7214_v24, %v7169_v13  ;;  %v4329_v2 = vsel %vm3468_vm10, %v4080_v23, %v4076_v58  ;;  %v4555_v18 = vrot.slane %v4418_v53, %v7169_v13  ;;  %v2488_v62 = vcombine.high %v2480_v15, %v2480_v15 }
 0x296   : > { %v3486_v49 = vsel %vm3468_vm10, %v7223_v30, %v7189_v3  ;;  %v4800_v0 = vsel %vm3468_vm10, %v4551_v40, %v4547_v46  ;;  %v2472_v42 = vcombine.high %v2470_v39, %v2470_v39  ;;  %v5373_v41 = vrot.slane %v2463_v60, 9 }
 0x297   : > { %v7260_v1 = vrot.slane %v7218_v57, 7  ;;  %v4088_v27 = vrot.slane %v3337_v7, %v7169_v13  ;;  %v5375_v51 = vrot.slane %v2470_v39, 9  ;;  %v4330_v47 = vsel %vm3462_vm11, %v4084_v38, %v4329_v2 }
 0x298   : > { %v4559_v22 = vrot.slane %v4419_v12, %v7169_v13  ;;  %v2489_v50 = vcombine.high %v2487_v52, %v2487_v52  ;;  %v3303_v59 = vmax.f32 %v2471_v25, %v5374_v16  ;;  %v7269_v8 = vmul.f32 %v7218_v57, %v7218_v57 }
 0x299   : > { %v7272_v14 = vrot.slane %v7183_v48, 7  ;;  %v4801_v56 = vsel %vm3462_vm11, %v4555_v18, %v4800_v0  ;;  %v5378_v63 = vrot.slane %v2488_v62, 9  ;;  %v3487_v44 = vsel %vm3470_vm12, %v7223_v30, %v3486_v49 }
 0x29a   : > { %v5377_v54 = vrot.slane %v2480_v15, 9  ;;  %v5376_v10 = vrot.slane %v2472_v42, 9  ;;  %v3302_v24 = vmax.f32 %v2463_v60, %v5373_v41  ;;  %v4567_v33 = vrot.slane %v7239_v34, %v7169_v13 }
 0x29b   : > { %v4331_v9 = vsel %vm3470_vm12, %v4088_v27, %v4330_v47  ;;  %v5379_v25 = vrot.slane %v2487_v52, 9  ;;  %v3304_v23 = vmax.f32 %v2470_v39, %v5375_v51  ;;  %v4571_v48 = vrot.slane %v7243_v43, %v7169_v13 }
 0x29c   : > { %v4802_v53 = vsel %vm3470_vm12, %v4559_v22, %v4801_v56  ;;  %v5380_v40 = vrot.slane %v2489_v50, 9  ;;  %v3367_v58 = vmax.f32 %v7196_v19, %v3303_v59  ;;  %v3493_v38 = vsel %vm3468_vm10, %v7260_v1, %v7204_v6 }
 0x29d   : > { %v3469_v60 = vsel %vm3468_vm10, %v7272_v14, %v7191_v11  ;;  %v7290_v34 = vrot.slane %v3337_v7, 7  ;;  %v3307_v12 = vmax.f32 %v2488_v62, %v5378_v63  ;;  %v4332_v39 = vsel %vm3463_vm13, %v4092_v45, %v4331_v9 }
 0x29e   : > { %v3306_v43 = vmax.f32 %v2480_v15, %v5377_v54  ;;  %v3305_v46 = vmax.f32 %v2472_v42, %v5376_v10  ;;  %v3366_v19 = vmax.f32 %v7194_v28, %v3302_v24  ;;  %v7299_v16 = vsel %vm3472_vm14, %v7223_v30, %v3487_v44 }
 0x29f   : > { %v4803_v2 = vsel %vm3463_vm13, %v4563_v20, %v4802_v53  ;;  %v3308_v18 = vmax.f32 %v2487_v52, %v5379_v25  ;;  %v7303_v11 = vmax.f32 %v7202_v4, %v3304_v23  ;;  %v3471_v3 = vsel %vm3470_vm12, %v7272_v14, %v3469_v60 }
 0x2a0   : > { %v3309_v45 = vmax.f32 %v2489_v50, %v5380_v40  ;;  %v4449_v15 = vmul.f32 %v3367_v58, %v3367_v58  ;;  %v7311_v28 = vsel %vm3470_vm12, %v7260_v1, %v3493_v38  ;;  %v3479_v20 = vsel %vm3468_vm10, %v7290_v34, %v7200_v26 }
 0x2a1   : > { %v4333_v4 = vsel %vm3472_vm14, %v4096_v17, %v4332_v39  ;;  %v7321_v52 = vmax.f32 %v7181_v55, %v3307_v12  ;;  %v4804_v62 = vsel %vm3472_vm14, %v4567_v33, %v4803_v2  ;;  %v7325_v49 = vmax.f32 %v7179_v61, %v3306_v43  ;;  %v5465_v17 = vpop.f32.mrf.mxu0  ;;  %v5489_v39 = vpop.f32.mrf.mxu1 }
 0x2a2   : > { %v3369_v0 = vmax.f32 %v7208_v29, %v3305_v46  ;;  %v4448_v42 = vmul.f32 %v3366_v19, %v3366_v19  ;;  %v7330_v41 = vsel %vm3472_vm14, %v7272_v14, %v3471_v3  ;;  %v7333_v26 = vmax.f32 %v7185_v37, %v3308_v18 }
 0x2a3   : > { %v4208_v36 = vrot.slane %v3367_v58, %v7169_v13  ;;  %v4450_v55 = vmul.f32 %v7303_v11, %v7303_v11  ;;  %v7340_v61 = vsel %vm3470_vm12, %v7290_v34, %v3479_v20  ;;  %v7346_v29 = vsel %vm3465_vm15, %v4100_v5, %v4333_v4  ;;  %v1979_v10 = vpop.f32.mrf.mxu0 }
 0x2a4   : > { %v7349_v27 = vmax.f32 %v7187_v31, %v3309_v45  ;;  %v4679_v37 = vrot.slane %v4449_v15, %v7169_v13  ;;  %v7353_v51 = vsel %vm3465_vm15, %v4571_v48, %v4804_v62  ;;  %v7356_v47 = vrot.slane %v7321_v52, 7 }
 0x2a5   : > { %v7358_v22 = vrot.slane %v3367_v58, 7  ;;  %v4204_v50 = vrot.slane %v3366_v19, %v7169_v13  ;;  %v4220_v6 = vrot.slane %v7325_v49, %v7169_v13  ;;  %v4212_v5 = vrot.slane %v7303_v11, %v7169_v13 }
 0x2a6   : > { %v4451_v31 = vmul.f32 %v3369_v0, %v3369_v0  ;;  %v4675_v59 = vrot.slane %v4448_v42, %v7169_v13  ;;  %v4452_v63 = vmul.f32 %v7325_v49, %v7325_v49  ;;  %v4683_v54 = vrot.slane %v4450_v55, %v7169_v13  ;;  %v2059_v55 = vpop.f32.mrf.mxu1 }
 0x2a7   : > { %v4357_v44 = vsel %vm3468_vm10, %v4208_v36, %v4204_v50  ;;  %v7373_v24 = vrot.slane %v7349_v27, 7  ;;  %v4224_v33 = vrot.slane %v7321_v52, %v7169_v13  ;;  %v7379_v9 = vmul.f32 %v7333_v26, %v7333_v26 }
 0x2a8   : > { %v4828_v25 = vsel %vm3468_vm10, %v4679_v37, %v4675_v59  ;;  %v3598_v23 = vsel %vm3468_vm10, %v7356_v47, %v7325_v49  ;;  %v4453_v48 = vmul.f32 %v7321_v52, %v7321_v52  ;;  %v3584_v53 = vsel %vm3468_vm10, %v7358_v22, %v3366_v19 }
 0x2a9   : > { %8801 = vst [vmem:[#allocation20_spill] sm:$0xff] %v7379_v9  ;;  %v4216_v40 = vrot.slane %v3369_v0, %v7169_v13  ;;  %v4358_v58 = vsel %vm3462_vm11, %v4212_v5, %v4357_v44  ;;  %v4687_v38 = vrot.slane %v4451_v31, %v7169_v13  ;;  %v2235_v60 = vcombine.high %v5465_v17, %v5465_v17  ;;  %v5492_v9 = vpop.f32.mrf.mxu1 }
 0x2aa   : > { %v2218_v12 = vcombine.high %v1979_v10, %v1979_v10  ;;  %v7396_v46 = vmul.f32 %v7349_v27, %v7349_v27  ;;  %v4691_v2 = vrot.slane %v4452_v63, %v7169_v13  ;;  %v4829_v19 = vsel %vm3462_vm11, %v4683_v54, %v4828_v25 }
 0x2ab   : > { %v3599_v18 = vsel %vm3470_vm12, %v7356_v47, %v3598_v23  ;;  %v3605_v3 = vsel %vm3468_vm10, %v7373_v24, %v7333_v26  ;;  %v7405_v45 = vrot.slane %v3369_v0, 7  ;;  %v2242_v15 = vrot.slane %v5465_v17, %v7124_v32 }
 0x2ac   : > { %8802 = vst [vmem:[#allocation17_spill] sm:$0xff] %v7396_v46  ;;  %v3585_v4 = vsel %vm3470_vm12, %v7358_v22, %v3584_v53  ;;  %v4359_v52 = vsel %vm3470_vm12, %v4216_v40, %v4358_v58  ;;  %v2225_v62 = vrot.slane %v1979_v10, %v7124_v32  ;;  %v4830_v49 = vsel %vm3470_vm12, %v4687_v38, %v4829_v19 }
 0x2ad   : > { %v2249_v42 = vrot.slane %v2235_v60, %v7124_v32  ;;  %v2232_v36 = vrot.slane %v2218_v12, %v7124_v32  ;;  %v2507_v0 = vcombine.high %v5489_v39, %v5489_v39  ;;  %v7419_v17 = vsel %vm3472_vm14, %v7356_v47, %v3599_v18 }
 0x2ae   : > { %v7423_v37 = vsel %vm3470_vm12, %v7373_v24, %v3605_v3  ;;  %v4695_v50 = vrot.slane %v4453_v48, %v7169_v13  ;;  %v7430_v31 = vsel %vm3472_vm14, %v7358_v22, %v3585_v4  ;;  %v3591_v59 = vsel %vm3468_vm10, %v7405_v45, %v7303_v11  ;;  %v5468_v4 = vpop.f32.mrf.mxu0 }
 0x2af   : > { %v4360_v63 = vsel %vm3463_vm13, %v4220_v6, %v4359_v52  ;;  %v2250_v44 = vcombine.high %v2242_v15, %v2242_v15  ;;  %v4831_v54 = vsel %vm3463_vm13, %v4691_v2, %v4830_v49  ;;  %v2233_v10 = vcombine.high %v2225_v62, %v2225_v62 }
 0x2b0   : > { %v2514_v25 = vrot.slane %v5489_v39, %v7124_v32  ;;  %v2490_v23 = vcombine.high %v2059_v55, %v2059_v55  ;;  %v2251_v48 = vcombine.high %v2249_v42, %v2249_v42  ;;  %v2234_v53 = vcombine.high %v2232_v36, %v2232_v36 }
 0x2b1   : > { %v2521_v40 = vrot.slane %v2507_v0, %v7124_v32  ;;  %v3592_v58 = vsel %vm3470_vm12, %v7405_v45, %v3591_v59  ;;  %v5289_v38 = vrot.slane %v2242_v15, 9  ;;  %v5285_v60 = vrot.slane %v2225_v62, 9 }
 0x2b2   : > { %v2497_v11 = vrot.slane %v2059_v55, %v7124_v32  ;;  %v7443_v6 = vsel %vm3472_vm14, %v4224_v33, %v4360_v63  ;;  %v7446_v12 = vsel %vm3472_vm14, %v4695_v50, %v4831_v54  ;;  %v5290_v2 = vrot.slane %v2250_v44, 9 }
 0x2b3   : > { %8803 = vst [vmem:[#allocation10_spill] sm:$0xff] %v7446_v12  ;;  %v5291_v39 = vrot.slane %v2249_v42, 9  ;;  %v5286_v19 = vrot.slane %v2233_v10, 9  ;;  %v2522_v18 = vcombine.high %v2514_v25, %v2514_v25  ;;  %v2504_v3 = vrot.slane %v2490_v23, %v7124_v32 }
 0x2b4   : > { %v5701_v52 = vmov 1934713408   ;;  %v5292_v0 = vrot.slane %v2251_v48, 9  ;;  %v5287_v59 = vrot.slane %v2232_v36, 9  ;;  %v5288_v5 = vrot.slane %v2234_v53, 9 }
 0x2b5   : > { %v3727_v49 = vunpack.c.l.s4 %v5701_v52  ;;  %v2523_v55 = vcombine.high %v2521_v40, %v2521_v40  ;;  %v7449_v20 = vmax.f32 %v2242_v15, %v5289_v38  ;;  %v7451_v33 = vmax.f32 %v2225_v62, %v5285_v60 }
 0x2b6   : > { %v5321_v50 = vrot.slane %v2514_v25, 9  ;;  %v2505_v63 = vcombine.high %v2497_v11, %v2497_v11  ;;  %v7453_v54 = vmax.f32 %v2250_v44, %v5290_v2  ;;  %v7455_v7 = vmax.f32 %v2249_v42, %v5291_v39 }
 0x2b7   : > { %8804 = vst [vmem:[#allocation9_spill] sm:$0xff] %v7451_v33  ;;  %v2269_v43 = vcombine.high %v5468_v4, %v5468_v4  ;;  %v2276_v23 = vrot.slane %v5468_v4, %v7124_v32  ;;  %v7458_v56 = vmax.f32 %v2233_v10, %v5286_v19  ;;  %v5322_v52 = vrot.slane %v2522_v18, 9 }
 0x2b8   : > { %v5323_v35 = vrot.slane %v2521_v40, 9  ;;  %v2506_v46 = vcombine.high %v2504_v3, %v2504_v3  ;;  %v7460_v12 = vmax.f32 %v2251_v48, %v5292_v0  ;;  %v7462_v15 = vmax.f32 %v2232_v36, %v5287_v59  ;;  %v1989_v0 = vpop.f32.mrf.mxu0 }
 0x2b9   : > { %8805 = vst [vmem:[#allocation11_spill] sm:$0xff] %v7458_v56  ;;  %v7464_v62 = vmax.f32 %v2234_v53, %v5288_v5  ;;  %v5324_v38 = vrot.slane %v2523_v55, 9  ;;  %v7466_v44 = vmax.f32 %v2514_v25, %v5321_v50  ;;  %v5317_v42 = vrot.slane %v2497_v11, 9 }
 0x2ba   : > { %v5318_v60 = vrot.slane %v2505_v63, 9  ;;  %v5319_v2 = vrot.slane %v2504_v3, 9  ;;  %v2283_v39 = vrot.slane %v2269_v43, %v7124_v32  ;;  %v2284_v10 = vcombine.high %v2276_v23, %v2276_v23 }
 0x2bb   : > { %v2541_v19 = vcombine.high %v5492_v9, %v5492_v9  ;;  %v3728_v4 = vunpack.c.0.s8 %v3727_v49  ;;  %v7469_v33 = vmax.f32 %v2522_v18, %v5322_v52  ;;  %v7471_v56 = vmax.f32 %v2521_v40, %v5323_v35 }
 0x2bc   : > { %v5320_v48 = vrot.slane %v2506_v46, 9  ;;  %v2548_v36 = vrot.slane %v5492_v9, %v7124_v32  ;;  %v7474_v5 = vmax.f32 %v2523_v55, %v5324_v38  ;;  %v7479_v25 = vsel %vm3474_vm0, %v7272_v14, %v7330_v41  ;;  %v2069_v38 = vpop.f32.mrf.mxu1 }
 0x2bd   : > { %v3481_v43 = vsel %vm3472_vm14, %v7290_v34, %v7340_v61  ;;  %v3593_v53 = vsel %vm3472_vm14, %v7405_v45, %v3592_v58  ;;  %v7486_v18 = vmax.f32 %v2497_v11, %v5317_v42  ;;  %v7488_v35 = vmax.f32 %v2505_v63, %v5318_v60 }
 0x2be   : > { %v7490_v40 = vmax.f32 %v2504_v3, %v5319_v2  ;;  %v7495_v9 = vsel %vm3474_vm0, %v7358_v22, %v7430_v31  ;;  %v2285_v14 = vcombine.high %v2283_v39, %v2283_v39  ;;  %v5354_v41 = vrot.slane %v2284_v10, 9 }
 0x2bf   : > { %v2555_v49 = vrot.slane %v2541_v19, %v7124_v32  ;;  %v7499_v61 = vsub.s32 %v3728_v4, %v7121_v21  ;;  %v7501_v58 = vmax.f32 %v2506_v46, %v5320_v48  ;;  %v2556_v11 = vcombine.high %v2548_v36, %v2548_v36  ;;  %v8810_v48 = vld [vmem:[#allocation10_spill] sm:$0xff] }
 0x2c0   : > { %v7505_v3 = vsel %vm3474_vm0, %v7290_v34, %v3481_v43  ;;  %v7509_v59 = vsel %vm3474_vm0, %v7405_v45, %v3593_v53  ;;  %v5353_v22 = vrot.slane %v2276_v23, 9  ;;  %v7514_v31 = vsel %vm3474_vm0, %v7223_v30, %v7299_v16  ;;  %v8811_v43 = vld [vmem:[#allocation20_spill] sm:$0xff] }
 0x2c1   : > { %v3495_v21 = vsel %vm3472_vm14, %v7260_v1, %v7311_v28  ;;  %v3607_v46 = vsel %vm3472_vm14, %v7373_v24, %v7423_v37  ;;  %v2259_v34 = vrot.slane %v1989_v0, %v7124_v32  ;;  %v7526_v45 = vsel %vm3474_vm0, %v7356_v47, %v7419_v17 }
 0x2c2   : > { %v8806_v30 = vrot.slane %v7218_v57, %v7169_v13  ;;  %v8807_v28 = vrot.slane %v7333_v26, %v7169_v13  ;;  %v5356_v37 = vrot.slane %v2285_v14, 9  ;;  %v3283_v50 = vmax.f32 %v2284_v10, %v5354_v41 }
 0x2c3   : > { %v2557_v63 = vcombine.high %v2555_v49, %v2555_v49  ;;  %v5385_v52 = vrot.slane %v2548_v36, 9  ;;  %v5386_v42 = vrot.slane %v2556_v11, 9  ;;  %v2252_v47 = vcombine.high %v1989_v0, %v1989_v0 }
 0x2c4   : > { %v4335_v16 = vsel %vm3474_vm0, %v8806_v30, %v7346_v29  ;;  %v4362_v55 = vsel %vm3465_vm15, %v8807_v28, %v7443_v6  ;;  %v7540_v17 = vsel %vm3474_vm0, %v7260_v1, %v3495_v21  ;;  %v7544_v57 = vsel %vm3474_vm0, %v7373_v24, %v3607_v46 }
 0x2c5   : > { %v5355_v29 = vrot.slane %v2283_v39, 9  ;;  %v3282_v60 = vmax.f32 %v2276_v23, %v5353_v22  ;;  %v8808_v26 = vrot.slane %v7349_v27, %v7169_v13  ;;  %v8809_v2 = vrot.slane %v7269_v8, %v7169_v13 }
 0x2c6   : > { %v5387_v19 = vrot.slane %v2555_v49, 9  ;;  %v2267_v1 = vcombine.high %v2259_v34, %v2259_v34  ;;  %v2524_v4 = vcombine.high %v2069_v38, %v2069_v38  ;;  %v8812_v24 = vrot.slane %v8811_v43, %v7169_v13 }
 0x2c7   : > { %v4363_v6 = vsel %vm3474_vm0, %v8808_v26, %v4362_v55  ;;  %v4806_v10 = vsel %vm3474_vm0, %v8809_v2, %v7353_v51  ;;  %v3285_v53 = vmax.f32 %v2285_v14, %v5356_v37  ;;  %v7561_v27 = vmax.f32 %v7453_v54, %v3283_v50  ;;  %v8814_v54 = vld [vmem:[#allocation17_spill] sm:$0xff] }
 0x2c8   : > { %v4833_v23 = vsel %vm3465_vm15, %v8812_v24, %v8810_v48  ;;  %v5388_v41 = vrot.slane %v2557_v63, 9  ;;  %v3314_v0 = vmax.f32 %v2548_v36, %v5385_v52  ;;  %v3315_v22 = vmax.f32 %v2556_v11, %v5386_v42 }
 0x2c9   : > { %v2266_v8 = vrot.slane %v2252_v47, %v7124_v32  ;;  %v7565_v51 = vrot.slane %v2069_v38, %v7124_v32  ;;  %v7568_v21 = vsel %vm1625_vm4, %v4335_v16, 0.0  ;;  %v3284_v46 = vmax.f32 %v2283_v39, %v5355_v29 }
 0x2ca   : > { %v7571_v30 = vmax.f32 %v7449_v20, %v3282_v60  ;;  %v7574_v14 = vsel %vm1625_vm4, %v4363_v6, 0.0  ;;  %v8815_v28 = vrot.slane %v8814_v54, %v7169_v13  ;;  %v3316_v11 = vmax.f32 %v2555_v49, %v5387_v19 }
 0x2cb   : > { %8813 = vst [vmem:[#allocation13_spill] sm:$0xff] %v7574_v14  ;;  %v5350_v55 = vrot.slane %v2267_v1, 9  ;;  %v7583_v37 = vrot.slane %v2524_v4, %v7124_v32  ;;  %v7586_v16 = vsel %vm1625_vm4, %v4806_v10, 0.0  ;;  %v7589_v20 = vmax.f32 %v7460_v12, %v3285_v53 }
 0x2cc   : > { %v7580_v36 = vsel %vm3474_vm0, %v8815_v28, %v4833_v23  ;;  %8817 = vst [vmem:[#allocation19_spill] sm:$0xff] %v7586_v16  ;;  %v7592_v39 = vrot.slane %v7561_v27, 7  ;;  %v3317_v50 = vmax.f32 %v2557_v63, %v5388_v41  ;;  %v7595_v52 = vmax.f32 %v7466_v44, %v3314_v0 }
 0x2cd   : > { %8816 = vst [vmem:[#allocation22_spill] sm:$0xff] %v7580_v36  ;;  %v7598_v38 = vmax.f32 %v7469_v33, %v3315_v22  ;;  %v2268_v49 = vcombine.high %v2266_v8, %v2266_v8  ;;  %v5349_v42 = vrot.slane %v2259_v34, 9  ;;  %v2539_v47 = vcombine.high %v7565_v51, %v7565_v51 }
 0x2ce   : > { %v7603_v29 = vmax.f32 %v7455_v7, %v3284_v46  ;;  %v7609_v63 = vmul.f32 %v7571_v30, %v7571_v30  ;;  %v5351_v44 = vrot.slane %v2266_v8, 9  ;;  %v7614_v60 = vmax.f32 %v7471_v56, %v3316_v11 }
 0x2cf   : > { %v3279_v26 = vmax.f32 %v2267_v1, %v5350_v55  ;;  %v2540_v6 = vcombine.high %v7583_v37, %v7583_v37  ;;  %v3514_v7 = vsel %vm3468_vm10, %v7592_v39, %v7571_v30  ;;  %v7622_v2 = vrot.slane %v7589_v20, 7 }
 0x2d0   : > { %v7626_v10 = vmul.f32 %v7561_v27, %v7561_v27  ;;  %v7629_v19 = vmax.f32 %v7474_v5, %v3317_v50  ;;  %v7632_v56 = vrot.slane %v7598_v38, 7  ;;  %v5352_v1 = vrot.slane %v2268_v49, 9  ;;  %v8819_v50 = vld [vmem:[#allocation9_spill] sm:$0xff] }
 0x2d1   : > { %v3278_v4 = vmax.f32 %v2259_v34, %v5349_v42  ;;  %v5382_v48 = vrot.slane %v2539_v47, 9  ;;  %v7638_v24 = vmul.f32 %v7603_v29, %v7603_v29  ;;  %v7642_v23 = vmul.f32 %v7589_v20, %v7589_v20  ;;  %v8818_v34 = vld [vmem:[#allocation11_spill] sm:$0xff] }
 0x2d2   : > { %v3280_v53 = vmax.f32 %v2266_v8, %v5351_v44  ;;  %v3515_v5 = vsel %vm3470_vm12, %v7592_v39, %v3514_v7  ;;  %v3343_v0 = vmax.f32 %v8818_v34, %v3279_v26  ;;  %v5384_v22 = vrot.slane %v2540_v6, 9 }
 0x2d3   : > { %v3521_v46 = vsel %vm3468_vm10, %v7622_v2, %v7603_v29  ;;  %v7657_v8 = vrot.slane %v7629_v19, 7  ;;  %v3626_v11 = vsel %vm3468_vm10, %v7632_v56, %v7595_v52  ;;  %v3281_v55 = vmax.f32 %v2268_v49, %v5352_v1 }
 0x2d4   : > { %v3342_v42 = vmax.f32 %v8819_v50, %v3278_v4  ;;  %v3311_v44 = vmax.f32 %v2539_v47, %v5382_v48  ;;  %v7665_v26 = vsel %vm3472_vm14, %v7592_v39, %v3515_v5  ;;  %v3344_v54 = vmax.f32 %v7462_v15, %v3280_v53 }
 0x2d5   : > { %v7674_v43 = vsel %vm3470_vm12, %v7622_v2, %v3521_v46  ;;  %v4425_v49 = vmul.f32 %v3343_v0, %v3343_v0  ;;  %v5381_v1 = vrot.slane %v7565_v51, 9  ;;  %v3313_v47 = vmax.f32 %v2540_v6, %v5384_v22 }
 0x2d6   : > { %v3627_v4 = vsel %vm3470_vm12, %v7632_v56, %v3626_v11  ;;  %v5383_v50 = vrot.slane %v7583_v37, 9  ;;  %v3633_v15 = vsel %vm3468_vm10, %v7657_v8, %v7614_v60  ;;  %v3345_v53 = vmax.f32 %v7464_v62, %v3281_v55 }
 0x2d7   : > { %v4424_v46 = vmul.f32 %v3342_v42, %v3342_v42  ;;  %v3375_v6 = vmax.f32 %v7488_v35, %v3311_v44  ;;  %v4112_v34 = vrot.slane %v3343_v0, %v7169_v13  ;;  %v4426_v5 = vmul.f32 %v3344_v54, %v3344_v54 }
 0x2d8   : > { %v7696_v48 = vsel %vm3472_vm14, %v7632_v56, %v3627_v4  ;;  %v4583_v7 = vrot.slane %v4425_v49, %v7169_v13  ;;  %v3310_v62 = vmax.f32 %v7565_v51, %v5381_v1  ;;  %v7701_v55 = vmax.f32 %v7501_v58, %v3313_v47 }
 0x2d9   : > { %v7705_v35 = vsel %vm3470_vm12, %v7657_v8, %v3633_v15  ;;  %v3499_v44 = vrot.slane %v3343_v0, 7  ;;  %v4108_v11 = vrot.slane %v3342_v42, %v7169_v13  ;;  %v3312_v22 = vmax.f32 %v7583_v37, %v5383_v50 }
 0x2da   : > { %v4116_v28 = vrot.slane %v3344_v54, %v7169_v13  ;;  %v4427_v4 = vmul.f32 %v3345_v53, %v3345_v53  ;;  %v4579_v33 = vrot.slane %v4424_v46, %v7169_v13  ;;  %v3611_v49 = vrot.slane %v3375_v6, 7 }
 0x2db   : > { %v7713_v51 = vmul.f32 %v7595_v52, %v7595_v52  ;;  %v3506_v58 = vrot.slane %v3345_v53, 7  ;;  %v4336_v1 = vsel %vm3468_vm10, %v4112_v34, %v4108_v11  ;;  %v4587_v47 = vrot.slane %v4426_v5, %v7169_v13 }
 0x2dc   : > { %v7719_v0 = vmul.f32 %v7598_v38, %v7598_v38  ;;  %v4807_v37 = vsel %vm3468_vm10, %v4583_v7, %v4579_v33  ;;  %v3374_v50 = vmax.f32 %v7486_v18, %v3310_v62  ;;  %v3618_v15 = vrot.slane %v7701_v55, 7 }
 0x2dd   : > { %v7726_v46 = vmul.f32 %v7614_v60, %v7614_v60  ;;  %v3500_v41 = vsel %vm3468_vm10, %v3499_v44, %v3342_v42  ;;  %v4120_v34 = vrot.slane %v3345_v53, %v7169_v13  ;;  %v3376_v5 = vmax.f32 %v7490_v40, %v3312_v22 }
 0x2de   : > { %v4337_v11 = vsel %vm3462_vm11, %v4116_v28, %v4336_v1  ;;  %v4591_v12 = vrot.slane %v4427_v4, %v7169_v13  ;;  %v3612_v33 = vsel %vm3468_vm10, %v3611_v49, %v3374_v50  ;;  %v4457_v7 = vmul.f32 %v3375_v6, %v3375_v6 }
 0x2df   : > { %v7736_v18 = vmul.f32 %v7629_v19, %v7629_v19  ;;  %v3507_v42 = vsel %vm3468_vm10, %v3506_v58, %v3344_v54  ;;  %v4808_v53 = vsel %vm3462_vm11, %v4587_v47, %v4807_v37  ;;  %v3501_v40 = vsel %vm3470_vm12, %v3499_v44, %v3500_v41 }
 0x2e0   : > { %v3619_v28 = vsel %vm3468_vm10, %v3618_v15, %v3376_v5  ;;  %v4240_v22 = vrot.slane %v3375_v6, %v7169_v13  ;;  %v4456_v4 = vmul.f32 %v3374_v50, %v3374_v50  ;;  %v4338_v36 = vsel %vm3470_vm12, %v4120_v34, %v4337_v11 }
 0x2e1   : > { %v3613_v14 = vsel %vm3470_vm12, %v3611_v49, %v3612_v33  ;;  %v4458_v16 = vmul.f32 %v3376_v5, %v3376_v5  ;;  %v3508_v62 = vsel %vm3470_vm12, %v3506_v58, %v3507_v42  ;;  %v4809_v54 = vsel %vm3470_vm12, %v4591_v12, %v4808_v53 }
 0x2e2   : > { %v4236_v47 = vrot.slane %v3374_v50, %v7169_v13  ;;  %v4711_v41 = vrot.slane %v4457_v7, %v7169_v13  ;;  %v4731_v6 = vrot.slane %v7726_v46, %v7169_v13  ;;  %v3502_v37 = vsel %vm3472_vm14, %v3499_v44, %v3501_v40 }
 0x2e3   : > { %v3620_v1 = vsel %vm3470_vm12, %v3618_v15, %v3619_v28  ;;  %v4244_v34 = vrot.slane %v3376_v5, %v7169_v13  ;;  %v3614_v11 = vsel %vm3472_vm14, %v3611_v49, %v3613_v14  ;;  %v4459_v12 = vmul.f32 %v7701_v55, %v7701_v55 }
 0x2e4   : > { %v4364_v33 = vsel %vm3468_vm10, %v4240_v22, %v4236_v47  ;;  %v4707_v50 = vrot.slane %v4456_v4, %v7169_v13  ;;  %v8820_v7 = vrot.slane %v7571_v30, %v7169_v13  ;;  %v8821_v53 = vrot.slane %v7609_v63, %v7169_v13  ;;  %v5471_v30 = vpop.f32.mrf.mxu0  ;;  %v5495_v63 = vpop.f32.mrf.mxu1 }
 0x2e5   : > { %v4715_v5 = vrot.slane %v4458_v16, %v7169_v13  ;;  %v3509_v14 = vsel %vm3472_vm14, %v3506_v58, %v3508_v62  ;;  %v4735_v28 = vrot.slane %v7736_v18, %v7169_v13  ;;  %v4248_v22 = vrot.slane %v7701_v55, %v7169_v13 }
 0x2e6   : > { %v4339_v42 = vsel %vm3463_vm13, %v8820_v7, %v4338_v36  ;;  %v4810_v40 = vsel %vm3463_vm13, %v8821_v53, %v4809_v54  ;;  %v4835_v4 = vsel %vm3468_vm10, %v4711_v41, %v4707_v50  ;;  %v3621_v36 = vsel %vm3472_vm14, %v3618_v15, %v3620_v1 }
 0x2e7   : > { %v4365_v47 = vsel %vm3462_vm11, %v4244_v34, %v4364_v33  ;;  %v3503_v54 = vsel %vm3474_vm0, %v3499_v44, %v3502_v37  ;;  %v3615_v16 = vsel %vm3474_vm0, %v3611_v49, %v3614_v11  ;;  %v3517_v62 = vsel %vm3474_vm0, %v7592_v39, %v7665_v26  ;;  %v1999_v33 = vpop.f32.mrf.mxu0 }
 0x2e8   : > { %v8822_v7 = vrot.slane %v7561_v27, %v7169_v13  ;;  %v8823_v41 = vrot.slane %v7626_v10, %v7169_v13  ;;  %v4719_v34 = vrot.slane %v4459_v12, %v7169_v13  ;;  %v3510_v44 = vsel %vm3474_vm0, %v3506_v58, %v3509_v14 }
 0x2e9   : > { %v4836_v49 = vsel %vm3462_vm11, %v4715_v5, %v4835_v4  ;;  %v2303_v37 = vcombine.high %v5471_v30, %v5471_v30  ;;  %v3622_v11 = vsel %vm3474_vm0, %v3618_v15, %v3621_v36  ;;  %v3629_v27 = vsel %vm3474_vm0, %v7632_v56, %v7696_v48 }
 0x2ea   : > { %v4340_v55 = vsel %vm3472_vm14, %v8822_v7, %v4339_v42  ;;  %v4811_v1 = vsel %vm3472_vm14, %v8823_v41, %v4810_v40  ;;  %v4366_v39 = vsel %vm3470_vm12, %v4248_v22, %v4365_v47  ;;  %v2575_v26 = vcombine.high %v5495_v63, %v5495_v63 }
 0x2eb   : > { %v3725_v10 = vcombine.low %v7479_v25, %v3503_v54  ;;  %v3743_v50 = vcombine.low %v7495_v9, %v3615_v16  ;;  %v8824_v58 = vrot.slane %v7603_v29, %v7169_v13  ;;  %v8825_v15 = vrot.slane %v7638_v24, %v7169_v13 }
 0x2ec   : > { %v2310_v56 = vrot.slane %v5471_v30, %v7124_v32  ;;  %v3761_v48 = vcombine.low %v7505_v3, %v3510_v44  ;;  %v4837_v53 = vsel %vm3470_vm12, %v4719_v34, %v4836_v49  ;;  %v2582_v25 = vrot.slane %v5495_v63, %v7124_v32 }
 0x2ed   : > { %v4341_v12 = vsel %vm3465_vm15, %v8824_v58, %v4340_v55  ;;  %v7811_v42 = vsel %vm3465_vm15, %v8825_v15, %v4811_v1  ;;  %v3779_v9 = vcombine.low %v7509_v59, %v3622_v11  ;;  %v3523_v29 = vsel %vm3472_vm14, %v7622_v2, %v7674_v43 }
 0x2ee   : > { %v8826_v24 = vrot.slane %v7595_v52, %v7169_v13  ;;  %v2317_v5 = vrot.slane %v2303_v37, %v7124_v32  ;;  %v2286_v14 = vcombine.high %v1999_v33, %v1999_v33  ;;  %v3797_v3 = vcombine.low %v7514_v31, %v3517_v62 }
 0x2ef   : > { %v2589_v22 = vrot.slane %v2575_v26, %v7124_v32  ;;  %v7829_v4 = vrot.slane %v3725_v10, %v7499_v61  ;;  %v7832_v59 = vrot.slane %v3743_v50, %v7499_v61  ;;  %v3815_v43 = vcombine.low %v7526_v45, %v3629_v27  ;;  %v2079_v27 = vpop.f32.mrf.mxu1 }
 0x2f0   : > { %v4367_v40 = vsel %vm3463_vm13, %v8826_v24, %v4366_v39  ;;  %v8827_v52 = vrot.slane %v7713_v51, %v7169_v13  ;;  %v2318_v36 = vcombine.high %v2310_v56, %v2310_v56  ;;  %v3524_v31 = vsel %vm3474_vm0, %v7622_v2, %v3523_v29 }
 0x2f1   : > { %v3635_v47 = vsel %vm3472_vm14, %v7657_v8, %v7705_v35  ;;  %v2590_v63 = vcombine.high %v2582_v25, %v2582_v25  ;;  %v2293_v54 = vrot.slane %v1999_v33, %v7124_v32  ;;  %v7848_v16 = vrot.slane %v3761_v48, %v7499_v61 }
 0x2f2   : > { %v7839_v30 = vsel %vm3463_vm13, %v8827_v52, %v4837_v53  ;;  %v7851_v45 = vrot.slane %v3779_v9, %v7499_v61  ;;  %v2319_v51 = vcombine.high %v2317_v5, %v2317_v5  ;;  %v2300_v62 = vrot.slane %v2286_v14, %v7124_v32 }
 0x2f3   : > { %v7855_v7 = vrot.slane %v3797_v3, %v7499_v61  ;;  %v8828_v2 = vrot.slane %v7589_v20, %v7169_v13  ;;  %v2591_v55 = vcombine.high %v2589_v22, %v2589_v22  ;;  %v7862_v1 = vrot.slane %v3815_v43, %v7499_v61 }
 0x2f4   : > { %v3636_v34 = vsel %vm3474_vm0, %v7657_v8, %v3635_v47  ;;  %v3833_v44 = vcombine.low %v7540_v17, %v3524_v31  ;;  %v5297_v49 = vrot.slane %v2310_v56, 9  ;;  %v5298_v37 = vrot.slane %v2318_v36, 9 }
 0x2f5   : > { %v4342_v35 = vsel %vm3474_vm0, %v8828_v2, %v4341_v12  ;;  %v5329_v11 = vrot.slane %v2582_v25, 9  ;;  %v8829_v39 = vrot.slane %v7598_v38, %v7169_v13  ;;  %v5299_v26 = vrot.slane %v2317_v5, 9 }
 0x2f6   : > { %v5330_v33 = vrot.slane %v2590_v63, 9  ;;  %v2301_v10 = vcombine.high %v2293_v54, %v2293_v54  ;;  %v4394_v50 = vsel %vm1625_vm4, %v4342_v35, 0.0  ;;  %v5300_v58 = vrot.slane %v2319_v51, 9 }
 0x2f7   : > { %v4368_v20 = vsel %vm3472_vm14, %v8829_v39, %v4367_v40  ;;  %v5331_v12 = vrot.slane %v2589_v22, 9  ;;  %v2302_v15 = vcombine.high %v2300_v62, %v2300_v62  ;;  %v5332_v17 = vrot.slane %v2591_v55, 9 }
 0x2f8   : > { %v2558_v48 = vcombine.high %v2079_v27, %v2079_v27  ;;  %v2565_v53 = vrot.slane %v2079_v27, %v7124_v32  ;;  %v3034_v29 = vmax.f32 %v2310_v56, %v5297_v49  ;;  %v3035_v24 = vmax.f32 %v2318_v36, %v5298_v37 }
 0x2f9   : > { %v7874_v38 = vmax.f32 %v2582_v25, %v5329_v11  ;;  %v5293_v40 = vrot.slane %v2293_v54, 9  ;;  %v7876_v14 = vmax.f32 %v2317_v5, %v5299_v26  ;;  %v7878_v3 = vmax.f32 %v2590_v63, %v5330_v33 }
 0x2fa   : > { %v5294_v43 = vrot.slane %v2301_v10, 9  ;;  %v5295_v52 = vrot.slane %v2300_v62, 9  ;;  %v7880_v47 = vmax.f32 %v2319_v51, %v5300_v58  ;;  %v7882_v2 = vmax.f32 %v2589_v22, %v5331_v12 }
 0x2fb   : > { %v5296_v35 = vrot.slane %v2302_v15, 9  ;;  %v7884_v27 = vmax.f32 %v2591_v55, %v5332_v17  ;;  %v2572_v56 = vrot.slane %v2558_v48, %v7124_v32  ;;  %v2573_v25 = vcombine.high %v2565_v53, %v2565_v53 }
 0x2fc   : > { %v7888_v5 = vmax.f32 %v2293_v54, %v5293_v40  ;;  %v5325_v63 = vrot.slane %v2565_v53, 9  ;;  %v3851_v49 = vcombine.low %v7544_v57, %v3636_v34  ;;  %v7891_v37 = vmax.f32 %v2301_v10, %v5294_v43 }
 0x2fd   : > { %v7893_v51 = vmax.f32 %v2300_v62, %v5295_v52  ;;  %v7897_v55 = vrot.slane %v3833_v44, %v7499_v61  ;;  %v7899_v11 = vmax.f32 %v2302_v15, %v5296_v35  ;;  %v8831_v54 = vrot.slane %v7614_v60, %v7169_v13 }
 0x2fe   : > { %v2574_v57 = vcombine.high %v2572_v56, %v2572_v56  ;;  %v5326_v34 = vrot.slane %v2573_v25, 9  ;;  %v7906_v62 = vadd.f32 %v4394_v50, %v7568_v21  ;;  %v5327_v17 = vrot.slane %v2572_v56, 9 }
 0x2ff   : > { %8830 = vst [vmem:[#allocation15_spill] sm:$0xff] %v7897_v55  ;;  %v4369_v12 = vsel %vm3465_vm15, %v8831_v54, %v4368_v20  ;;  %v7908_v48 = vmax.f32 %v2565_v53, %v5325_v63  ;;  %v7912_v15 = vrot.slane %v3851_v49, %v7499_v61  ;;  %v8833_v60 = vrot.slane %v7642_v23, %v7169_v13 }
 0x300   : > { %v8834_v21 = vrot.slane %v7719_v0, %v7169_v13  ;;  %v5328_v35 = vrot.slane %v2574_v57, 9  ;;  %v8835_v49 = vrot.slane %v7629_v19, %v7169_v13  ;;  %v7929_v54 = vmax.f32 %v2573_v25, %v5326_v34 }
 0x301   : > { %v5474_v41 = vpop.f32.mrf.mxu0  ;;  %v5498_v31 = vpop.f32.mrf.mxu1  ;;  %8832 = vst [vmem:[#allocation12_spill] sm:$0xff] %v7912_v15  ;;  %v4813_v20 = vsel %vm3474_vm0, %v8833_v60, %v7811_v42  ;;  %v7931_v42 = vmax.f32 %v2572_v56, %v5327_v17 }
 0x302   : > { %v2344_v8 = vrot.slane %v5474_v41, %v7124_v32  ;;  %v2337_v9 = vcombine.high %v5474_v41, %v5474_v41  ;;  %v2609_v41 = vcombine.high %v5498_v31, %v5498_v31  ;;  %v2616_v22 = vrot.slane %v5498_v31, %v7124_v32 }
 0x303   : > { %v2009_v58 = vpop.f32.mrf.mxu0  ;;  %v4839_v50 = vsel %vm3472_vm14, %v8834_v21, %v7839_v30  ;;  %v4370_v23 = vsel %vm3474_vm0, %v8835_v49, %v4369_v12  ;;  %v2089_v0 = vpop.f32.mrf.mxu1 }
 0x304   : > { %v2352_v39 = vcombine.high %v2344_v8, %v2344_v8  ;;  %v2351_v36 = vrot.slane %v2337_v9, %v7124_v32  ;;  %v5361_v26 = vrot.slane %v2344_v8, 9  ;;  %v2623_v44 = vrot.slane %v2609_v41, %v7124_v32 }
 0x305   : > { %v2624_v9 = vcombine.high %v2616_v22, %v2616_v22  ;;  %v2327_v40 = vrot.slane %v2009_v58, %v7124_v32  ;;  %v5393_v31 = vrot.slane %v2616_v22, 9  ;;  %v2320_v41 = vcombine.high %v2009_v58, %v2009_v58 }
 0x306   : > { %v5362_v33 = vrot.slane %v2352_v39, 9  ;;  %v2353_v10 = vcombine.high %v2351_v36, %v2351_v36  ;;  %v5363_v53 = vrot.slane %v2351_v36, 9  ;;  %v3290_v43 = vmax.f32 %v2344_v8, %v5361_v26 }
 0x307   : > { %v2625_v60 = vcombine.high %v2623_v44, %v2623_v44  ;;  %v4840_v30 = vsel %vm3465_vm15, %v4731_v6, %v4839_v50  ;;  %v5394_v8 = vrot.slane %v2624_v9, 9  ;;  %v2335_v26 = vcombine.high %v2327_v40, %v2327_v40 }
 0x308   : > { %v3291_v52 = vmax.f32 %v2352_v39, %v5362_v33  ;;  %v5364_v63 = vrot.slane %v2353_v10, 9  ;;  %v5395_v39 = vrot.slane %v2623_v44, 9  ;;  %v4865_v33 = vsel %vm1625_vm4, %v4813_v20, 0.0 }
 0x309   : > { %v3292_v58 = vmax.f32 %v2351_v36, %v5363_v53  ;;  %v7938_v19 = vmax.f32 %v3034_v29, %v3290_v43  ;;  %v3322_v25 = vmax.f32 %v2616_v22, %v5393_v31  ;;  %v2334_v34 = vrot.slane %v2320_v41, %v7124_v32 }
 0x30a   : > { %v7940_v12 = vmax.f32 %v3035_v24, %v3291_v52  ;;  %v3293_v56 = vmax.f32 %v2353_v10, %v5364_v63  ;;  %v2599_v17 = vrot.slane %v2089_v0, %v7124_v32  ;;  %v7945_v46 = vsel %vm1625_vm4, %v4370_v23, 0.0  ;;  %v8838_v10 = vld [vmem:[#allocation19_spill] sm:$0xff] }
 0x30b   : > { %8836 = vst [vmem:[#allocation14_spill] sm:$0xff] %v7945_v46  ;;  %v7947_v6 = vmax.f32 %v2574_v57, %v5328_v35  ;;  %v5396_v21 = vrot.slane %v2625_v60, 9  ;;  %v2592_v50 = vcombine.high %v2089_v0, %v2089_v0  ;;  %v7953_v29 = vsel %vm3474_vm0, %v4735_v28, %v4840_v30 }
 0x30c   : > { %8837 = vst [vmem:[#allocation21_spill] sm:$0xff] %v7953_v29  ;;  %v3323_v24 = vmax.f32 %v2624_v9, %v5394_v8  ;;  %v3324_v36 = vmax.f32 %v2623_v44, %v5395_v39  ;;  %v5358_v22 = vrot.slane %v2335_v26, 9  ;;  %v7956_v20 = vadd.f32 %v4865_v33, %v8838_v10 }
 0x30d   : > { %v7959_v53 = vmax.f32 %v7876_v14, %v3292_v58  ;;  %v7962_v57 = vrot.slane %v7940_v12, 7  ;;  %v4156_v43 = vrot.slane %v7938_v19, %v7169_v13  ;;  %v7967_v18 = vmax.f32 %v7874_v38, %v3322_v25 }
 0x30e   : > { %v7970_v28 = vmax.f32 %v7880_v47, %v3293_v56  ;;  %v2336_v44 = vcombine.high %v2334_v34, %v2334_v34  ;;  %v5357_v9 = vrot.slane %v2327_v40, 9  ;;  %v2607_v52 = vcombine.high %v2599_v17, %v2599_v17 }
 0x30f   : > { %v7974_v31 = vmul.f32 %v7938_v19, %v7938_v19  ;;  %v3325_v14 = vmax.f32 %v2625_v60, %v5396_v21  ;;  %v5359_v35 = vrot.slane %v2334_v34, 9  ;;  %v2606_v63 = vrot.slane %v2592_v50, %v7124_v32 }
 0x310   : > { %v7980_v38 = vmax.f32 %v7878_v3, %v3323_v24  ;;  %v7983_v47 = vmax.f32 %v7882_v2, %v3324_v36  ;;  %v3287_v49 = vmax.f32 %v2335_v26, %v5358_v22  ;;  %v3542_v23 = vsel %vm3468_vm10, %v7962_v57, %v7938_v19 }
 0x311   : > { %v7992_v0 = vmul.f32 %v7940_v12, %v7940_v12  ;;  %v7996_v30 = vmul.f32 %v7959_v53, %v7959_v53  ;;  %v7999_v3 = vrot.slane %v7970_v28, 7  ;;  %v5360_v2 = vrot.slane %v2336_v44, 9 }
 0x312   : > { %v3286_v8 = vmax.f32 %v2327_v40, %v5357_v9  ;;  %v5390_v39 = vrot.slane %v2607_v52, 9  ;;  %v8004_v33 = vmax.f32 %v7884_v27, %v3325_v14  ;;  %v3288_v58 = vmax.f32 %v2334_v34, %v5359_v35 }
 0x313   : > { %v2608_v25 = vcombine.high %v2606_v63, %v2606_v63  ;;  %v3543_v56 = vsel %vm3470_vm12, %v7962_v57, %v3542_v23  ;;  %v8010_v21 = vmul.f32 %v7970_v28, %v7970_v28  ;;  %v3351_v50 = vmax.f32 %v7891_v37, %v3287_v49 }
 0x314   : > { %v5389_v24 = vrot.slane %v2599_v17, 9  ;;  %v8018_v27 = vrot.slane %v7980_v38, 7  ;;  %v5391_v34 = vrot.slane %v2606_v63, 9  ;;  %v3549_v22 = vsel %vm3468_vm10, %v7999_v3, %v7959_v53 }
 0x315   : > { %v3289_v10 = vmax.f32 %v2336_v44, %v5360_v2  ;;  %v3350_v9 = vmax.f32 %v7888_v5, %v3286_v8  ;;  %v3319_v14 = vmax.f32 %v2607_v52, %v5390_v39  ;;  %v8026_v37 = vsel %vm3472_vm14, %v7962_v57, %v3543_v56 }
 0x316   : > { %v8031_v49 = vmax.f32 %v7893_v51, %v3288_v58  ;;  %v5392_v23 = vrot.slane %v2608_v25, 9  ;;  %v4144_v36 = vrot.slane %v3351_v50, %v7169_v13  ;;  %v4433_v44 = vmul.f32 %v3351_v50, %v3351_v50 }
 0x317   : > { %v3318_v2 = vmax.f32 %v2599_v17, %v5389_v24  ;;  %v8038_v5 = vsel %vm3470_vm12, %v7999_v3, %v3549_v22  ;;  %v3654_v52 = vsel %vm3468_vm10, %v8018_v27, %v7967_v18  ;;  %v8044_v8 = vrot.slane %v8004_v33, 7 }
 0x318   : > { %v3320_v51 = vmax.f32 %v2606_v63, %v5391_v34  ;;  %v3353_v39 = vmax.f32 %v7899_v11, %v3289_v10  ;;  %v4140_v58 = vrot.slane %v3350_v9, %v7169_v13  ;;  %v4432_v56 = vmul.f32 %v3350_v9, %v3350_v9 }
 0x319   : > { %v3383_v40 = vmax.f32 %v7929_v54, %v3319_v14  ;;  %v4148_v24 = vrot.slane %v8031_v49, %v7169_v13  ;;  %v4434_v22 = vmul.f32 %v8031_v49, %v8031_v49  ;;  %v3321_v35 = vmax.f32 %v2608_v25, %v5392_v23 }
 0x31a   : > { %v4343_v11 = vsel %vm3468_vm10, %v4144_v36, %v4140_v58  ;;  %v4615_v34 = vrot.slane %v4433_v44, %v7169_v13  ;;  %v3382_v10 = vmax.f32 %v7908_v48, %v3318_v2  ;;  %v3655_v54 = vsel %vm3470_vm12, %v8018_v27, %v3654_v52 }
 0x31b   : > { %v3661_v14 = vsel %vm3468_vm10, %v8044_v8, %v7983_v47  ;;  %v8065_v60 = vrot.slane %v3351_v50, 7  ;;  %v3384_v25 = vmax.f32 %v7931_v42, %v3320_v51  ;;  %v4152_v23 = vrot.slane %v3353_v39, %v7169_v13 }
 0x31c   : > { %v4435_v63 = vmul.f32 %v3353_v39, %v3353_v39  ;;  %v4611_v36 = vrot.slane %v4432_v56, %v7169_v13  ;;  %v4272_v44 = vrot.slane %v3383_v40, %v7169_v13  ;;  %v4344_v2 = vsel %vm3462_vm11, %v4148_v24, %v4343_v11 }
 0x31d   : > { %v4619_v52 = vrot.slane %v4434_v22, %v7169_v13  ;;  %v3385_v58 = vmax.f32 %v7947_v6, %v3321_v35  ;;  %v3656_v50 = vsel %vm3472_vm14, %v8018_v27, %v3655_v54  ;;  %v4268_v56 = vrot.slane %v3382_v10, %v7169_v13 }
 0x31e   : > { %v4814_v51 = vsel %vm3468_vm10, %v4615_v34, %v4611_v36  ;;  %v8084_v17 = vmul.f32 %v7967_v18, %v7967_v18  ;;  %v8088_v24 = vmul.f32 %v7980_v38, %v7980_v38  ;;  %v3528_v6 = vsel %vm3468_vm10, %v8065_v60, %v3350_v9 }
 0x31f   : > { %v4276_v35 = vrot.slane %v3384_v25, %v7169_v13  ;;  %v3534_v22 = vrot.slane %v3353_v39, 7  ;;  %v4345_v11 = vsel %vm3470_vm12, %v4152_v23, %v4344_v2  ;;  %v4623_v34 = vrot.slane %v4435_v63, %v7169_v13 }
 0x320   : > { %v4371_v54 = vsel %vm3468_vm10, %v4272_v44, %v4268_v56  ;;  %v4815_v36 = vsel %vm3462_vm11, %v4619_v52, %v4814_v51  ;;  %v3639_v42 = vrot.slane %v3383_v40, 7  ;;  %v3646_v48 = vrot.slane %v3385_v58, 7 }
 0x321   : > { %v4465_v26 = vmul.f32 %v3383_v40, %v3383_v40  ;;  %v3662_v41 = vsel %vm3470_vm12, %v8044_v8, %v3661_v14  ;;  %v8101_v9 = vmul.f32 %v7983_v47, %v7983_v47  ;;  %v8105_v39 = vmul.f32 %v8004_v33, %v8004_v33 }
 0x322   : > { %v4280_v63 = vrot.slane %v3385_v58, %v7169_v13  ;;  %v3529_v44 = vsel %vm3470_vm12, %v8065_v60, %v3528_v6  ;;  %v4372_v40 = vsel %vm3462_vm11, %v4276_v35, %v4371_v54  ;;  %v4464_v2 = vmul.f32 %v3382_v10, %v3382_v10 }
 0x323   : > { %8839 = vst [vmem:[#allocation18_spill] sm:$0xff] %v8101_v9  ;;  %8840 = vst [vmem:[#allocation16_spill] sm:$0xff] %v8105_v39  ;;  %v4759_v14 = vrot.slane %v8088_v24, %v7169_v13  ;;  %v4346_v52 = vsel %vm3463_vm13, %v4156_v43, %v4345_v11  ;;  %v4816_v51 = vsel %vm3470_vm12, %v4623_v34, %v4815_v36 }
 0x324   : > { %v4466_v56 = vmul.f32 %v3384_v25, %v3384_v25  ;;  %v3535_v23 = vsel %vm3468_vm10, %v3534_v22, %v8031_v49  ;;  %v3640_v29 = vsel %vm3468_vm10, %v3639_v42, %v3382_v10  ;;  %v3647_v6 = vsel %vm3468_vm10, %v3646_v48, %v3384_v25 }
 0x325   : > { %v4743_v35 = vrot.slane %v4465_v26, %v7169_v13  ;;  %v3530_v19 = vsel %vm3472_vm14, %v8065_v60, %v3529_v44  ;;  %v4373_v43 = vsel %vm3470_vm12, %v4280_v63, %v4372_v40  ;;  %v8133_v49 = vsel %vm3474_vm0, %v7962_v57, %v8026_v37 }
 0x326   : > { %v8841_v10 = vrot.slane %v7940_v12, %v7169_v13  ;;  %v8842_v25 = vrot.slane %v7974_v31, %v7169_v13  ;;  %v4467_v44 = vmul.f32 %v3385_v58, %v3385_v58  ;;  %v4739_v63 = vrot.slane %v4464_v2, %v7169_v13 }
 0x327   : > { %v3536_v40 = vsel %vm3470_vm12, %v3534_v22, %v3535_v23  ;;  %v3641_v54 = vsel %vm3470_vm12, %v3639_v42, %v3640_v29  ;;  %v3648_v57 = vsel %vm3470_vm12, %v3646_v48, %v3647_v6  ;;  %v4747_v37 = vrot.slane %v4466_v56, %v7169_v13 }
 0x328   : > { %v4347_v26 = vsel %vm3472_vm14, %v8841_v10, %v4346_v52  ;;  %v4817_v36 = vsel %vm3463_vm13, %v8842_v25, %v4816_v51  ;;  %v8843_v12 = vrot.slane %v7967_v18, %v7169_v13  ;;  %v4842_v31 = vsel %vm3468_vm10, %v4743_v35, %v4739_v63 }
 0x329   : > { %v8844_v58 = vrot.slane %v7959_v53, %v7169_v13  ;;  %v8845_v29 = vrot.slane %v7992_v0, %v7169_v13  ;;  %v8163_v56 = vsel %vm3474_vm0, %v8065_v60, %v3530_v19  ;;  %v8167_v18 = vsel %vm3474_vm0, %v8018_v27, %v3656_v50 }
 0x32a   : > { %v4374_v52 = vsel %vm3463_vm13, %v8843_v12, %v4373_v43  ;;  %v3642_v6 = vsel %vm3472_vm14, %v3639_v42, %v3641_v54  ;;  %v4751_v35 = vrot.slane %v4467_v44, %v7169_v13  ;;  %v3537_v53 = vsel %vm3472_vm14, %v3534_v22, %v3536_v40 }
 0x32b   : > { %v4348_v23 = vsel %vm3465_vm15, %v8844_v58, %v4347_v26  ;;  %v4818_v2 = vsel %vm3472_vm14, %v8845_v29, %v4817_v36  ;;  %v3649_v43 = vsel %vm3472_vm14, %v3646_v48, %v3648_v57  ;;  %v4843_v0 = vsel %vm3462_vm11, %v4747_v37, %v4842_v31 }
 0x32c   : > { %v8846_v19 = vrot.slane %v7980_v38, %v7169_v13  ;;  %v8847_v50 = vrot.slane %v7996_v30, %v7169_v13  ;;  %v8191_v63 = vsel %vm3474_vm0, %v3639_v42, %v3642_v6  ;;  %v8194_v38 = vsel %vm3474_vm0, %v3534_v22, %v3537_v53 }
 0x32d   : > { %v8197_v40 = vsel %vm3474_vm0, %v3646_v48, %v3649_v43  ;;  %v3551_v30 = vsel %vm3472_vm14, %v7999_v3, %v8038_v5  ;;  %v4844_v57 = vsel %vm3470_vm12, %v4751_v35, %v4843_v0  ;;  %v8849_v42 = vrot.slane %v7983_v47, %v7169_v13 }
 0x32e   : > { %v4375_v27 = vsel %vm3472_vm14, %v8846_v19, %v4374_v52  ;;  %v4819_v54 = vsel %vm3465_vm15, %v8847_v50, %v4818_v2  ;;  %v8850_v31 = vrot.slane %v8010_v21, %v7169_v13  ;;  %v8851_v47 = vrot.slane %v8084_v17, %v7169_v13 }
 0x32f   : > { %v4376_v12 = vsel %vm3465_vm15, %v8849_v42, %v4375_v27  ;;  %v8853_v53 = vrot.slane %v8004_v33, %v7169_v13 }
 0x330   : > { %v4820_v5 = vsel %vm3474_vm0, %v8850_v31, %v4819_v54 }
 0x331   : > { %v5477_v11 = vpop.f32.mrf.mxu0  ;;  %v5501_v34 = vpop.f32.mrf.mxu1  ;;  %v4867_v17 = vsel %vm1625_vm4, %v4820_v5, 0.0 }
 0x332   : > { %v2371_v10 = vcombine.high %v5477_v11, %v5477_v11  ;;  %v2643_v51 = vcombine.high %v5501_v34, %v5501_v34  ;;  %v2378_v26 = vrot.slane %v5477_v11, %v7124_v32  ;;  %v2650_v25 = vrot.slane %v5501_v34, %v7124_v32 }
 0x333   : > { %v2019_v60 = vpop.f32.mrf.mxu0  ;;  %v8848_v11 = vrot.slane %v7970_v28, %v7169_v13  ;;  %v3663_v28 = vsel %vm3472_vm14, %v8044_v8, %v3662_v41  ;;  %v8217_v41 = vsel %vm3474_vm0, %v7999_v3, %v3551_v30  ;;  %v2099_v6 = vpop.f32.mrf.mxu1  ;;  %v8232_v3 = vsel %vm3474_vm0, %v8853_v53, %v4376_v12 }
 0x334   : > { %v2385_v36 = vrot.slane %v2371_v10, %v7124_v32  ;;  %v2657_v44 = vrot.slane %v2643_v51, %v7124_v32  ;;  %v2354_v37 = vcombine.high %v2019_v60, %v2019_v60  ;;  %v2386_v22 = vcombine.high %v2378_v26, %v2378_v26  ;;  %8854 = vst [vmem:[#allocation25_spill] sm:$0xff] %v8232_v3 }
 0x335   : > { %v4349_v34 = vsel %vm3474_vm0, %v8848_v11, %v4348_v23  ;;  %v2658_v52 = vcombine.high %v2650_v25, %v2650_v25  ;;  %v2361_v58 = vrot.slane %v2019_v60, %v7124_v32  ;;  %v4845_v23 = vsel %vm3463_vm13, %v8851_v47, %v4844_v57 }
 0x336   : > { %v4396_v48 = vsel %vm1625_vm4, %v4349_v34, 0.0  ;;  %v2387_v10 = vcombine.high %v2385_v36, %v2385_v36  ;;  %v2659_v51 = vcombine.high %v2657_v44, %v2657_v44  ;;  %v5305_v29 = vrot.slane %v2378_v26, 9 }
 0x337   : > { %v5337_v2 = vrot.slane %v2650_v25, 9  ;;  %v8225_v21 = vsel %vm3474_vm0, %v8044_v8, %v3663_v28  ;;  %v2368_v35 = vrot.slane %v2354_v37, %v7124_v32  ;;  %v8235_v43 = vadd.f32 %v4396_v48, %v7906_v62 }
 0x338   : > { %8852 = vst [vmem:[#allocation32_spill] sm:$0xff] %v8225_v21  ;;  %v5306_v0 = vrot.slane %v2386_v22, 9  ;;  %v5307_v60 = vrot.slane %v2385_v36, 9  ;;  %v5338_v19 = vrot.slane %v2658_v52, 9  ;;  %v5339_v27 = vrot.slane %v2657_v44, 9 }
 0x339   : > { %8855 = vst [vmem:[#allocation37_spill] sm:$0xff] %v8235_v43  ;;  %v5308_v50 = vrot.slane %v2387_v10, 9  ;;  %v5340_v8 = vrot.slane %v2659_v51, 9  ;;  %v2369_v54 = vcombine.high %v2361_v58, %v2361_v58  ;;  %v2626_v11 = vcombine.high %v2099_v6, %v2099_v6 }
 0x33a   : > { %v3042_v34 = vmax.f32 %v2378_v26, %v5305_v29  ;;  %v8238_v30 = vmax.f32 %v2650_v25, %v5337_v2  ;;  %v8244_v33 = vsel %vm3472_vm14, %v4759_v14, %v4845_v23  ;;  %v8247_v62 = vadd.f32 %v4867_v17, %v7956_v20 }
 0x33b   : > { %8856 = vst [vmem:[#allocation24_spill] sm:$0xff] %v8244_v33  ;;  %v2370_v57 = vcombine.high %v2368_v35, %v2368_v35  ;;  %v5301_v37 = vrot.slane %v2361_v58, 9  ;;  %v5303_v28 = vrot.slane %v2368_v35, 9  ;;  %v2633_v42 = vrot.slane %v2099_v6, %v7124_v32 }
 0x33c   : > { %8857 = vst [vmem:[#allocation31_spill] sm:$0xff] %v8247_v62  ;;  %v3043_v12 = vmax.f32 %v2386_v22, %v5306_v0  ;;  %v3044_v48 = vmax.f32 %v2385_v36, %v5307_v60  ;;  %v3075_v31 = vmax.f32 %v2658_v52, %v5338_v19  ;;  %v8250_v26 = vmax.f32 %v2657_v44, %v5339_v27 }
 0x33d   : > { %v3045_v25 = vmax.f32 %v2387_v10, %v5308_v50  ;;  %v3077_v5 = vmax.f32 %v2659_v51, %v5340_v8  ;;  %v5302_v47 = vrot.slane %v2369_v54, 9  ;;  %v2640_v24 = vrot.slane %v2626_v11, %v7124_v32 }
 0x33e   : > { %v5304_v17 = vrot.slane %v2370_v57, 9  ;;  %v8255_v6 = vmax.f32 %v2361_v58, %v5301_v37  ;;  %v8257_v36 = vmax.f32 %v2368_v35, %v5303_v28  ;;  %v2641_v44 = vcombine.high %v2633_v42, %v2633_v42 }
 0x33f   : > { %v8261_v0 = vmax.f32 %v2369_v54, %v5302_v47  ;;  %v2642_v60 = vcombine.high %v2640_v24, %v2640_v24  ;;  %v5333_v19 = vrot.slane %v2633_v42, 9  ;;  %v5335_v37 = vrot.slane %v2640_v24, 9 }
 0x340   : > { %v5334_v58 = vrot.slane %v2641_v44, 9  ;;  %v8263_v47 = vmax.f32 %v2370_v57, %v5304_v17 }
 0x341   : > { %v5336_v46 = vrot.slane %v2642_v60, 9 }
 0x34d   : > { %v5480_v14 = vpop.f32.mrf.mxu0  ;;  %v5504_v23 = vpop.f32.mrf.mxu1 }
 0x34e   : > { %v2405_v29 = vcombine.high %v5480_v14, %v5480_v14  ;;  %v2412_v20 = vrot.slane %v5480_v14, %v7124_v32  ;;  %v2677_v2 = vcombine.high %v5504_v23, %v5504_v23  ;;  %v2684_v53 = vrot.slane %v5504_v23, %v7124_v32 }
 0x350   : > { %v2419_v22 = vrot.slane %v2405_v29, %v7124_v32  ;;  %v2420_v52 = vcombine.high %v2412_v20, %v2412_v20  ;;  %v5369_v10 = vrot.slane %v2412_v20, 9  ;;  %v2691_v51 = vrot.slane %v2677_v2, %v7124_v32 }
 0x351   : > { %v2692_v27 = vcombine.high %v2684_v53, %v2684_v53  ;;  %v5401_v62 = vrot.slane %v2684_v53, 9 }
 0x352   : > { %v2421_v50 = vcombine.high %v2419_v22, %v2419_v22  ;;  %v5370_v8 = vrot.slane %v2420_v52, 9  ;;  %v5371_v11 = vrot.slane %v2419_v22, 9  ;;  %v3298_v14 = vmax.f32 %v2412_v20, %v5369_v10 }
 0x353   : > { %v2693_v35 = vcombine.high %v2691_v51, %v2691_v51  ;;  %v5402_v28 = vrot.slane %v2692_v27, 9  ;;  %v5403_v39 = vrot.slane %v2691_v51, 9  ;;  %v8269_v20 = vmax.f32 %v2633_v42, %v5333_v19 }
 0x354   : > { %v5372_v23 = vrot.slane %v2421_v50, 9  ;;  %v3299_v3 = vmax.f32 %v2420_v52, %v5370_v8  ;;  %v3300_v29 = vmax.f32 %v2419_v22, %v5371_v11  ;;  %v8265_v33 = vmax.f32 %v3042_v34, %v3298_v14  ;;  %v2029_v22 = vpop.f32.mrf.mxu0 }
 0x355   : > { %v5404_v2 = vrot.slane %v2693_v35, 9  ;;  %v3331_v54 = vmax.f32 %v2692_v27, %v5402_v28  ;;  %v8275_v52 = vmax.f32 %v2641_v44, %v5334_v58  ;;  %v3330_v17 = vmax.f32 %v2684_v53, %v5401_v62  ;;  %v2109_v58 = vpop.f32.mrf.mxu1 }
 0x356   : > { %v3301_v9 = vmax.f32 %v2421_v50, %v5372_v23  ;;  %v8267_v43 = vmax.f32 %v3043_v12, %v3299_v3  ;;  %v8271_v10 = vmax.f32 %v3044_v48, %v3300_v29  ;;  %v8282_v34 = vmax.f32 %v2640_v24, %v5335_v37 }
 0x357   : > { %v3333_v15 = vmax.f32 %v2693_v35, %v5404_v2  ;;  %v8273_v55 = vmax.f32 %v3075_v31, %v3331_v54  ;;  %v8284_v3 = vmax.f32 %v2642_v60, %v5336_v46  ;;  %v3332_v42 = vmax.f32 %v2691_v51, %v5403_v39 }
 0x358   : > { %8858 = vst [vmem:[#allocation30_spill] sm:$0xff] %v8271_v10  ;;  %v8277_v8 = vmax.f32 %v3045_v25, %v3301_v9  ;;  %v8280_v57 = vrot.slane %v8267_v43, 7  ;;  %v8296_v9 = vmul.f32 %v8265_v33, %v8265_v33  ;;  %v2388_v25 = vcombine.high %v2029_v22, %v2029_v22 }
 0x359   : > { %8859 = vst [vmem:[#allocation23_spill] sm:$0xff] %v8273_v55  ;;  %v8286_v12 = vmax.f32 %v3077_v5, %v3333_v15  ;;  %v8300_v62 = vmul.f32 %v8267_v43, %v8267_v43  ;;  %v8304_v15 = vmul.f32 %v8271_v10, %v8271_v10  ;;  %v8311_v39 = vrot.slane %v8273_v55, 7 }
 0x35a   : > { %8860 = vst [vmem:[#allocation34_spill] sm:$0xff] %v8277_v8  ;;  %v3570_v48 = vsel %vm3468_vm10, %v8280_v57, %v8265_v33  ;;  %v8292_v31 = vrot.slane %v8277_v8, 7  ;;  %v8308_v46 = vmul.f32 %v8277_v8, %v8277_v8  ;;  %v8318_v53 = vmax.f32 %v8238_v30, %v3330_v17 }
 0x35b   : > { %8861 = vst [vmem:[#allocation27_spill] sm:$0xff] %v8286_v12  ;;  %8862 = vst [vmem:[#allocation33_spill] sm:$0xff] %v8304_v15  ;;  %v3571_v5 = vsel %vm3470_vm12, %v8280_v57, %v3570_v48  ;;  %v2395_v44 = vrot.slane %v2029_v22, %v7124_v32  ;;  %v8327_v19 = vmax.f32 %v8250_v26, %v3332_v42  ;;  %v8330_v27 = vrot.slane %v8286_v12, 7 }
 0x35c   : > { %8863 = vst [vmem:[#allocation26_spill] sm:$0xff] %v8308_v46  ;;  %v3577_v51 = vsel %vm3468_vm10, %v8292_v31, %v8271_v10  ;;  %v3682_v14 = vsel %vm3468_vm10, %v8311_v39, %v8318_v53  ;;  %v8343_v26 = vsel %vm3472_vm14, %v8280_v57, %v3571_v5  ;;  %v2402_v2 = vrot.slane %v2388_v25, %v7124_v32 }
 0x35d   : > { %v8353_v23 = vsel %vm3470_vm12, %v8292_v31, %v3577_v51  ;;  %v2403_v54 = vcombine.high %v2395_v44, %v2395_v44  ;;  %v3683_v22 = vsel %vm3470_vm12, %v8311_v39, %v3682_v14  ;;  %v3689_v17 = vsel %vm3468_vm10, %v8330_v27, %v8327_v19 }
 0x35e   : > { %v5365_v42 = vrot.slane %v2395_v44, 9  ;;  %v2660_v48 = vcombine.high %v2109_v58, %v2109_v58  ;;  %v2404_v28 = vcombine.high %v2402_v2, %v2402_v2  ;;  %v5367_v30 = vrot.slane %v2402_v2, 9 }
 0x35f   : > { %v5366_v35 = vrot.slane %v2403_v54, 9  ;;  %v2667_v50 = vrot.slane %v2109_v58, %v7124_v32  ;;  %v3684_v29 = vsel %vm3472_vm14, %v8311_v39, %v3683_v22  ;;  %v8373_v37 = vsel %vm3470_vm12, %v8330_v27, %v3689_v17 }
 0x360   : > { %v3294_v25 = vmax.f32 %v2395_v44, %v5365_v42  ;;  %v2674_v14 = vrot.slane %v2660_v48, %v7124_v32  ;;  %v5368_v11 = vrot.slane %v2404_v28, 9  ;;  %v3296_v60 = vmax.f32 %v2402_v2, %v5367_v30 }
 0x361   : > { %v3295_v5 = vmax.f32 %v2403_v54, %v5366_v35  ;;  %v2675_v24 = vcombine.high %v2667_v50, %v2667_v50  ;;  %v5397_v58 = vrot.slane %v2667_v50, 9 }
 0x362   : > { %v3358_v51 = vmax.f32 %v8255_v6, %v3294_v25  ;;  %v2676_v46 = vcombine.high %v2674_v14, %v2674_v14  ;;  %v3297_v15 = vmax.f32 %v2404_v28, %v5368_v11  ;;  %v5399_v42 = vrot.slane %v2674_v14, 9 }
 0x363   : > { %v3359_v44 = vmax.f32 %v8261_v0, %v3295_v5  ;;  %v3360_v48 = vmax.f32 %v8257_v36, %v3296_v60  ;;  %v5398_v8 = vrot.slane %v2675_v24, 9 }
 0x364   : > { %v4172_v22 = vrot.slane %v3358_v51, %v7169_v13  ;;  %v4440_v12 = vmul.f32 %v3358_v51, %v3358_v51  ;;  %v3361_v17 = vmax.f32 %v8263_v47, %v3297_v15  ;;  %v5400_v0 = vrot.slane %v2676_v46, 9 }
 0x365   : > { %v3555_v10 = vrot.slane %v3359_v44, 7  ;;  %v4176_v30 = vrot.slane %v3359_v44, %v7169_v13  ;;  %v4441_v35 = vmul.f32 %v3359_v44, %v3359_v44  ;;  %v4180_v6 = vrot.slane %v3360_v48, %v7169_v13 }
 0x366   : > { %v4442_v2 = vmul.f32 %v3360_v48, %v3360_v48  ;;  %v4643_v11 = vrot.slane %v4440_v12, %v7169_v13  ;;  %v3562_v54 = vrot.slane %v3361_v17, 7  ;;  %v4184_v36 = vrot.slane %v3361_v17, %v7169_v13 }
 0x367   : > { %v3556_v28 = vsel %vm3468_vm10, %v3555_v10, %v3358_v51  ;;  %v4350_v60 = vsel %vm3468_vm10, %v4176_v30, %v4172_v22  ;;  %v4443_v15 = vmul.f32 %v3361_v17, %v3361_v17  ;;  %v4647_v25 = vrot.slane %v4441_v35, %v7169_v13 }
 0x368   : > { %v3557_v5 = vsel %vm3470_vm12, %v3555_v10, %v3556_v28  ;;  %v4351_v47 = vsel %vm3462_vm11, %v4180_v6, %v4350_v60  ;;  %v8391_v44 = vmul.f32 %v8318_v53, %v8318_v53  ;;  %v3563_v12 = vsel %vm3468_vm10, %v3562_v54, %v3360_v48 }
 0x369   : > { %v4352_v51 = vsel %vm3470_vm12, %v4184_v36, %v4351_v47  ;;  %v4651_v21 = vrot.slane %v4442_v2, %v7169_v13  ;;  %v8398_v22 = vmul.f32 %v8273_v55, %v8273_v55  ;;  %v3564_v30 = vsel %vm3470_vm12, %v3562_v54, %v3563_v12 }
 0x36a   : > { %v4655_v17 = vrot.slane %v4443_v15, %v7169_v13  ;;  %v4821_v35 = vsel %vm3468_vm10, %v4647_v25, %v4643_v11  ;;  %v3558_v6 = vsel %vm3472_vm14, %v3555_v10, %v3557_v5  ;;  %v8865_v28 = vrot.slane %v8265_v33, %v7169_v13 }
 0x36b   : > { %8864 = vst [vmem:[#allocation36_spill] sm:$0xff] %v8398_v22  ;;  %v4822_v36 = vsel %vm3462_vm11, %v4651_v21, %v4821_v35  ;;  %v3326_v2 = vmax.f32 %v2667_v50, %v5397_v58  ;;  %v3565_v60 = vsel %vm3472_vm14, %v3562_v54, %v3564_v30  ;;  %v3327_v47 = vmax.f32 %v2675_v24, %v5398_v8 }
 0x36c   : > { %v4353_v48 = vsel %vm3463_vm13, %v8865_v28, %v4352_v51  ;;  %v3328_v22 = vmax.f32 %v2674_v14, %v5399_v42  ;;  %v3329_v55 = vmax.f32 %v2676_v46, %v5400_v0  ;;  %v8412_v15 = vmul.f32 %v8327_v19, %v8327_v19 }
 0x36d   : > { %v4787_v11 = vrot.slane %v8391_v44, %v7169_v13  ;;  %v4823_v5 = vsel %vm3470_vm12, %v4655_v17, %v4822_v36  ;;  %v3390_v33 = vmax.f32 %v8269_v20, %v3326_v2  ;;  %v3391_v25 = vmax.f32 %v8275_v52, %v3327_v47 }
 0x36e   : > { %v3392_v21 = vmax.f32 %v8282_v34, %v3328_v22  ;;  %v3393_v50 = vmax.f32 %v8284_v3, %v3329_v55  ;;  %v3559_v8 = vsel %vm3474_vm0, %v3555_v10, %v3558_v6  ;;  %v8866_v46 = vrot.slane %v8267_v43, %v7169_v13 }
 0x36f   : > { %v3566_v14 = vsel %vm3474_vm0, %v3562_v54, %v3565_v60  ;;  %v3573_v20 = vsel %vm3474_vm0, %v8280_v57, %v8343_v26  ;;  %v3685_v52 = vsel %vm3474_vm0, %v8311_v39, %v3684_v29  ;;  %v8867_v55 = vrot.slane %v8296_v9, %v7169_v13 }
 0x370   : > { %v8426_v24 = vsel %vm3472_vm14, %v8866_v46, %v4353_v48  ;;  %v3667_v34 = vrot.slane %v3391_v25, 7  ;;  %v3674_v3 = vrot.slane %v3393_v50, 7  ;;  %v4304_v43 = vrot.slane %v3391_v25, %v7169_v13 }
 0x371   : > { %v4824_v10 = vsel %vm3463_vm13, %v8867_v55, %v4823_v5  ;;  %v4300_v58 = vrot.slane %v3390_v33, %v7169_v13  ;;  %v4472_v42 = vmul.f32 %v3390_v33, %v3390_v33  ;;  %v4473_v0 = vmul.f32 %v3391_v25, %v3391_v25 }
 0x372   : > { %v3734_v54 = vcombine.low %v8163_v56, %v3559_v8  ;;  %v3668_v57 = vsel %vm3468_vm10, %v3667_v34, %v3390_v33  ;;  %v3675_v26 = vsel %vm3468_vm10, %v3674_v3, %v3392_v21  ;;  %v4308_v39 = vrot.slane %v3392_v21, %v7169_v13 }
 0x373   : > { %v3770_v9 = vcombine.low %v8194_v38, %v3566_v14  ;;  %v3669_v29 = vsel %vm3470_vm12, %v3667_v34, %v3668_v57  ;;  %v3676_v12 = vsel %vm3470_vm12, %v3674_v3, %v3675_v26  ;;  %v4378_v51 = vsel %vm3468_vm10, %v4304_v43, %v4300_v58 }
 0x374   : > { %v4474_v22 = vmul.f32 %v3392_v21, %v3392_v21  ;;  %v8868_v30 = vrot.slane %v8300_v62, %v7169_v13  ;;  %v3670_v17 = vsel %vm3472_vm14, %v3667_v34, %v3669_v29  ;;  %v3677_v35 = vsel %vm3472_vm14, %v3674_v3, %v3676_v12 }
 0x375   : > { %v4775_v6 = vrot.slane %v4473_v0, %v7169_v13  ;;  %v4312_v38 = vrot.slane %v3393_v50, %v7169_v13  ;;  %v4475_v28 = vmul.f32 %v3393_v50, %v3393_v50  ;;  %v4771_v48 = vrot.slane %v4472_v42, %v7169_v13 }
 0x376   : > { %v8452_v56 = vsel %vm3472_vm14, %v8868_v30, %v4824_v10  ;;  %v3671_v36 = vsel %vm3474_vm0, %v3667_v34, %v3670_v17  ;;  %v4379_v2 = vsel %vm3462_vm11, %v4308_v39, %v4378_v51  ;;  %v3741_v62 = vrot.slane %v3734_v54, %v7499_v61 }
 0x377   : > { %v3752_v60 = vcombine.low %v8191_v63, %v3671_v36  ;;  %v3678_v47 = vsel %vm3474_vm0, %v3674_v3, %v3677_v35  ;;  %v4779_v5 = vrot.slane %v4474_v22, %v7169_v13  ;;  %v3777_v33 = vrot.slane %v3770_v9, %v7499_v61 }
 0x378   : > { %v3788_v25 = vcombine.low %v8197_v40, %v3678_v47  ;;  %v3806_v21 = vcombine.low %v8133_v49, %v3573_v20  ;;  %v4849_v50 = vsel %vm3468_vm10, %v4775_v6, %v4771_v48  ;;  %v5405_v46 = vcombine.high %v7829_v4, %v3741_v62 }
 0x379   : > { %v3759_v8 = vrot.slane %v3752_v60, %v7499_v61  ;;  %v3824_v14 = vcombine.low %v8167_v18, %v3685_v52  ;;  %v3919_v55 = vcombine.low %v7848_v16, %v3777_v33  ;;  %v5407_v10 = vcombine.high %v7848_v16, %v3777_v33 }
 0x37a   : > { %v3795_v63 = vrot.slane %v3788_v25, %v7499_v61  ;;  %v3813_v34 = vrot.slane %v3806_v21, %v7499_v61  ;;  %v3903_v49 = vrot.slane %v5405_v46, %v7124_v32  ;;  %v3579_v3 = vsel %vm3472_vm14, %v8292_v31, %v8353_v23  ;;  %v8872_v25 = vld [vmem:[#allocation30_spill] sm:$0xff] }
 0x37b   : > { %v5406_v40 = vcombine.high %v7832_v59, %v3759_v8  ;;  %v3831_v20 = vrot.slane %v3824_v14, %v7499_v61  ;;  %v4380_v18 = vsel %vm3470_vm12, %v4312_v38, %v4379_v2  ;;  %v3927_v43 = vrot.slane %v3919_v55, %v7124_v32  ;;  %v8877_v55 = vld [vmem:[#allocation34_spill] sm:$0xff] }
 0x37c   : > { %v3920_v52 = vcombine.low %v7851_v45, %v3795_v63  ;;  %v5408_v16 = vcombine.high %v7851_v45, %v3795_v63  ;;  %v4783_v58 = vrot.slane %v4475_v28, %v7169_v13  ;;  %v3967_v0 = vcombine.low %v7855_v7, %v3813_v34  ;;  %v8870_v28 = vld [vmem:[#allocation32_spill] sm:$0xff] }
 0x37d   : > { %v3910_v42 = vrot.slane %v5406_v40, %v7124_v32  ;;  %v3968_v54 = vcombine.low %v7862_v1, %v3831_v20  ;;  %v4850_v57 = vsel %vm3462_vm11, %v4779_v5, %v4849_v50  ;;  %v5409_v26 = vcombine.high %v7855_v7, %v3813_v34  ;;  %v8874_v50 = vld [vmem:[#allocation23_spill] sm:$0xff] }
 0x37e   : > { %v3934_v23 = vrot.slane %v3920_v52, %v7124_v32  ;;  %v3580_v39 = vsel %vm3474_vm0, %v8292_v31, %v3579_v3  ;;  %v3951_v45 = vrot.slane %v5407_v10, %v7124_v32  ;;  %v3958_v29 = vrot.slane %v5408_v16, %v7124_v32  ;;  %v8879_v3 = vld [vmem:[#allocation36_spill] sm:$0xff]  ;;  %v8880_v16 = vld [vmem:[#allocation37_spill] sm:$0xff] }
 0x37f   : > { %v3911_v9 = vcombine.low %v3903_v49, %v3910_v42  ;;  %v5410_v12 = vcombine.high %v7862_v1, %v3831_v20  ;;  %v3975_v22 = vrot.slane %v3967_v0, %v7124_v32  ;;  %v3982_v30 = vrot.slane %v3968_v54, %v7124_v32  ;;  %v8881_v42 = vld [vmem:[#allocation27_spill] sm:$0xff] }
 0x380   : > { %v3935_v51 = vcombine.low %v3927_v43, %v3934_v23  ;;  %v3691_v17 = vsel %vm3472_vm14, %v8330_v27, %v8373_v37  ;;  %v4851_v7 = vsel %vm3470_vm12, %v4783_v58, %v4850_v57  ;;  %v3842_v35 = vcombine.low %v8217_v41, %v3580_v39 }
 0x381   : > { %3912 = vrot.lane.b32.xlu0 %v3911_v9, %s5695_s9  ;;  %v3692_v31 = vsel %vm3474_vm0, %v8330_v27, %v3691_v17  ;;  %v3874_v1 = vcombine.low %v7832_v59, %v3759_v8  ;;  %v8869_v6 = vrot.slane %v8318_v53, %v7169_v13  ;;  %v3999_v37 = vrot.slane %v5409_v26, %v7124_v32  ;;  %v8876_v8 = vld [vmem:[#allocation12_spill] sm:$0xff]  ;;  %v8883_v26 = vld [vmem:[#allocation33_spill] sm:$0xff]  ;;  %s5415_s9 = sshll.u32 %s5756_s19, 4 }
 0x382   : > { %3936 = vrot.lane.b32.xlu1 %v3935_v51, %s5699_s27  ;;  %v3860_v48 = vcombine.low %v8870_v28, %v3692_v31  ;;  %v3873_v36 = vcombine.low %v7829_v4, %v3741_v62  ;;  %v3959_v2 = vcombine.low %v3951_v45, %v3958_v29  ;;  %v4006_v27 = vrot.slane %v5410_v12, %v7124_v32  ;;  %v8871_v4 = vld [vmem:[#allocation15_spill] sm:$0xff]  ;;  %v8885_v45 = vld [vmem:[#allocation13_spill] sm:$0xff]  ;;  %v8886_v12 = vld [vmem:[#allocation26_spill] sm:$0xff]  ;;  %s8613_s14 = scalar_lea.hbm %s8719_s3, %s5415_s9  ;;  %s8623_s27 = scalar_lea.sflag [#allocation5], %s4891_s8 }
 0x383   : > { %v4381_v38 = vsel %vm3463_vm13, %v8869_v6, %v4380_v18  ;;  %v3849_v41 = vrot.slane %v3842_v35, %v7499_v61  ;;  %v8520_v59 = vrot.slane %v3874_v1, %v7124_v32  ;;  %v4852_v53 = vsel %vm3463_vm13, %v4787_v11, %v4851_v7  ;;  %v8888_v7 = vld [vmem:[#allocation24_spill] sm:$0xff]  ;;  %v8889_v31 = vld [vmem:[#allocation18_spill] sm:$0xff] }
 0x384   : > { %v3983_v60 = vcombine.low %v3975_v22, %v3982_v30  ;;  %v3867_v47 = vrot.slane %v3860_v48, %v7499_v61  ;;  %v8528_v5 = vrot.slane %v3873_v36, %v7124_v32  ;;  %v8873_v21 = vrot.slane %v8872_v25, %v7169_v13  ;;  %v8891_v6 = vld [vmem:[#allocation16_spill] sm:$0xff]  ;;  %v8892_v28 = vld [vmem:[#allocation14_spill] sm:$0xff]  ;;  %v8893_v36 = vld [vmem:[#allocation31_spill] sm:$0xff] }
 0x385   : > { %3960 = vrot.lane.b32.xlu0 %v3959_v2, %s5702_s28  ;;  %v4015_v62 = vcombine.low %v8871_v4, %v3849_v41  ;;  %v5411_v33 = vcombine.high %v8871_v4, %v3849_v41  ;;  %v8875_v11 = vrot.slane %v8874_v50, %v7169_v13  ;;  %v8878_v10 = vrot.slane %v8877_v55, %v7169_v13  ;;  %v8894_v2 = vld [vmem:[#allocation25_spill] sm:$0xff]  ;;  %s5574_s28 = scalar_lea.vmem %s8615_s11, 16 }
 0x386   : > { %v4355_v44 = vsel %vm3465_vm15, %v8873_v21, %v8426_v24  ;;  %3984 = vrot.lane.b32.xlu1 %v3983_v60, %s5703_s29  ;;  %v4016_v46 = vcombine.low %v8876_v8, %v3867_v47  ;;  %v5412_v14 = vcombine.high %v8876_v8, %v3867_v47  ;;  %v3889_v63 = vcombine.low %v8528_v5, %v8520_v59  ;;  %v8896_v21 = vld [vmem:[#allocation21_spill] sm:$0xff]  ;;  %p5575_p11 = scmp.ne.s32.totalorder %s8615_s11, %s5574_s28  ;;  %s5707_s29 = smov [#allocation4]  }
 0x387   : > { %v4382_v61 = vsel %vm3472_vm14, %v8875_v11, %v4381_v38  ;;  %v4356_v34 = vsel %vm3474_vm0, %v8878_v10, %v4355_v44  ;;  %v4007_v24 = vcombine.low %v3999_v37, %v4006_v27  ;;  %v4023_v40 = vrot.slane %v4015_v62, %v7124_v32 }
 0x388   : > { %v4047_v49 = vrot.slane %v5411_v33, %v7124_v32  ;;  %v4398_v20 = vsel %vm1625_vm4, %v4356_v34, 0.0  ;;  %v4791_v18 = vrot.slane %v8879_v3, %v7169_v13  ;;  %v4030_v52 = vrot.slane %v4016_v46, %v7124_v32  ;;  %p5576_p12 = pnand %p5575_p11, %p5775_p5 }
 0x389   : > { %v4054_v43 = vrot.slane %v5412_v14, %v7124_v32  ;;  %v4399_v58 = vadd.f32 %v4398_v20, %v8880_v16  ;;  %v4328_v0 = vrot.slane %v8881_v42, %v7169_v13  ;;  %v4479_v54 = vmul.f32 %v8881_v42, %v8881_v42  ;;  %4008 = vrot.lane.b32.xlu0 %v4007_v24, %s5704_s30  ;;  %s5578_s30 = sshll.u32 %s5707_s29, 4  ;;  %s5579_s30 = int_to_ptr.vmem [resolvable:$false] %s5578_s30 }
 0x38a   : > { %v8882_v57 = vrot.slane %v8327_v19, %v7169_v13  ;;  %v8884_v39 = vrot.slane %v8883_v26, %v7169_v13  ;;  %v4031_v9 = vcombine.low %v4023_v40, %v4030_v52  ;;  %v8887_v51 = vrot.slane %v8886_v12, %v7169_v13  ;;  %p5577_p13 = pneg %p5576_p12  ;;  %p5581_p0 = scmp.lt.s32.totalorder %s8615_s11, %s5579_s30 }
 0x38b   : > { %v4401_v29 = vadd.f32 %v8885_v45, %v4399_v58  ;;  %v4853_v30 = vsel %vm3472_vm14, %v4791_v18, %v4852_v53  ;;  %v4795_v19 = vrot.slane %v8412_v15, %v7169_v13  ;;  %v4055_v17 = vcombine.low %v4047_v49, %v4054_v43  ;;  %v8895_v53 = vld [vmem:[#allocation22_spill] sm:$0xff] }
 0x38c   : > { %v4383_v23 = vsel %vm3465_vm15, %v8882_v57, %v4382_v61  ;;  %v4826_v32 = vsel %vm3465_vm15, %v8884_v39, %v8452_v56  ;;  %v8890_v35 = vrot.slane %v8889_v31, %v7169_v13  ;;  %v4767_v38 = vrot.slane %v8891_v6, %v7169_v13  ;;  %4032 = vrot.lane.b32.xlu1 %v4031_v9, %s5705_s5  ;;  %s5580_s5 = scalar_lea.vmem %s5579_s30, 32 }
 0x38d   : > { %v4827_v22 = vsel %vm3474_vm0, %v8887_v51, %v4826_v32  ;;  %v4384_v37 = vsel %vm3474_vm0, %v4328_v0, %v4383_v23  ;;  %v4403_v48 = vadd.f32 %v8892_v28, %v4401_v29  ;;  %4056 = vrot.lane.b32.xlu0 %v4055_v17, %s5706_s6  ;;  %v4404_v27 = vsel %vm1625_vm4, %v8894_v2, 0.0  ;;  %p5582_p1 = scmp.lt.s32.totalorder %s5580_s5, %s5574_s28 }
 0x38e   : > { %v4847_v56 = vsel %vm3465_vm15, %v8890_v35, %v8888_v7  ;;  %v4869_v1 = vsel %vm1625_vm4, %v4827_v22, 0.0  ;;  %v4854_v41 = vsel %vm3465_vm15, %v4795_v19, %v4853_v30  ;;  %v4871_v60 = vsel %vm1625_vm4, %v8895_v53, 0.0 }
 0x38f   : > { %v4870_v15 = vadd.f32 %v4869_v1, %v8893_v36  ;;  %v4799_v47 = vrot.slane %v4479_v54, %v7169_v13  ;;  %v4405_v4 = vadd.f32 %v4404_v27, %v4403_v48  ;;  %v4848_v62 = vsel %vm3474_vm0, %v4767_v38, %v4847_v56  ;;  %p5583_p2 = por %p5582_p1, %p5581_p0 }
 0x390   : > { %v4406_v25 = vsel %vm1625_vm4, %v4384_v37, 0.0  ;;  %v4873_v44 = vsel %vm1625_vm4, %v8896_v21, 0.0  ;;  %v4875_v8 = vsel %vm1625_vm4, %v4848_v62, 0.0 }
 0x391   : > { %v4872_v33 = vadd.f32 %v4871_v60, %v4870_v15  ;;  %v4407_v50 = vadd.f32 %v4406_v25, %v4405_v4  ;;  %v4855_v11 = vsel %vm3474_vm0, %v4799_v47, %v4854_v41  ;;  %p5584_p3 = pnand %p5583_p2, %p5577_p13 }
 0x392   : > { %v4877_v13 = vsel %vm1625_vm4, %v4855_v11, 0.0 }
 0x393   : > { %v4874_v61 = vadd.f32 %v4873_v44, %v4872_v33  ;;  %v4408_v46 = vrot.slane %v4407_v50, 4 }
 0x395   : > { %v4876_v14 = vadd.f32 %v4875_v8, %v4874_v61  ;;  %v4409_v55 = vadd.f32 %v4408_v46, %v4407_v50 }
 0x397   : > { %v4878_v10 = vadd.f32 %v4877_v13, %v4876_v14  ;;  %v4410_v34 = vrot.slane %v4409_v55, 2 }
 0x399   : > { %v4879_v24 = vrot.slane %v4878_v10, 4  ;;  %v4411_v40 = vadd.f32 %v4410_v34, %v4409_v55 }
 0x39b   : > { %v4880_v49 = vadd.f32 %v4879_v24, %v4878_v10  ;;  %v4412_v20 = vrot.slane %v4411_v40, 1 }
 0x39d   : > { %v4881_v3 = vrot.slane %v4880_v49, 2  ;;  %v4413_v18 = vadd.f32 %v4412_v20, %v4411_v40 }
 0x39f   : > { %v4882_v52 = vadd.f32 %v4881_v3, %v4880_v49  ;;  %4415 = vst.msk [vmem:[%s200_s10] sm:$0x1] %vm4414_vm1, %v4413_v18 }
 0x3a1   : > { %v4883_v43 = vrot.slane %v4882_v52, 1 }
 0x3a2   : > { %5587 = shalt.err (!%p5584_p3)
}
 0x3a3   : > { %s5588_s6 = scalar_lea.hbm %s8613_s14, 16  ;;  %s5592_s12 = scalar_lea.hbm %s8719_s3, 32 }
 0x3a4   : > { %p5589_p4 = scmp.ne.s32.totalorder %s8613_s14, %s5588_s6  ;;  %p5593_p9 = scmp.lt.s32.totalorder %s8613_s14, %s8719_s3 }
 0x3a5   : > { %p5594_p10 = scmp.lt.s32.totalorder %s5592_s12, %s5588_s6 }
 0x3a6   : > { %p5590_p7 = pnand %p5589_p4, %p5775_p5 }
 0x3a7   : > { %p5595_p11 = por %p5594_p10, %p5593_p9 }
 0x3a8   : > { %p5591_p8 = pneg %p5590_p7 }
 0x3aa   : > { %p5596_p12 = pnand %p5595_p11, %p5591_p8 }
 0x3ac   : > { %5599 = shalt.err (!%p5596_p12)
}
 0x3ad   : > { %5511 = dma.vmem_to_hbm [thread:$0]  (%p5775_p5), %s8615_s11, 16, %s8613_s14, %s8623_s27   ;;  %v4884_v16 = vadd.f32 %v4883_v43, %v4882_v52 }
 0x3ae   : > { %s4932_s5 = scalar_lea.hbm %s8720_s4, %s5415_s9  ;;  %s5600_s6 = scalar_lea.vmem %s4935_s23, 16 }
 0x3af   : > { %4885 = vst.msk [vmem:[%s206_s22] sm:$0x1] %vm4414_vm1, %v4884_v16  ;;  %p5601_p13 = scmp.ne.s32.totalorder %s4935_s23, %s5600_s6  ;;  %s5708_s8 = smov [#allocation6]  }
 0x3b0   : > { %s5604_s10 = sshll.u32 %s5708_s8, 4  ;;  %s5605_s10 = int_to_ptr.vmem [resolvable:$false] %s5604_s10 }
 0x3b1   : > { %p5602_p0 = pnand %p5601_p13, %p5775_p5  ;;  %s5606_s12 = scalar_lea.vmem %s5605_s10, 32 }
 0x3b2   : > { %p5607_p2 = scmp.lt.s32.totalorder %s4935_s23, %s5605_s10  ;;  %p5608_p3 = scmp.lt.s32.totalorder %s5606_s12, %s5600_s6 }
 0x3b3   : > { %p5603_p1 = pneg %p5602_p0 }
 0x3b4   : > { %p5609_p4 = por %p5608_p3, %p5607_p2 }
 0x3b6   : > { %p5610_p7 = pnand %p5609_p4, %p5603_p1 }
 0x3b8   : > { %5613 = shalt.err (!%p5610_p7)
}
 0x3b9   : > { %s5614_s9 = scalar_lea.hbm %s4932_s5, 16  ;;  %s5618_s22 = scalar_lea.hbm %s8720_s4, 32 }
 0x3ba   : > { %p5615_p8 = scmp.ne.s32.totalorder %s4932_s5, %s5614_s9  ;;  %p5619_p11 = scmp.lt.s32.totalorder %s4932_s5, %s8720_s4 }
 0x3bb   : > { %p5620_p12 = scmp.lt.s32.totalorder %s5618_s22, %s5614_s9 }
 0x3bc   : > { %p5616_p9 = pnand %p5615_p8, %p5775_p5 }
 0x3bd   : > { %p5621_p13 = por %p5620_p12, %p5619_p11 }
 0x3be   : > { %p5617_p10 = pneg %p5616_p9 }
 0x3c0   : > { %p5622_p0 = pnand %p5621_p13, %p5617_p10 }
 0x3c2   : > { %5625 = shalt.err (!%p5622_p0)
}
 0x3c3   : > { %5512 = dma.vmem_to_hbm [thread:$0]  (%p5775_p5), %s4935_s23, 16, %s4932_s5, %s8623_s27   ;;  %vm4061_vm2 = vcmask 97280   ;;  %vm4063_vm3 = vcmask 130048   ;;  %vm4065_vm5 = vcmask 162816   ;;  %vm4067_vm6 = vcmask 195584  }
 0x3c4   : > { %s5050_s28 = sshll.u32 %s8603_s7, 3  ;;  %s5414_s23 = sshll.u32 %s5756_s19, 7  ;;  %vm4071_vm7 = vcmask 261120  }
 0x3c5   : > { %s194_s27 = scalar_lea.vmem [#allocation2], %s5050_s28  ;;  %s8678_s8 = scalar_lea.hbm %s8718_s2, %s5414_s23 }
 0x3c6   : > { %s4908_s30 = sshll.u32 %s194_s27, 4  ;;  %s4887_s10 = scalar_lea.sflag [#allocation3], %s8603_s7  ;;  %s4909_s30 = int_to_ptr.vmem [resolvable:$true] %s4908_s30 }
 0x3c7   : > { %s5626_s12 = scalar_lea.vmem %s4909_s30, 128  ;;  %s5709_s19 = smov [#allocation2]  }
 0x3c8   : > { %p5627_p1 = scmp.ne.s32.totalorder %s4909_s30, %s5626_s12  ;;  %s5630_s9 = sshll.u32 %s5709_s19, 4  ;;  %s5631_s9 = int_to_ptr.vmem [resolvable:$false] %s5630_s9 }
 0x3c9   : > { %s5632_s11 = scalar_lea.vmem %s5631_s9, 256  ;;  %p5633_p4 = scmp.lt.s32.totalorder %s4909_s30, %s5631_s9 }
 0x3ca   : > { %p5628_p2 = pnand %p5627_p1, %p5775_p5  ;;  %p5634_p7 = scmp.lt.s32.totalorder %s5632_s11, %s5626_s12 }
 0x3cc   : > { %p5629_p3 = pneg %p5628_p2  ;;  %p5635_p8 = por %p5634_p7, %p5633_p4 }
 0x3ce   : > { %p5636_p9 = pnand %p5635_p8, %p5629_p3 }
 0x3f3   : > { %v3913_v58 = vpop.permute.xlu0 %3912 }
 0x3f4   : > { %v4059_v42 = vsel %vm1625_vm4, %v3889_v63, %v3913_v58  ;;  %v3937_v0 = vpop.permute.xlu1 %3936  ;;  %vm4069_vm4 = vcmask 228352  }
 0x3f5   : > { %v4060_v54 = vsel %vm1757_vm8, %v4059_v42, %v3937_v0 }
 0x3f7   : > { %v3961_v57 = vpop.permute.xlu0 %3960 }
 0x3f8   : > { %v4062_v23 = vsel %vm4061_vm2, %v4060_v54, %v3961_v57  ;;  %v3985_v26 = vpop.permute.xlu1 %3984 }
 0x3f9   : > { %v4064_v39 = vsel %vm4063_vm3, %v4062_v23, %v3985_v26 }
 0x3fb   : > { %v4009_v32 = vpop.permute.xlu0 %4008 }
 0x3fc   : > { %v4066_v9 = vsel %vm4065_vm5, %v4064_v39, %v4009_v32 }
 0x3fe   : > { %v4033_v59 = vpop.permute.xlu1 %4032 }
 0x3ff   : > { %v4068_v5 = vsel %vm4067_vm6, %v4066_v9, %v4033_v59  ;;  %v4057_v63 = vpop.permute.xlu0 %4056 }
 0x400   : > { %v4070_v45 = vsel %vm4069_vm4, %v4068_v5, %v4057_v63 }
 0x401   : > { %4072 = vst.msk [vmem:[%s194_s27] sm:$0xff] %vm4071_vm7, %v4070_v45 }
 0x402   : > { %5639 = shalt.err (!%p5636_p9)
}
 0x403   : > { %s5640_s14 = scalar_lea.hbm %s8678_s8, 128  ;;  %s5644_s13 = scalar_lea.hbm %s8718_s2, 256 }
 0x404   : > { %p5641_p10 = scmp.ne.s32.totalorder %s8678_s8, %s5640_s14  ;;  %p5645_p13 = scmp.lt.s32.totalorder %s8678_s8, %s8718_s2 }
 0x405   : > { %p5646_p0 = scmp.lt.s32.totalorder %s5644_s13, %s5640_s14 }
 0x406   : > { %p5642_p11 = pnand %p5641_p10, %p5775_p5 }
 0x407   : > { %p5647_p1 = por %p5646_p0, %p5645_p13 }
 0x408   : > { %p5643_p12 = pneg %p5642_p11 }
 0x40a   : > { %p5648_p2 = pnand %p5647_p1, %p5643_p12 }
 0x40c   : > { %5651 = shalt.err (!%p5648_p2)
}
 0x40d   : > { %5510 = dma.vmem_to_hbm [thread:$0]  (%p5775_p5), %s4909_s30, 128, %s8678_s8, %s4887_s10  }
 0x40e PF: > { %p5526_p3 = scmp.ge.s32.totalorder %s5690_s18, 2  ;;  %s4946_s23 = sand.u32 1, %s5678_s15  }
 0x40f   : > { %s4947_s27 = scalar_lea.sflag [#allocation3], %s4946_s23 }
 0x410   : > { %p5517_p4 = pnand %p5526_p3, %p5779_p6 }
 0x412   : > { %p5518_p7 = pneg %p5517_p4 }
 0x414   : > { %5669 = dma.done.wait (%p5518_p7), %s4947_s27, 128  }
 0x415   : > { %5671 = vsyncadd (%p5518_p7), %s4947_s27, 4294967168  ;;  %s4955_s5 = sand.u32 1, %s5046_s20  }
 0x416   : > { %s4956_s6 = scalar_lea.sflag [#allocation5], %s4955_s5 }
 0x417   : > { %5673 = dma.done.wait (%p5518_p7), %s4956_s6, 32  }
 0x418   : > { %5675 = vsyncadd (%p5518_p7), %s4956_s6, 4294967264  ;;  %p18_p5 = scmp.ge.s32.totalorder %s5760_s21, 4   ;;  %s8897_s15 = smov %s5682_s16 }
 0x419   : > { %s8898_s16 = smov %s5686_s17  ;;  %s8899_s17 = smov %s5773_s24 }
 0x41a   : > { %s8900_s18 = smov %s5760_s21  ;;  %20 = sbr.rel (!%p18_p5) target bundleno = 5 (0x5), region = 97 }
 0x41f   :  { %4968 = vsyncpa [#allocation3], 1 }
 0x420   :  { %4970 = vsyncpa [#allocation3 + $0x1], 1 }
 0x421   :  { %4971 = vsyncpa [#allocation5], 1 }
 0x422   :  { %4973 = vsyncpa [#allocation5 + $0x1], 1 }

</bundles_post_ra>
